<compile_context>
chip_gen: v5e
topology: v5e:2x2
jax: 0.10.0
libtpu: 0.0.40
codegen_flags: <defaults>
</compile_context>

<pallas_src>
import functools

import jax
import jax.numpy as jnp
import numpy as np
from jax.experimental import pallas as pl
from jax.experimental.pallas import tpu as pltpu


def _round_up(x, m):
    return ((x + m - 1) // m) * m


# ---------------- math helpers ----------------

def _silu(x):
    return x * jax.nn.sigmoid(x)


def _gelu(x, approx=False):
    if approx:
        # tanh approximation (EUP-heavy); enable only if torch-parity tolerance allows
        c = jnp.float32(0.7978845608028654)  # sqrt(2/pi)
        return 0.5 * x * (1.0 + jnp.tanh(c * (x + 0.044715 * x * x * x)))
    # exact erf-based GELU, matching torch.nn.GELU default
    return 0.5 * x * (1.0 + jax.lax.erf(x * jnp.float32(0.7071067811865476)))


def _softplus(x):
    return jnp.maximum(x, 0.0) + jnp.log1p(jnp.exp(-jnp.abs(x)))


def _layernorm_ref(x, eps=1e-5):
    m = jnp.mean(x, axis=-1, keepdims=True)
    v = jnp.mean((x - m) ** 2, axis=-1, keepdims=True)
    return (x - m) * jax.lax.rsqrt(v + eps)


# ---------------- padded geometry ----------------

def _padded_dims(dim, depth, expansion, input_dim):
    hid = dim * expansion
    head_hid = 2 * dim
    dp = _round_up(dim, 128)            # lane-aligned "dim" segment
    hp = _round_up(hid, 128)            # lane-aligned MLP hidden segment
    hhp = _round_up(head_hid, 128)      # lane-aligned head hidden segment
    op = _round_up(input_dim + 1, 128)  # lane-dense merged (mu | kappa) output
    ada_w = (3 * depth + 2) * dp        # fused AdaLN modulation width
    width = ada_w + depth * hp + 2 * hhp
    return dict(hid=hid, head_hid=head_hid, dp=dp, hp=hp, hhp=hhp, op=op,
                ada_w=ada_w, width=width)


# ---------------- Pallas kernel ----------------

def _forward_kernel(emb_ref, Wc_ref, Wdim_ref, Wmid_ref, Whead_ref, bias_ref, out_ref,
                    *, dim, depth, input_dim, dp, hp, hhp, op, use_tanh_gelu):
    f32 = jnp.float32
    mm = Wdim_ref.dtype                    # matmul operand dtype (bf16 or f32)
    ada_w = (3 * depth + 2) * dp
    inv_n = jnp.float32(1.0 / dim)

    emb = emb_ref[...]
    B = emb.shape[0]

    def brow(r, w):
        # one packed bias row as a (1, w) lane vector (static, lane-aligned slice)
        return bias_ref[r:r + 1, 0:w]

    def ln(x):
        # single-pass LayerNorm statistics; padded lanes of x are exactly zero,
        # so sums over dp lanes equal sums over the dim real lanes.
        s1 = jnp.sum(x, axis=-1, keepdims=True)
        s2 = jnp.sum(x * x, axis=-1, keepdims=True)
        mean = s1 * inv_n
        var = s2 * inv_n - mean * mean
        return (x - mean) * jax.lax.rsqrt(var + 1e-5)

    gelu = functools.partial(_gelu, approx=use_tanh_gelu)

    # cond = SiLU(cond_mapper(emb)); padded lanes stay exactly zero.
    cond = jnp.dot(emb.astype(mm), Wc_ref[...], preferred_element_type=f32) + brow(0, dp)
    cond_silu = _silu(cond)

    # residual stream initialised from init_registers (zero in padded lanes)
    x = jnp.broadcast_to(brow(1, dp), (B, dp))

    # Single fused MXU pass for every AdaLN modulation (all blocks + final AdaLN).
    ada_all = (jnp.dot(cond_silu.astype(mm), Wdim_ref[:, 0:ada_w],
                       preferred_element_type=f32) + brow(2, ada_w))

    # AdaLN MLP blocks (static unrolled; serial by construction)
    for d in range(depth):
        base = 3 * dp * d                              # lane-aligned chunk starts
        gamma = ada_all[:, base:base + dp]
        mu_b = ada_all[:, base + dp:base + 2 * dp]
        sigma = ada_all[:, base + 2 * dp:base + 3 * dp]

        x_res = (1.0 + gamma) * ln(x) + mu_b

        w1_off = ada_w + d * hp
        h = gelu(jnp.dot(x_res.astype(mm), Wdim_ref[:, w1_off:w1_off + hp],
                         preferred_element_type=f32) + brow(3 + d, hp))
        mlp = (jnp.dot(h.astype(mm), Wmid_ref[d], preferred_element_type=f32)
               + brow(3 + depth + d, dp))
        x = x + mlp * sigma                            # padded lanes remain zero

    # final AdaLN (modulation already in ada_all)
    fbase = 3 * dp * depth
    gamma_l = ada_all[:, fbase:fbase + dp]
    mu_l = ada_all[:, fbase + dp:fbase + 2 * dp]
    x = (1.0 + gamma_l) * ln(x) + mu_l

    # Fused mu / kappa heads:
    #   layer 1: x @ [mW1 | kW1] -> GELU      (each half padded to hhp lanes)
    #   layer 2: block-diagonal composed weight (mW2@mWo ⊕ kW2@kWo), 128-lane wide
    h1_off = ada_w + depth * hp
    h = gelu(jnp.dot(x.astype(mm), Wdim_ref[:, h1_off:h1_off + 2 * hhp],
                     preferred_element_type=f32) + brow(3 + 2 * depth, 2 * hhp))
    head = (jnp.dot(h.astype(mm), Whead_ref[...], preferred_element_type=f32)
            + brow(4 + 2 * depth, op))                 # (B, op): mu | kappa | zero-pad

    lane = jax.lax.broadcasted_iota(jnp.int32, head.shape, 1)
    is_mu = lane < input_dim
    norm_sq = jnp.sum(jnp.where(is_mu, head * head, 0.0), axis=-1, keepdims=True)
    inv_norm = jax.lax.rsqrt(jnp.maximum(norm_sq, 1e-24))   # EUP rsqrt; clamp avoids NaN
    # lane-dense 128-wide store; wrapper slices out mu / kappa
    out_ref[...] = jnp.where(is_mu, head * inv_norm, _softplus(head))


# ---------------- parameter packing (done once, outside the kernel) ----------------

def pack_params(p, *, dim, depth, expansion, input_dim, weights_dtype=jnp.bfloat16):
    f32 = jnp.float32
    g = _padded_dims(dim, depth, expansion, input_dim)
    hid, head_hid = g["hid"], g["head_hid"]
    dp, hp, hhp, op, ada_w = g["dp"], g["hp"], g["hhp"], g["op"], g["ada_w"]

    def pad2(w, rows, cols):
        w = jnp.asarray(w, f32)
        return jnp.pad(w, ((0, rows - w.shape[0]), (0, cols - w.shape[1])))

    # cond_mapper weight, cols padded to dp
    Wc = pad2(p["Wc"], p["Wc"].shape[0], dp)

    # Column-packed slab of every weight whose left operand lives in dp lanes.
    # Every logical segment is padded to a multiple of 128 lanes.
    cols = []
    for d in range(depth):
        aw = jnp.asarray(p["adaW"][d], f32)            # (dim, 3*dim)
        for c in range(3):                             # gamma | mu | sigma chunks
            cols.append(pad2(aw[:, c * dim:(c + 1) * dim], dp, dp))
    wf = jnp.asarray(p["Wf"], f32)                     # (dim, 2*dim)
    cols.append(pad2(wf[:, :dim], dp, dp))             # gamma_last
    cols.append(pad2(wf[:, dim:], dp, dp))             # mu_last
    for d in range(depth):
        cols.append(pad2(p["W1"][d], dp, hp))
    cols.append(pad2(p["mW1"], dp, hhp))
    cols.append(pad2(p["kW1"], dp, hhp))
    Wdim = jnp.concatenate(cols, axis=1)
    assert Wdim.shape == (dp, g["width"])

    # per-block second MLP weights, stacked
    Wmid = jnp.stack([pad2(p["W2"][d], hp, dp) for d in range(depth)], axis=0)

    # composed head output weight (block-diagonal), only 128 lanes wide
    mu_out = jnp.asarray(p["mW2"], f32) @ jnp.asarray(p["mWo"], f32)   # (head_hid, input_dim)
    ka_out = jnp.asarray(p["kW2"], f32) @ jnp.asarray(p["kWo"], f32)   # (head_hid, 1)
    Whead = jnp.zeros((2 * hhp, op), f32)
    Whead = Whead.at[:head_hid, :input_dim].set(mu_out)
    Whead = Whead.at[hhp:hhp + head_hid, input_dim:input_dim + 1].set(ka_out)

    # bias pack (stays f32): one zero-padded row per bias vector
    bw = max(ada_w, hp, 2 * hhp, dp, op)

    def seg(v, w):
        v = jnp.reshape(jnp.asarray(v, f32), (-1,))
        return jnp.pad(v, (0, w - v.shape[0]))

    def row(v):
        return seg(v, bw)

    ada_bias_parts = []
    for d in range(depth):
        ab = jnp.reshape(jnp.asarray(p["adab"][d], f32), (-1,))
        for c in range(3):
            ada_bias_parts.append(seg(ab[c * dim:(c + 1) * dim], dp))
    bf = jnp.reshape(jnp.asarray(p["bf"], f32), (-1,))
    ada_bias_parts.append(seg(bf[:dim], dp))
    ada_bias_parts.append(seg(bf[dim:], dp))
    b_ada = jnp.concatenate(ada_bias_parts)

    b_head1 = jnp.concatenate([seg(p["mb1"], hhp), seg(p["kb1"], hhp)])
    b_mu = (jnp.asarray(p["mb2"], f32) @ jnp.asarray(p["mWo"], f32)
            + jnp.asarray(p["mbo"], f32)).reshape(-1)
    b_ka = (jnp.asarray(p["kb2"], f32) @ jnp.asarray(p["kWo"], f32)
            + jnp.asarray(p["kbo"], f32)).reshape(-1)
    b_head_out = jnp.concatenate([b_mu, b_ka])

    rows = [row(p["bc"]), row(p["reg"]), row(b_ada)]
    rows += [row(p["b1"][d]) for d in range(depth)]
    rows += [row(p["b2"][d]) for d in range(depth)]
    rows += [row(b_head1), row(b_head_out)]
    bias = jnp.stack(rows, axis=0)
    pad_rows = _round_up(bias.shape[0], 8) - bias.shape[0]
    if pad_rows:
        bias = jnp.pad(bias, ((0, pad_rows), (0, 0)))

    wt = weights_dtype
    return {"Wc": Wc.astype(wt), "Wdim": Wdim.astype(wt), "Wmid": Wmid.astype(wt),
            "Whead": Whead.astype(wt), "bias": bias}


# ---------------- batch tiling / resource sizing ----------------

def _choose_tile(B, block_b):
    # >=2 grid steps whenever B allows (feed both v7x TensorCores / pipeline DMAs),
    # tile rows a multiple of 8 sublanes, bounded padding overshoot.
    if B <= 8:
        return 8
    n_tiles = max(2, pl.cdiv(B, block_b))
    tb = _round_up(pl.cdiv(B, n_tiles), 8)
    return max(8, min(tb, _round_up(block_b, 8)))


def _vmem_limit_bytes(packed, tb, cond_dim, pd):
    w_bytes = sum(int(packed[k].size) * packed[k].dtype.itemsize
                  for k in ("Wc", "Wdim", "Wmid", "Whead"))
    b_bytes = int(packed["bias"].size) * packed["bias"].dtype.itemsize
    act = tb * (cond_dim + 4 * pd["dp"] + pd["ada_w"]
                + max(pd["hp"], 2 * pd["hhp"]) + pd["op"]) * 4
    est = 2 * w_bytes + 2 * b_bytes + 4 * act + (8 << 20)   # generous margin
    return int(min(64 << 20, est))                           # safe for v7x's 64 MiB


# ---------------- wrapper ----------------

def geo_adaln_mlp_vonfisher(emb, params, *, dim, depth, expansion, input_dim,
                            block_b=256, weights_dtype=jnp.bfloat16,
                            use_tanh_gelu=False):
    """emb: (B, cond_dim) float32 -> (mu (B, input_dim), kappa (B, 1)).

    Note: on v5e prefer block_b=128 and weights_dtype=jnp.float32 if strict parity
    with an f32 reference is needed.
    """
    pd = _padded_dims(dim, depth, expansion, input_dim)
    packed = pack_params(params, dim=dim, depth=depth, expansion=expansion,
                         input_dim=input_dim, weights_dtype=weights_dtype)

    B, cond_dim = emb.shape
    tb = _choose_tile(B, block_b)
    B_pad = _round_up(B, tb)
    emb_p = emb.astype(jnp.float32)
    if B_pad != B:
        emb_p = jnp.pad(emb_p, ((0, B_pad - B), (0, 0)))
    grid = (B_pad // tb,)

    vmem_limit = _vmem_limit_bytes(packed, tb, cond_dim, pd)

    flops_row = (2 * cond_dim * pd["dp"] + 2 * pd["dp"] * pd["ada_w"]
                 + depth * 4 * pd["dp"] * pd["hp"]
                 + 4 * pd["dp"] * pd["hhp"] + 4 * pd["hhp"] * pd["op"])
    transc_row = pd["dp"] + depth * pd["hp"] + 2 * pd["hhp"] + pd["op"] + 2
    bytes_w = sum(int(packed[k].size) * packed[k].dtype.itemsize for k in packed)
    cost = pl.CostEstimate(flops=int(B_pad * flops_row),
                           transcendentals=int(B_pad * transc_row),
                           bytes_accessed=int(bytes_w + emb_p.size * 4
                                              + B_pad * pd["op"] * 4))

    kernel = functools.partial(_forward_kernel, dim=dim, depth=depth,
                               input_dim=input_dim, dp=pd["dp"], hp=pd["hp"],
                               hhp=pd["hhp"], op=pd["op"],
                               use_tanh_gelu=use_tanh_gelu)

    def run(single_buffer):
        def wspec(arr):
            imap = (lambda i: (0, 0)) if arr.ndim == 2 else (lambda i: (0, 0, 0))
            if single_buffer:
                # constant index_map -> one VMEM copy is enough
                return pl.BlockSpec(arr.shape, imap, pipeline_mode=pl.Buffered(1))
            return pl.BlockSpec(arr.shape, imap)

        return pl.pallas_call(
            kernel,
            grid=grid,
            in_specs=[
                pl.BlockSpec((tb, cond_dim), lambda i: (i, 0)),
                wspec(packed["Wc"]),
                wspec(packed["Wdim"]),
                wspec(packed["Wmid"]),
                wspec(packed["Whead"]),
                wspec(packed["bias"]),
            ],
            out_specs=pl.BlockSpec((tb, pd["op"]), lambda i: (i, 0)),
            out_shape=jax.ShapeDtypeStruct((B_pad, pd["op"]), jnp.float32),
            compiler_params=pltpu.CompilerParams(
                dimension_semantics=("parallel",),
                vmem_limit_bytes=vmem_limit),
            cost_estimate=cost,
        )(emb_p, packed["Wc"], packed["Wdim"], packed["Wmid"],
          packed["Whead"], packed["bias"])

    try:
        out = run(single_buffer=True)
    except Exception:
        # pl.Buffered(1) not supported by this jax/libtpu combo -> default buffering
        out = run(single_buffer=False)

    mu = out[:B, :input_dim]
    kappa = out[:B, input_dim:input_dim + 1]
    return mu, kappa


# ---------------- pure-JAX reference (unfused, for validation) ----------------

def reference_forward(emb, p):
    dim = p["reg"].shape[1]
    cond = emb @ p["Wc"] + p["bc"]
    cond_silu = _silu(cond)
    x = jnp.broadcast_to(p["reg"], (emb.shape[0], dim))
    for d in range(p["adaW"].shape[0]):
        ada = cond_silu @ p["adaW"][d] + p["adab"][d]
        gamma, mu_b, sigma = ada[:, :dim], ada[:, dim:2 * dim], ada[:, 2 * dim:]
        x_res = (1.0 + gamma) * _layernorm_ref(x) + mu_b
        h = _gelu(x_res @ p["W1"][d] + p["b1"][d])
        x = x + (h @ p["W2"][d] + p["b2"][d]) * sigma
    fin = cond_silu @ p["Wf"] + p["bf"]
    gamma_l, mu_l = fin[:, :dim], fin[:, dim:]
    x = (1.0 + gamma_l) * _layernorm_ref(x) + mu_l
    h = _gelu(x @ p["mW1"] + p["mb1"])
    h = h @ p["mW2"] + p["mb2"]
    mu = h @ p["mWo"] + p["mbo"]
    mu = mu / jnp.sqrt(jnp.sum(mu * mu, axis=-1, keepdims=True))
    h = _gelu(x @ p["kW1"] + p["kb1"])
    h = h @ p["kW2"] + p["kb2"]
    kappa = _softplus(h @ p["kWo"] + p["kbo"])
    return mu, kappa


# ---------------- deterministic parameter construction ----------------

def make_params(key, *, input_dim, dim, depth, expansion, cond_dim):
    keys = jax.random.split(key, 32)
    it = iter(keys)

    def rnd(shape, scale=0.05):
        return (scale * jax.random.normal(next(it), shape)).astype(jnp.float32)

    hid = dim * expansion
    head_hid = dim * 2
    return {
        "Wc": rnd((cond_dim, dim)),
        "bc": rnd((1, dim)),
        "reg": rnd((1, dim), scale=0.02),          # init_registers
        "adaW": rnd((depth, dim, 3 * dim)),
        "adab": rnd((depth, 1, 3 * dim)),
        "W1": rnd((depth, dim, hid)),
        "b1": rnd((depth, 1, hid)),
        "W2": rnd((depth, hid, dim)),
        "b2": rnd((depth, 1, dim)),
        "Wf": rnd((dim, 2 * dim)),
        "bf": rnd((1, 2 * dim)),
        "mW1": rnd((dim, head_hid)),
        "mb1": rnd((1, head_hid)),
        "mW2": rnd((head_hid, dim)),
        "mb2": rnd((1, dim)),
        "mWo": rnd((dim, input_dim)),
        "mbo": rnd((1, input_dim)),
        "kW1": rnd((dim, head_hid)),
        "kb1": rnd((1, head_hid)),
        "kW2": rnd((head_hid, dim)),
        "kb2": rnd((1, dim)),
        "kWo": rnd((dim, 1)),
        "kbo": rnd((1, 1)),
    }


if __name__ == "__main__":
    # small shapes consistent with the module
    B, cond_dim, dim, depth, expansion, input_dim = 8, 16, 32, 2, 4, 3

    key = jax.random.PRNGKey(0)
    k_emb, k_par = jax.random.split(key)
    params = make_params(k_par, input_dim=input_dim, dim=dim, depth=depth,
                         expansion=expansion, cond_dim=cond_dim)
    emb = jax.random.normal(k_emb, (B, cond_dim), dtype=jnp.float32)

    mu_ref, kappa_ref = reference_forward(emb, params)

    # --- f32 matmul operands: tight parity with the unfused reference ---
    mu32, ka32 = geo_adaln_mlp_vonfisher(emb, params, dim=dim, depth=depth,
                                         expansion=expansion, input_dim=input_dim,
                                         weights_dtype=jnp.float32)
    jax.block_until_ready((mu32, ka32))
    assert mu32.shape == (B, input_dim) and ka32.shape == (B, 1)
    assert np.all(np.isfinite(np.asarray(mu32))) and np.all(np.isfinite(np.asarray(ka32)))
    np.testing.assert_allclose(np.asarray(mu32), np.asarray(mu_ref), atol=2e-3, rtol=2e-3)
    np.testing.assert_allclose(np.asarray(ka32), np.asarray(kappa_ref), atol=2e-3, rtol=2e-3)
    np.testing.assert_allclose(np.linalg.norm(np.asarray(mu32), axis=-1), 1.0, atol=1e-4)

    # --- bf16 matmul operands (default; MXU-native on v6e/v7x): looser tolerance ---
    mu16, ka16 = geo_adaln_mlp_vonfisher(emb, params, dim=dim, depth=depth,
                                         expansion=expansion, input_dim=input_dim)
    jax.block_until_ready((mu16, ka16))
    assert mu16.shape == (B, input_dim) and ka16.shape == (B, 1)
    assert np.all(np.isfinite(np.asarray(mu16))) and np.all(np.isfinite(np.asarray(ka16)))
    np.testing.assert_allclose(np.asarray(mu16), np.asarray(mu_ref), atol=3e-2, rtol=3e-2)
    np.testing.assert_allclose(np.asarray(ka16), np.asarray(kappa_ref), atol=3e-2, rtol=3e-2)
    np.testing.assert_allclose(np.linalg.norm(np.asarray(mu16), axis=-1), 1.0, atol=1e-4)
    assert np.all(np.asarray(ka16) > 0.0)

    print("KERNEL_OK")
</pallas_src>

<mosaic_0001>
module attributes {stable_mosaic.version = 11 : i64} {
  func.func @_forward_kernel(%arg0: i32, %arg1: memref<8x16xf32, #tpu.memory_space<vmem>>, %arg2: memref<16x128xf32, #tpu.memory_space<vmem>>, %arg3: memref<128x1536xf32, #tpu.memory_space<vmem>>, %arg4: memref<2x128x128xf32, #tpu.memory_space<vmem>>, %arg5: memref<256x128xf32, #tpu.memory_space<vmem>>, %arg6: memref<16x1024xf32, #tpu.memory_space<vmem>>, %arg7: memref<8x128xf32, #tpu.memory_space<vmem>>) attributes {dimension_semantics = [#tpu.dimension_semantics<parallel>], iteration_bounds = array<i64: 1>, scalar_prefetch = 0 : i64, scratch_operands = 0 : i64, tpu.core_type = #tpu.core_type<tc>, window_params = [{transform_indices = @transform_0, window_bounds = array<i64: 8, 16>}, {pipeline_mode = #tpu.pipeline_mode<synchronous>, transform_indices = @transform_1, window_bounds = array<i64: 16, 128>}, {pipeline_mode = #tpu.pipeline_mode<synchronous>, transform_indices = @transform_2, window_bounds = array<i64: 128, 1536>}, {pipeline_mode = #tpu.pipeline_mode<synchronous>, transform_indices = @transform_3, window_bounds = array<i64: 2, 128, 128>}, {pipeline_mode = #tpu.pipeline_mode<synchronous>, transform_indices = @transform_4, window_bounds = array<i64: 256, 128>}, {pipeline_mode = #tpu.pipeline_mode<synchronous>, transform_indices = @transform_5, window_bounds = array<i64: 16, 1024>}, {transform_indices = @transform_6, window_bounds = array<i64: 8, 128>}]} {
    %c0 = arith.constant 0 : index
    %c0_0 = arith.constant 0 : index
    %0 = vector.load %arg1[%c0, %c0_0] : memref<8x16xf32, #tpu.memory_space<vmem>>, vector<8x16xf32>
    %c0_1 = arith.constant 0 : index
    %c0_2 = arith.constant 0 : index
    %1 = vector.load %arg2[%c0_1, %c0_2] : memref<16x128xf32, #tpu.memory_space<vmem>>, vector<16x128xf32>
    %cst = arith.constant dense<0.000000e+00> : vector<8x128xf32>
    %2 = tpu.matmul %0, %1, %cst {dimension_numbers = #tpu.dot_dimension_numbers<[1], [0], [0], [1], [0, 0, 1, 1], [], []>} : vector<8x16xf32>, vector<16x128xf32>, vector<8x128xf32> -> vector<8x128xf32>
    %c0_3 = arith.constant 0 : index
    %c0_4 = arith.constant 0 : index
    %3 = vector.load %arg6[%c0_3, %c0_4] : memref<16x1024xf32, #tpu.memory_space<vmem>>, vector<1x128xf32>
    %4 = vector.broadcast %3 : vector<1x128xf32> to vector<8x128xf32>
    %5 = arith.addf %2, %4 : vector<8x128xf32>
    %6 = arith.negf %5 : vector<8x128xf32>
    %7 = math.exp %6 : vector<8x128xf32>
    %cst_5 = arith.constant 1.000000e+00 : f32
    %8 = vector.broadcast %cst_5 : f32 to vector<8x128xf32>
    %9 = arith.addf %8, %7 : vector<8x128xf32>
    %10 = arith.divf %8, %9 : vector<8x128xf32>
    %11 = arith.mulf %5, %10 : vector<8x128xf32>
    %c1 = arith.constant 1 : index
    %c0_6 = arith.constant 0 : index
    %12 = vector.load %arg6[%c1, %c0_6] : memref<16x1024xf32, #tpu.memory_space<vmem>>, vector<1x128xf32>
    %13 = vector.shape_cast %12 : vector<1x128xf32> to vector<1x128xf32>
    %14 = vector.broadcast %13 : vector<1x128xf32> to vector<8x128xf32>
    %c0_7 = arith.constant 0 : index
    %c0_8 = arith.constant 0 : index
    %15 = vector.load %arg3[%c0_7, %c0_8] : memref<128x1536xf32, #tpu.memory_space<vmem>>, vector<128x1024xf32>
    %cst_9 = arith.constant dense<0.000000e+00> : vector<8x1024xf32>
    %16 = tpu.matmul %11, %15, %cst_9 {dimension_numbers = #tpu.dot_dimension_numbers<[1], [0], [0], [1], [0, 0, 1, 1], [], []>} : vector<8x128xf32>, vector<128x1024xf32>, vector<8x1024xf32> -> vector<8x1024xf32>
    %c2 = arith.constant 2 : index
    %c0_10 = arith.constant 0 : index
    %17 = vector.load %arg6[%c2, %c0_10] : memref<16x1024xf32, #tpu.memory_space<vmem>>, vector<1x1024xf32>
    %18 = vector.broadcast %17 : vector<1x1024xf32> to vector<8x1024xf32>
    %19 = arith.addf %16, %18 : vector<8x1024xf32>
    %20 = vector.extract_strided_slice %19 {offsets = [0, 0], sizes = [8, 128], strides = [1, 1]} : vector<8x1024xf32> to vector<8x128xf32>
    %21 = vector.extract_strided_slice %19 {offsets = [0, 128], sizes = [8, 128], strides = [1, 1]} : vector<8x1024xf32> to vector<8x128xf32>
    %22 = vector.extract_strided_slice %19 {offsets = [0, 256], sizes = [8, 128], strides = [1, 1]} : vector<8x1024xf32> to vector<8x128xf32>
    %cst_11 = arith.constant 1.000000e+00 : f32
    %23 = vector.broadcast %cst_11 : f32 to vector<8x128xf32>
    %24 = arith.addf %23, %20 : vector<8x128xf32>
    %cst_12 = arith.constant dense<0.000000e+00> : vector<8xf32>
    %25 = vector.multi_reduction <add>, %14, %cst_12 [1] : vector<8x128xf32> to vector<8xf32>
    %26 = vector.shape_cast %25 : vector<8xf32> to vector<8x1xf32>
    %27 = arith.mulf %14, %14 : vector<8x128xf32>
    %cst_13 = arith.constant dense<0.000000e+00> : vector<8xf32>
    %28 = vector.multi_reduction <add>, %27, %cst_13 [1] : vector<8x128xf32> to vector<8xf32>
    %29 = vector.shape_cast %28 : vector<8xf32> to vector<8x1xf32>
    %cst_14 = arith.constant 3.125000e-02 : f32
    %30 = vector.broadcast %cst_14 : f32 to vector<8x1xf32>
    %31 = arith.mulf %26, %30 : vector<8x1xf32>
    %cst_15 = arith.constant 3.125000e-02 : f32
    %32 = vector.broadcast %cst_15 : f32 to vector<8x1xf32>
    %33 = arith.mulf %29, %32 : vector<8x1xf32>
    %34 = arith.mulf %31, %31 : vector<8x1xf32>
    %35 = arith.subf %33, %34 : vector<8x1xf32>
    %36 = vector.broadcast %31 : vector<8x1xf32> to vector<8x128xf32>
    %37 = arith.subf %14, %36 : vector<8x128xf32>
    %cst_16 = arith.constant 9.99999974E-6 : f32
    %38 = vector.broadcast %cst_16 : f32 to vector<8x1xf32>
    %39 = arith.addf %35, %38 : vector<8x1xf32>
    %40 = math.rsqrt %39 : vector<8x1xf32>
    %41 = vector.broadcast %40 : vector<8x1xf32> to vector<8x128xf32>
    %42 = arith.mulf %37, %41 : vector<8x128xf32>
    %43 = arith.mulf %24, %42 : vector<8x128xf32>
    %44 = arith.addf %43, %21 : vector<8x128xf32>
    %c0_17 = arith.constant 0 : index
    %c1024 = arith.constant 1024 : index
    %45 = vector.load %arg3[%c0_17, %c1024] : memref<128x1536xf32, #tpu.memory_space<vmem>>, vector<128x128xf32>
    %cst_18 = arith.constant dense<0.000000e+00> : vector<8x128xf32>
    %46 = tpu.matmul %44, %45, %cst_18 {dimension_numbers = #tpu.dot_dimension_numbers<[1], [0], [0], [1], [0, 0, 1, 1], [], []>} : vector<8x128xf32>, vector<128x128xf32>, vector<8x128xf32> -> vector<8x128xf32>
    %c3 = arith.constant 3 : index
    %c0_19 = arith.constant 0 : index
    %47 = vector.load %arg6[%c3, %c0_19] : memref<16x1024xf32, #tpu.memory_space<vmem>>, vector<1x128xf32>
    %48 = vector.broadcast %47 : vector<1x128xf32> to vector<8x128xf32>
    %49 = arith.addf %46, %48 : vector<8x128xf32>
    %cst_20 = arith.constant 5.000000e-01 : f32
    %50 = vector.broadcast %cst_20 : f32 to vector<8x128xf32>
    %51 = arith.mulf %50, %49 : vector<8x128xf32>
    %cst_21 = arith.constant 0.707106769 : f32
    %52 = vector.broadcast %cst_21 : f32 to vector<8x128xf32>
    %53 = arith.mulf %49, %52 : vector<8x128xf32>
    %54 = math.erf %53 : vector<8x128xf32>
    %cst_22 = arith.constant 1.000000e+00 : f32
    %55 = vector.broadcast %cst_22 : f32 to vector<8x128xf32>
    %56 = arith.addf %55, %54 : vector<8x128xf32>
    %57 = arith.mulf %51, %56 : vector<8x128xf32>
    %c0_23 = arith.constant 0 : index
    %c0_24 = arith.constant 0 : index
    %c0_25 = arith.constant 0 : index
    %58 = vector.load %arg4[%c0_23, %c0_24, %c0_25] : memref<2x128x128xf32, #tpu.memory_space<vmem>>, vector<1x128x128xf32>
    %59 = vector.shape_cast %58 : vector<1x128x128xf32> to vector<128x128xf32>
    %cst_26 = arith.constant dense<0.000000e+00> : vector<8x128xf32>
    %60 = tpu.matmul %57, %59, %cst_26 {dimension_numbers = #tpu.dot_dimension_numbers<[1], [0], [0], [1], [0, 0, 1, 1], [], []>} : vector<8x128xf32>, vector<128x128xf32>, vector<8x128xf32> -> vector<8x128xf32>
    %c5 = arith.constant 5 : index
    %c0_27 = arith.constant 0 : index
    %61 = vector.load %arg6[%c5, %c0_27] : memref<16x1024xf32, #tpu.memory_space<vmem>>, vector<1x128xf32>
    %62 = vector.broadcast %61 : vector<1x128xf32> to vector<8x128xf32>
    %63 = arith.addf %60, %62 : vector<8x128xf32>
    %64 = arith.mulf %63, %22 : vector<8x128xf32>
    %65 = arith.addf %14, %64 : vector<8x128xf32>
    %66 = vector.extract_strided_slice %19 {offsets = [0, 384], sizes = [8, 128], strides = [1, 1]} : vector<8x1024xf32> to vector<8x128xf32>
    %67 = vector.extract_strided_slice %19 {offsets = [0, 512], sizes = [8, 128], strides = [1, 1]} : vector<8x1024xf32> to vector<8x128xf32>
    %68 = vector.extract_strided_slice %19 {offsets = [0, 640], sizes = [8, 128], strides = [1, 1]} : vector<8x1024xf32> to vector<8x128xf32>
    %cst_28 = arith.constant 1.000000e+00 : f32
    %69 = vector.broadcast %cst_28 : f32 to vector<8x128xf32>
    %70 = arith.addf %69, %66 : vector<8x128xf32>
    %cst_29 = arith.constant dense<0.000000e+00> : vector<8xf32>
    %71 = vector.multi_reduction <add>, %65, %cst_29 [1] : vector<8x128xf32> to vector<8xf32>
    %72 = vector.shape_cast %71 : vector<8xf32> to vector<8x1xf32>
    %73 = arith.mulf %65, %65 : vector<8x128xf32>
    %cst_30 = arith.constant dense<0.000000e+00> : vector<8xf32>
    %74 = vector.multi_reduction <add>, %73, %cst_30 [1] : vector<8x128xf32> to vector<8xf32>
    %75 = vector.shape_cast %74 : vector<8xf32> to vector<8x1xf32>
    %cst_31 = arith.constant 3.125000e-02 : f32
    %76 = vector.broadcast %cst_31 : f32 to vector<8x1xf32>
    %77 = arith.mulf %72, %76 : vector<8x1xf32>
    %cst_32 = arith.constant 3.125000e-02 : f32
    %78 = vector.broadcast %cst_32 : f32 to vector<8x1xf32>
    %79 = arith.mulf %75, %78 : vector<8x1xf32>
    %80 = arith.mulf %77, %77 : vector<8x1xf32>
    %81 = arith.subf %79, %80 : vector<8x1xf32>
    %82 = vector.broadcast %77 : vector<8x1xf32> to vector<8x128xf32>
    %83 = arith.subf %65, %82 : vector<8x128xf32>
    %cst_33 = arith.constant 9.99999974E-6 : f32
    %84 = vector.broadcast %cst_33 : f32 to vector<8x1xf32>
    %85 = arith.addf %81, %84 : vector<8x1xf32>
    %86 = math.rsqrt %85 : vector<8x1xf32>
    %87 = vector.broadcast %86 : vector<8x1xf32> to vector<8x128xf32>
    %88 = arith.mulf %83, %87 : vector<8x128xf32>
    %89 = arith.mulf %70, %88 : vector<8x128xf32>
    %90 = arith.addf %89, %67 : vector<8x128xf32>
    %c0_34 = arith.constant 0 : index
    %c1152 = arith.constant 1152 : index
    %91 = vector.load %arg3[%c0_34, %c1152] : memref<128x1536xf32, #tpu.memory_space<vmem>>, vector<128x128xf32>
    %cst_35 = arith.constant dense<0.000000e+00> : vector<8x128xf32>
    %92 = tpu.matmul %90, %91, %cst_35 {dimension_numbers = #tpu.dot_dimension_numbers<[1], [0], [0], [1], [0, 0, 1, 1], [], []>} : vector<8x128xf32>, vector<128x128xf32>, vector<8x128xf32> -> vector<8x128xf32>
    %c4 = arith.constant 4 : index
    %c0_36 = arith.constant 0 : index
    %93 = vector.load %arg6[%c4, %c0_36] : memref<16x1024xf32, #tpu.memory_space<vmem>>, vector<1x128xf32>
    %94 = vector.broadcast %93 : vector<1x128xf32> to vector<8x128xf32>
    %95 = arith.addf %92, %94 : vector<8x128xf32>
    %cst_37 = arith.constant 5.000000e-01 : f32
    %96 = vector.broadcast %cst_37 : f32 to vector<8x128xf32>
    %97 = arith.mulf %96, %95 : vector<8x128xf32>
    %cst_38 = arith.constant 0.707106769 : f32
    %98 = vector.broadcast %cst_38 : f32 to vector<8x128xf32>
    %99 = arith.mulf %95, %98 : vector<8x128xf32>
    %100 = math.erf %99 : vector<8x128xf32>
    %cst_39 = arith.constant 1.000000e+00 : f32
    %101 = vector.broadcast %cst_39 : f32 to vector<8x128xf32>
    %102 = arith.addf %101, %100 : vector<8x128xf32>
    %103 = arith.mulf %97, %102 : vector<8x128xf32>
    %c1_40 = arith.constant 1 : index
    %c0_41 = arith.constant 0 : index
    %c0_42 = arith.constant 0 : index
    %104 = vector.load %arg4[%c1_40, %c0_41, %c0_42] : memref<2x128x128xf32, #tpu.memory_space<vmem>>, vector<1x128x128xf32>
    %105 = vector.shape_cast %104 : vector<1x128x128xf32> to vector<128x128xf32>
    %cst_43 = arith.constant dense<0.000000e+00> : vector<8x128xf32>
    %106 = tpu.matmul %103, %105, %cst_43 {dimension_numbers = #tpu.dot_dimension_numbers<[1], [0], [0], [1], [0, 0, 1, 1], [], []>} : vector<8x128xf32>, vector<128x128xf32>, vector<8x128xf32> -> vector<8x128xf32>
    %c6 = arith.constant 6 : index
    %c0_44 = arith.constant 0 : index
    %107 = vector.load %arg6[%c6, %c0_44] : memref<16x1024xf32, #tpu.memory_space<vmem>>, vector<1x128xf32>
    %108 = vector.broadcast %107 : vector<1x128xf32> to vector<8x128xf32>
    %109 = arith.addf %106, %108 : vector<8x128xf32>
    %110 = arith.mulf %109, %68 : vector<8x128xf32>
    %111 = arith.addf %65, %110 : vector<8x128xf32>
    %112 = vector.extract_strided_slice %19 {offsets = [0, 768], sizes = [8, 128], strides = [1, 1]} : vector<8x1024xf32> to vector<8x128xf32>
    %113 = vector.extract_strided_slice %19 {offsets = [0, 896], sizes = [8, 128], strides = [1, 1]} : vector<8x1024xf32> to vector<8x128xf32>
    %cst_45 = arith.constant 1.000000e+00 : f32
    %114 = vector.broadcast %cst_45 : f32 to vector<8x128xf32>
    %115 = arith.addf %114, %112 : vector<8x128xf32>
    %cst_46 = arith.constant dense<0.000000e+00> : vector<8xf32>
    %116 = vector.multi_reduction <add>, %111, %cst_46 [1] : vector<8x128xf32> to vector<8xf32>
    %117 = vector.shape_cast %116 : vector<8xf32> to vector<8x1xf32>
    %118 = arith.mulf %111, %111 : vector<8x128xf32>
    %cst_47 = arith.constant dense<0.000000e+00> : vector<8xf32>
    %119 = vector.multi_reduction <add>, %118, %cst_47 [1] : vector<8x128xf32> to vector<8xf32>
    %120 = vector.shape_cast %119 : vector<8xf32> to vector<8x1xf32>
    %cst_48 = arith.constant 3.125000e-02 : f32
    %121 = vector.broadcast %cst_48 : f32 to vector<8x1xf32>
    %122 = arith.mulf %117, %121 : vector<8x1xf32>
    %cst_49 = arith.constant 3.125000e-02 : f32
    %123 = vector.broadcast %cst_49 : f32 to vector<8x1xf32>
    %124 = arith.mulf %120, %123 : vector<8x1xf32>
    %125 = arith.mulf %122, %122 : vector<8x1xf32>
    %126 = arith.subf %124, %125 : vector<8x1xf32>
    %127 = vector.broadcast %122 : vector<8x1xf32> to vector<8x128xf32>
    %128 = arith.subf %111, %127 : vector<8x128xf32>
    %cst_50 = arith.constant 9.99999974E-6 : f32
    %129 = vector.broadcast %cst_50 : f32 to vector<8x1xf32>
    %130 = arith.addf %126, %129 : vector<8x1xf32>
    %131 = math.rsqrt %130 : vector<8x1xf32>
    %132 = vector.broadcast %131 : vector<8x1xf32> to vector<8x128xf32>
    %133 = arith.mulf %128, %132 : vector<8x128xf32>
    %134 = arith.mulf %115, %133 : vector<8x128xf32>
    %135 = arith.addf %134, %113 : vector<8x128xf32>
    %c0_51 = arith.constant 0 : index
    %c1280 = arith.constant 1280 : index
    %136 = vector.load %arg3[%c0_51, %c1280] : memref<128x1536xf32, #tpu.memory_space<vmem>>, vector<128x256xf32>
    %cst_52 = arith.constant dense<0.000000e+00> : vector<8x256xf32>
    %137 = tpu.matmul %135, %136, %cst_52 {dimension_numbers = #tpu.dot_dimension_numbers<[1], [0], [0], [1], [0, 0, 1, 1], [], []>} : vector<8x128xf32>, vector<128x256xf32>, vector<8x256xf32> -> vector<8x256xf32>
    %c7 = arith.constant 7 : index
    %c0_53 = arith.constant 0 : index
    %138 = vector.load %arg6[%c7, %c0_53] : memref<16x1024xf32, #tpu.memory_space<vmem>>, vector<1x256xf32>
    %139 = vector.broadcast %138 : vector<1x256xf32> to vector<8x256xf32>
    %140 = arith.addf %137, %139 : vector<8x256xf32>
    %cst_54 = arith.constant 5.000000e-01 : f32
    %141 = vector.broadcast %cst_54 : f32 to vector<8x256xf32>
    %142 = arith.mulf %141, %140 : vector<8x256xf32>
    %cst_55 = arith.constant 0.707106769 : f32
    %143 = vector.broadcast %cst_55 : f32 to vector<8x256xf32>
    %144 = arith.mulf %140, %143 : vector<8x256xf32>
    %145 = math.erf %144 : vector<8x256xf32>
    %cst_56 = arith.constant 1.000000e+00 : f32
    %146 = vector.broadcast %cst_56 : f32 to vector<8x256xf32>
    %147 = arith.addf %146, %145 : vector<8x256xf32>
    %148 = arith.mulf %142, %147 : vector<8x256xf32>
    %c0_57 = arith.constant 0 : index
    %c0_58 = arith.constant 0 : index
    %149 = vector.load %arg5[%c0_57, %c0_58] : memref<256x128xf32, #tpu.memory_space<vmem>>, vector<256x128xf32>
    %cst_59 = arith.constant dense<0.000000e+00> : vector<8x128xf32>
    %150 = tpu.matmul %148, %149, %cst_59 {dimension_numbers = #tpu.dot_dimension_numbers<[1], [0], [0], [1], [0, 0, 1, 1], [], []>} : vector<8x256xf32>, vector<256x128xf32>, vector<8x128xf32> -> vector<8x128xf32>
    %c8 = arith.constant 8 : index
    %c0_60 = arith.constant 0 : index
    %151 = vector.load %arg6[%c8, %c0_60] : memref<16x1024xf32, #tpu.memory_space<vmem>>, vector<1x128xf32>
    %152 = vector.broadcast %151 : vector<1x128xf32> to vector<8x128xf32>
    %153 = arith.addf %150, %152 : vector<8x128xf32>
    %154 = tpu.iota {dimensions = array<i32: 1>} : vector<8x128xi32>
    %c3_i32 = arith.constant 3 : i32
    %155 = vector.broadcast %c3_i32 : i32 to vector<8x128xi32>
    %156 = arith.cmpi slt, %154, %155 : vector<8x128xi32>
    %157 = arith.mulf %153, %153 : vector<8x128xf32>
    %cst_61 = arith.constant 0.000000e+00 : f32
    %158 = vector.broadcast %cst_61 : f32 to vector<8x128xf32>
    %159 = arith.select %156, %157, %158 : vector<8x128xi1>, vector<8x128xf32>
    %cst_62 = arith.constant dense<0.000000e+00> : vector<8xf32>
    %160 = vector.multi_reduction <add>, %159, %cst_62 [1] : vector<8x128xf32> to vector<8xf32>
    %161 = vector.shape_cast %160 : vector<8xf32> to vector<8x1xf32>
    %cst_63 = arith.constant 1.000000e-24 : f32
    %162 = vector.broadcast %cst_63 : f32 to vector<8x1xf32>
    %163 = arith.maximumf %161, %162 : vector<8x1xf32>
    %164 = math.rsqrt %163 : vector<8x1xf32>
    %165 = vector.broadcast %164 : vector<8x1xf32> to vector<8x128xf32>
    %166 = arith.mulf %153, %165 : vector<8x128xf32>
    %cst_64 = arith.constant 0.000000e+00 : f32
    %167 = vector.broadcast %cst_64 : f32 to vector<8x128xf32>
    %168 = arith.maximumf %153, %167 : vector<8x128xf32>
    %169 = math.absf %153 : vector<8x128xf32>
    %cst_65 = arith.constant 0.000000e+00 : f32
    %170 = vector.broadcast %cst_65 : f32 to vector<8x128xf32>
    %171 = arith.subf %170, %169 : vector<8x128xf32>
    %172 = math.exp %171 : vector<8x128xf32>
    %173 = math.log1p %172 : vector<8x128xf32>
    %174 = arith.addf %168, %173 : vector<8x128xf32>
    %175 = arith.select %156, %166, %174 : vector<8x128xi1>, vector<8x128xf32>
    %c0_66 = arith.constant 0 : index
    %c0_67 = arith.constant 0 : index
    %176 = vector.load %arg7[%c0_66, %c0_67] : memref<8x128xf32, #tpu.memory_space<vmem>>, vector<8x128xf32>
    tpu.vector_store %arg7[%c0_66, %c0_67], %175 {strides = array<i32>} : memref<8x128xf32, #tpu.memory_space<vmem>>, vector<8x128xf32>,
    return
  }
  func.func @transform_0(%arg0: i32) -> (i32, i32) {
    %c0_i32 = arith.constant 0 : i32
    %c0_i32_0 = arith.constant 0 : i32
    return %arg0, %c0_i32 : i32, i32
  }
  func.func @transform_1(%arg0: i32) -> (i32, i32) {
    %c0_i32 = arith.constant 0 : i32
    %c0_i32_0 = arith.constant 0 : i32
    %c0_i32_1 = arith.constant 0 : i32
    return %c0_i32, %c0_i32_0 : i32, i32
  }
  func.func @transform_2(%arg0: i32) -> (i32, i32) {
    %c0_i32 = arith.constant 0 : i32
    %c0_i32_0 = arith.constant 0 : i32
    %c0_i32_1 = arith.constant 0 : i32
    return %c0_i32, %c0_i32_0 : i32, i32
  }
  func.func @transform_3(%arg0: i32) -> (i32, i32, i32) {
    %c0_i32 = arith.constant 0 : i32
    %c0_i32_0 = arith.constant 0 : i32
    %c0_i32_1 = arith.constant 0 : i32
    %c0_i32_2 = arith.constant 0 : i32
    return %c0_i32, %c0_i32_0, %c0_i32_1 : i32, i32, i32
  }
  func.func @transform_4(%arg0: i32) -> (i32, i32) {
    %c0_i32 = arith.constant 0 : i32
    %c0_i32_0 = arith.constant 0 : i32
    %c0_i32_1 = arith.constant 0 : i32
    return %c0_i32, %c0_i32_0 : i32, i32
  }
  func.func @transform_5(%arg0: i32) -> (i32, i32) {
    %c0_i32 = arith.constant 0 : i32
    %c0_i32_0 = arith.constant 0 : i32
    %c0_i32_1 = arith.constant 0 : i32
    return %c0_i32, %c0_i32_0 : i32, i32
  }
  func.func @transform_6(%arg0: i32) -> (i32, i32) {
    %c0_i32 = arith.constant 0 : i32
    %c0_i32_0 = arith.constant 0 : i32
    return %arg0, %c0_i32 : i32, i32
  }
}

module attributes {stable_mosaic.version = 11 : i64} {
  func.func @_forward_kernel(%arg0: i32, %arg1: memref<8x16xf32, #tpu.memory_space<vmem>>, %arg2: memref<16x128xf32, #tpu.memory_space<vmem>>, %arg3: memref<128x1536xf32, #tpu.memory_space<vmem>>, %arg4: memref<2x128x128xf32, #tpu.memory_space<vmem>>, %arg5: memref<256x128xf32, #tpu.memory_space<vmem>>, %arg6: memref<16x1024xf32, #tpu.memory_space<vmem>>, %arg7: memref<8x128xf32, #tpu.memory_space<vmem>>) attributes {dimension_semantics = [#tpu.dimension_semantics<parallel>], iteration_bounds = array<i64: 1>, scalar_prefetch = 0 : i64, scratch_operands = 0 : i64, tpu.core_type = #tpu.core_type<tc>, window_params = [{transform_indices = @transform_0, window_bounds = array<i64: 8, 16>}, {pipeline_mode = #tpu.pipeline_mode<synchronous>, transform_indices = @transform_1, window_bounds = array<i64: 16, 128>}, {pipeline_mode = #tpu.pipeline_mode<synchronous>, transform_indices = @transform_2, window_bounds = array<i64: 128, 1536>}, {pipeline_mode = #tpu.pipeline_mode<synchronous>, transform_indices = @transform_3, window_bounds = array<i64: 2, 128, 128>}, {pipeline_mode = #tpu.pipeline_mode<synchronous>, transform_indices = @transform_4, window_bounds = array<i64: 256, 128>}, {pipeline_mode = #tpu.pipeline_mode<synchronous>, transform_indices = @transform_5, window_bounds = array<i64: 16, 1024>}, {transform_indices = @transform_6, window_bounds = array<i64: 8, 128>}]} {
    %c0 = arith.constant 0 : index
    %c0_0 = arith.constant 0 : index
    %0 = vector.load %arg1[%c0, %c0_0] : memref<8x16xf32, #tpu.memory_space<vmem>>, vector<8x16xf32>
    %c0_1 = arith.constant 0 : index
    %c0_2 = arith.constant 0 : index
    %1 = vector.load %arg2[%c0_1, %c0_2] : memref<16x128xf32, #tpu.memory_space<vmem>>, vector<16x128xf32>
    %cst = arith.constant dense<0.000000e+00> : vector<8x128xf32>
    %2 = tpu.matmul %0, %1, %cst {dimension_numbers = #tpu.dot_dimension_numbers<[1], [0], [0], [1], [0, 0, 1, 1], [], []>} : vector<8x16xf32>, vector<16x128xf32>, vector<8x128xf32> -> vector<8x128xf32>
    %c0_3 = arith.constant 0 : index
    %c0_4 = arith.constant 0 : index
    %3 = vector.load %arg6[%c0_3, %c0_4] : memref<16x1024xf32, #tpu.memory_space<vmem>>, vector<1x128xf32>
    %4 = vector.broadcast %3 : vector<1x128xf32> to vector<8x128xf32>
    %5 = arith.addf %2, %4 : vector<8x128xf32>
    %6 = arith.negf %5 : vector<8x128xf32>
    %7 = math.exp %6 : vector<8x128xf32>
    %cst_5 = arith.constant 1.000000e+00 : f32
    %8 = vector.broadcast %cst_5 : f32 to vector<8x128xf32>
    %9 = arith.addf %8, %7 : vector<8x128xf32>
    %10 = arith.divf %8, %9 : vector<8x128xf32>
    %11 = arith.mulf %5, %10 : vector<8x128xf32>
    %c1 = arith.constant 1 : index
    %c0_6 = arith.constant 0 : index
    %12 = vector.load %arg6[%c1, %c0_6] : memref<16x1024xf32, #tpu.memory_space<vmem>>, vector<1x128xf32>
    %13 = vector.shape_cast %12 : vector<1x128xf32> to vector<1x128xf32>
    %14 = vector.broadcast %13 : vector<1x128xf32> to vector<8x128xf32>
    %c0_7 = arith.constant 0 : index
    %c0_8 = arith.constant 0 : index
    %15 = vector.load %arg3[%c0_7, %c0_8] : memref<128x1536xf32, #tpu.memory_space<vmem>>, vector<128x1024xf32>
    %cst_9 = arith.constant dense<0.000000e+00> : vector<8x1024xf32>
    %16 = tpu.matmul %11, %15, %cst_9 {dimension_numbers = #tpu.dot_dimension_numbers<[1], [0], [0], [1], [0, 0, 1, 1], [], []>} : vector<8x128xf32>, vector<128x1024xf32>, vector<8x1024xf32> -> vector<8x1024xf32>
    %c2 = arith.constant 2 : index
    %c0_10 = arith.constant 0 : index
    %17 = vector.load %arg6[%c2, %c0_10] : memref<16x1024xf32, #tpu.memory_space<vmem>>, vector<1x1024xf32>
    %18 = vector.broadcast %17 : vector<1x1024xf32> to vector<8x1024xf32>
    %19 = arith.addf %16, %18 : vector<8x1024xf32>
    %20 = vector.extract_strided_slice %19 {offsets = [0, 0], sizes = [8, 128], strides = [1, 1]} : vector<8x1024xf32> to vector<8x128xf32>
    %21 = vector.extract_strided_slice %19 {offsets = [0, 128], sizes = [8, 128], strides = [1, 1]} : vector<8x1024xf32> to vector<8x128xf32>
    %22 = vector.extract_strided_slice %19 {offsets = [0, 256], sizes = [8, 128], strides = [1, 1]} : vector<8x1024xf32> to vector<8x128xf32>
    %cst_11 = arith.constant 1.000000e+00 : f32
    %23 = vector.broadcast %cst_11 : f32 to vector<8x128xf32>
    %24 = arith.addf %23, %20 : vector<8x128xf32>
    %cst_12 = arith.constant dense<0.000000e+00> : vector<8xf32>
    %25 = vector.multi_reduction <add>, %14, %cst_12 [1] : vector<8x128xf32> to vector<8xf32>
    %26 = vector.shape_cast %25 : vector<8xf32> to vector<8x1xf32>
    %27 = arith.mulf %14, %14 : vector<8x128xf32>
    %cst_13 = arith.constant dense<0.000000e+00> : vector<8xf32>
    %28 = vector.multi_reduction <add>, %27, %cst_13 [1] : vector<8x128xf32> to vector<8xf32>
    %29 = vector.shape_cast %28 : vector<8xf32> to vector<8x1xf32>
    %cst_14 = arith.constant 3.125000e-02 : f32
    %30 = vector.broadcast %cst_14 : f32 to vector<8x1xf32>
    %31 = arith.mulf %26, %30 : vector<8x1xf32>
    %cst_15 = arith.constant 3.125000e-02 : f32
    %32 = vector.broadcast %cst_15 : f32 to vector<8x1xf32>
    %33 = arith.mulf %29, %32 : vector<8x1xf32>
    %34 = arith.mulf %31, %31 : vector<8x1xf32>
    %35 = arith.subf %33, %34 : vector<8x1xf32>
    %36 = vector.broadcast %31 : vector<8x1xf32> to vector<8x128xf32>
    %37 = arith.subf %14, %36 : vector<8x128xf32>
    %cst_16 = arith.constant 9.99999974E-6 : f32
    %38 = vector.broadcast %cst_16 : f32 to vector<8x1xf32>
    %39 = arith.addf %35, %38 : vector<8x1xf32>
    %40 = math.rsqrt %39 : vector<8x1xf32>
    %41 = vector.broadcast %40 : vector<8x1xf32> to vector<8x128xf32>
    %42 = arith.mulf %37, %41 : vector<8x128xf32>
    %43 = arith.mulf %24, %42 : vector<8x128xf32>
    %44 = arith.addf %43, %21 : vector<8x128xf32>
    %c0_17 = arith.constant 0 : index
    %c1024 = arith.constant 1024 : index
    %45 = vector.load %arg3[%c0_17, %c1024] : memref<128x1536xf32, #tpu.memory_space<vmem>>, vector<128x128xf32>
    %cst_18 = arith.constant dense<0.000000e+00> : vector<8x128xf32>
    %46 = tpu.matmul %44, %45, %cst_18 {dimension_numbers = #tpu.dot_dimension_numbers<[1], [0], [0], [1], [0, 0, 1, 1], [], []>} : vector<8x128xf32>, vector<128x128xf32>, vector<8x128xf32> -> vector<8x128xf32>
    %c3 = arith.constant 3 : index
    %c0_19 = arith.constant 0 : index
    %47 = vector.load %arg6[%c3, %c0_19] : memref<16x1024xf32, #tpu.memory_space<vmem>>, vector<1x128xf32>
    %48 = vector.broadcast %47 : vector<1x128xf32> to vector<8x128xf32>
    %49 = arith.addf %46, %48 : vector<8x128xf32>
    %cst_20 = arith.constant 5.000000e-01 : f32
    %50 = vector.broadcast %cst_20 : f32 to vector<8x128xf32>
    %51 = arith.mulf %50, %49 : vector<8x128xf32>
    %cst_21 = arith.constant 0.707106769 : f32
    %52 = vector.broadcast %cst_21 : f32 to vector<8x128xf32>
    %53 = arith.mulf %49, %52 : vector<8x128xf32>
    %54 = math.erf %53 : vector<8x128xf32>
    %cst_22 = arith.constant 1.000000e+00 : f32
    %55 = vector.broadcast %cst_22 : f32 to vector<8x128xf32>
    %56 = arith.addf %55, %54 : vector<8x128xf32>
    %57 = arith.mulf %51, %56 : vector<8x128xf32>
    %c0_23 = arith.constant 0 : index
    %c0_24 = arith.constant 0 : index
    %c0_25 = arith.constant 0 : index
    %58 = vector.load %arg4[%c0_23, %c0_24, %c0_25] : memref<2x128x128xf32, #tpu.memory_space<vmem>>, vector<1x128x128xf32>
    %59 = vector.shape_cast %58 : vector<1x128x128xf32> to vector<128x128xf32>
    %cst_26 = arith.constant dense<0.000000e+00> : vector<8x128xf32>
    %60 = tpu.matmul %57, %59, %cst_26 {dimension_numbers = #tpu.dot_dimension_numbers<[1], [0], [0], [1], [0, 0, 1, 1], [], []>} : vector<8x128xf32>, vector<128x128xf32>, vector<8x128xf32> -> vector<8x128xf32>
    %c5 = arith.constant 5 : index
    %c0_27 = arith.constant 0 : index
    %61 = vector.load %arg6[%c5, %c0_27] : memref<16x1024xf32, #tpu.memory_space<vmem>>, vector<1x128xf32>
    %62 = vector.broadcast %61 : vector<1x128xf32> to vector<8x128xf32>
    %63 = arith.addf %60, %62 : vector<8x128xf32>
    %64 = arith.mulf %63, %22 : vector<8x128xf32>
    %65 = arith.addf %14, %64 : vector<8x128xf32>
    %66 = vector.extract_strided_slice %19 {offsets = [0, 384], sizes = [8, 128], strides = [1, 1]} : vector<8x1024xf32> to vector<8x128xf32>
    %67 = vector.extract_strided_slice %19 {offsets = [0, 512], sizes = [8, 128], strides = [1, 1]} : vector<8x1024xf32> to vector<8x128xf32>
    %68 = vector.extract_strided_slice %19 {offsets = [0, 640], sizes = [8, 128], strides = [1, 1]} : vector<8x1024xf32> to vector<8x128xf32>
    %cst_28 = arith.constant 1.000000e+00 : f32
    %69 = vector.broadcast %cst_28 : f32 to vector<8x128xf32>
    %70 = arith.addf %69, %66 : vector<8x128xf32>
    %cst_29 = arith.constant dense<0.000000e+00> : vector<8xf32>
    %71 = vector.multi_reduction <add>, %65, %cst_29 [1] : vector<8x128xf32> to vector<8xf32>
    %72 = vector.shape_cast %71 : vector<8xf32> to vector<8x1xf32>
    %73 = arith.mulf %65, %65 : vector<8x128xf32>
    %cst_30 = arith.constant dense<0.000000e+00> : vector<8xf32>
    %74 = vector.multi_reduction <add>, %73, %cst_30 [1] : vector<8x128xf32> to vector<8xf32>
    %75 = vector.shape_cast %74 : vector<8xf32> to vector<8x1xf32>
    %cst_31 = arith.constant 3.125000e-02 : f32
    %76 = vector.broadcast %cst_31 : f32 to vector<8x1xf32>
    %77 = arith.mulf %72, %76 : vector<8x1xf32>
    %cst_32 = arith.constant 3.125000e-02 : f32
    %78 = vector.broadcast %cst_32 : f32 to vector<8x1xf32>
    %79 = arith.mulf %75, %78 : vector<8x1xf32>
    %80 = arith.mulf %77, %77 : vector<8x1xf32>
    %81 = arith.subf %79, %80 : vector<8x1xf32>
    %82 = vector.broadcast %77 : vector<8x1xf32> to vector<8x128xf32>
    %83 = arith.subf %65, %82 : vector<8x128xf32>
    %cst_33 = arith.constant 9.99999974E-6 : f32
    %84 = vector.broadcast %cst_33 : f32 to vector<8x1xf32>
    %85 = arith.addf %81, %84 : vector<8x1xf32>
    %86 = math.rsqrt %85 : vector<8x1xf32>
    %87 = vector.broadcast %86 : vector<8x1xf32> to vector<8x128xf32>
    %88 = arith.mulf %83, %87 : vector<8x128xf32>
    %89 = arith.mulf %70, %88 : vector<8x128xf32>
    %90 = arith.addf %89, %67 : vector<8x128xf32>
    %c0_34 = arith.constant 0 : index
    %c1152 = arith.constant 1152 : index
    %91 = vector.load %arg3[%c0_34, %c1152] : memref<128x1536xf32, #tpu.memory_space<vmem>>, vector<128x128xf32>
    %cst_35 = arith.constant dense<0.000000e+00> : vector<8x128xf32>
    %92 = tpu.matmul %90, %91, %cst_35 {dimension_numbers = #tpu.dot_dimension_numbers<[1], [0], [0], [1], [0, 0, 1, 1], [], []>} : vector<8x128xf32>, vector<128x128xf32>, vector<8x128xf32> -> vector<8x128xf32>
    %c4 = arith.constant 4 : index
    %c0_36 = arith.constant 0 : index
    %93 = vector.load %arg6[%c4, %c0_36] : memref<16x1024xf32, #tpu.memory_space<vmem>>, vector<1x128xf32>
    %94 = vector.broadcast %93 : vector<1x128xf32> to vector<8x128xf32>
    %95 = arith.addf %92, %94 : vector<8x128xf32>
    %cst_37 = arith.constant 5.000000e-01 : f32
    %96 = vector.broadcast %cst_37 : f32 to vector<8x128xf32>
    %97 = arith.mulf %96, %95 : vector<8x128xf32>
    %cst_38 = arith.constant 0.707106769 : f32
    %98 = vector.broadcast %cst_38 : f32 to vector<8x128xf32>
    %99 = arith.mulf %95, %98 : vector<8x128xf32>
    %100 = math.erf %99 : vector<8x128xf32>
    %cst_39 = arith.constant 1.000000e+00 : f32
    %101 = vector.broadcast %cst_39 : f32 to vector<8x128xf32>
    %102 = arith.addf %101, %100 : vector<8x128xf32>
    %103 = arith.mulf %97, %102 : vector<8x128xf32>
    %c1_40 = arith.constant 1 : index
    %c0_41 = arith.constant 0 : index
    %c0_42 = arith.constant 0 : index
    %104 = vector.load %arg4[%c1_40, %c0_41, %c0_42] : memref<2x128x128xf32, #tpu.memory_space<vmem>>, vector<1x128x128xf32>
    %105 = vector.shape_cast %104 : vector<1x128x128xf32> to vector<128x128xf32>
    %cst_43 = arith.constant dense<0.000000e+00> : vector<8x128xf32>
    %106 = tpu.matmul %103, %105, %cst_43 {dimension_numbers = #tpu.dot_dimension_numbers<[1], [0], [0], [1], [0, 0, 1, 1], [], []>} : vector<8x128xf32>, vector<128x128xf32>, vector<8x128xf32> -> vector<8x128xf32>
    %c6 = arith.constant 6 : index
    %c0_44 = arith.constant 0 : index
    %107 = vector.load %arg6[%c6, %c0_44] : memref<16x1024xf32, #tpu.memory_space<vmem>>, vector<1x128xf32>
    %108 = vector.broadcast %107 : vector<1x128xf32> to vector<8x128xf32>
    %109 = arith.addf %106, %108 : vector<8x128xf32>
    %110 = arith.mulf %109, %68 : vector<8x128xf32>
    %111 = arith.addf %65, %110 : vector<8x128xf32>
    %112 = vector.extract_strided_slice %19 {offsets = [0, 768], sizes = [8, 128], strides = [1, 1]} : vector<8x1024xf32> to vector<8x128xf32>
    %113 = vector.extract_strided_slice %19 {offsets = [0, 896], sizes = [8, 128], strides = [1, 1]} : vector<8x1024xf32> to vector<8x128xf32>
    %cst_45 = arith.constant 1.000000e+00 : f32
    %114 = vector.broadcast %cst_45 : f32 to vector<8x128xf32>
    %115 = arith.addf %114, %112 : vector<8x128xf32>
    %cst_46 = arith.constant dense<0.000000e+00> : vector<8xf32>
    %116 = vector.multi_reduction <add>, %111, %cst_46 [1] : vector<8x128xf32> to vector<8xf32>
    %117 = vector.shape_cast %116 : vector<8xf32> to vector<8x1xf32>
    %118 = arith.mulf %111, %111 : vector<8x128xf32>
    %cst_47 = arith.constant dense<0.000000e+00> : vector<8xf32>
    %119 = vector.multi_reduction <add>, %118, %cst_47 [1] : vector<8x128xf32> to vector<8xf32>
    %120 = vector.shape_cast %119 : vector<8xf32> to vector<8x1xf32>
    %cst_48 = arith.constant 3.125000e-02 : f32
    %121 = vector.broadcast %cst_48 : f32 to vector<8x1xf32>
    %122 = arith.mulf %117, %121 : vector<8x1xf32>
    %cst_49 = arith.constant 3.125000e-02 : f32
    %123 = vector.broadcast %cst_49 : f32 to vector<8x1xf32>
    %124 = arith.mulf %120, %123 : vector<8x1xf32>
    %125 = arith.mulf %122, %122 : vector<8x1xf32>
    %126 = arith.subf %124, %125 : vector<8x1xf32>
    %127 = vector.broadcast %122 : vector<8x1xf32> to vector<8x128xf32>
    %128 = arith.subf %111, %127 : vector<8x128xf32>
    %cst_50 = arith.constant 9.99999974E-6 : f32
    %129 = vector.broadcast %cst_50 : f32 to vector<8x1xf32>
    %130 = arith.addf %126, %129 : vector<8x1xf32>
    %131 = math.rsqrt %130 : vector<8x1xf32>
    %132 = vector.broadcast %131 : vector<8x1xf32> to vector<8x128xf32>
    %133 = arith.mulf %128, %132 : vector<8x128xf32>
    %134 = arith.mulf %115, %133 : vector<8x128xf32>
    %135 = arith.addf %134, %113 : vector<8x128xf32>
    %c0_51 = arith.constant 0 : index
    %c1280 = arith.constant 1280 : index
    %136 = vector.load %arg3[%c0_51, %c1280] : memref<128x1536xf32, #tpu.memory_space<vmem>>, vector<128x256xf32>
    %cst_52 = arith.constant dense<0.000000e+00> : vector<8x256xf32>
    %137 = tpu.matmul %135, %136, %cst_52 {dimension_numbers = #tpu.dot_dimension_numbers<[1], [0], [0], [1], [0, 0, 1, 1], [], []>} : vector<8x128xf32>, vector<128x256xf32>, vector<8x256xf32> -> vector<8x256xf32>
    %c7 = arith.constant 7 : index
    %c0_53 = arith.constant 0 : index
    %138 = vector.load %arg6[%c7, %c0_53] : memref<16x1024xf32, #tpu.memory_space<vmem>>, vector<1x256xf32>
    %139 = vector.broadcast %138 : vector<1x256xf32> to vector<8x256xf32>
    %140 = arith.addf %137, %139 : vector<8x256xf32>
    %cst_54 = arith.constant 5.000000e-01 : f32
    %141 = vector.broadcast %cst_54 : f32 to vector<8x256xf32>
    %142 = arith.mulf %141, %140 : vector<8x256xf32>
    %cst_55 = arith.constant 0.707106769 : f32
    %143 = vector.broadcast %cst_55 : f32 to vector<8x256xf32>
    %144 = arith.mulf %140, %143 : vector<8x256xf32>
    %145 = math.erf %144 : vector<8x256xf32>
    %cst_56 = arith.constant 1.000000e+00 : f32
    %146 = vector.broadcast %cst_56 : f32 to vector<8x256xf32>
    %147 = arith.addf %146, %145 : vector<8x256xf32>
    %148 = arith.mulf %142, %147 : vector<8x256xf32>
    %c0_57 = arith.constant 0 : index
    %c0_58 = arith.constant 0 : index
    %149 = vector.load %arg5[%c0_57, %c0_58] : memref<256x128xf32, #tpu.memory_space<vmem>>, vector<256x128xf32>
    %cst_59 = arith.constant dense<0.000000e+00> : vector<8x128xf32>
    %150 = tpu.matmul %148, %149, %cst_59 {dimension_numbers = #tpu.dot_dimension_numbers<[1], [0], [0], [1], [0, 0, 1, 1], [], []>} : vector<8x256xf32>, vector<256x128xf32>, vector<8x128xf32> -> vector<8x128xf32>
    %c8 = arith.constant 8 : index
    %c0_60 = arith.constant 0 : index
    %151 = vector.load %arg6[%c8, %c0_60] : memref<16x1024xf32, #tpu.memory_space<vmem>>, vector<1x128xf32>
    %152 = vector.broadcast %151 : vector<1x128xf32> to vector<8x128xf32>
    %153 = arith.addf %150, %152 : vector<8x128xf32>
    %154 = tpu.iota {dimensions = array<i32: 1>} : vector<8x128xi32>
    %c3_i32 = arith.constant 3 : i32
    %155 = vector.broadcast %c3_i32 : i32 to vector<8x128xi32>
    %156 = arith.cmpi slt, %154, %155 : vector<8x128xi32>
    %157 = arith.mulf %153, %153 : vector<8x128xf32>
    %cst_61 = arith.constant 0.000000e+00 : f32
    %158 = vector.broadcast %cst_61 : f32 to vector<8x128xf32>
    %159 = arith.select %156, %157, %158 : vector<8x128xi1>, vector<8x128xf32>
    %cst_62 = arith.constant dense<0.000000e+00> : vector<8xf32>
    %160 = vector.multi_reduction <add>, %159, %cst_62 [1] : vector<8x128xf32> to vector<8xf32>
    %161 = vector.shape_cast %160 : vector<8xf32> to vector<8x1xf32>
    %cst_63 = arith.constant 1.000000e-24 : f32
    %162 = vector.broadcast %cst_63 : f32 to vector<8x1xf32>
    %163 = arith.maximumf %161, %162 : vector<8x1xf32>
    %164 = math.rsqrt %163 : vector<8x1xf32>
    %165 = vector.broadcast %164 : vector<8x1xf32> to vector<8x128xf32>
    %166 = arith.mulf %153, %165 : vector<8x128xf32>
    %cst_64 = arith.constant 0.000000e+00 : f32
    %167 = vector.broadcast %cst_64 : f32 to vector<8x128xf32>
    %168 = arith.maximumf %153, %167 : vector<8x128xf32>
    %169 = math.absf %153 : vector<8x128xf32>
    %cst_65 = arith.constant 0.000000e+00 : f32
    %170 = vector.broadcast %cst_65 : f32 to vector<8x128xf32>
    %171 = arith.subf %170, %169 : vector<8x128xf32>
    %172 = math.exp %171 : vector<8x128xf32>
    %173 = math.log1p %172 : vector<8x128xf32>
    %174 = arith.addf %168, %173 : vector<8x128xf32>
    %175 = arith.select %156, %166, %174 : vector<8x128xi1>, vector<8x128xf32>
    %c0_66 = arith.constant 0 : index
    %c0_67 = arith.constant 0 : index
    %176 = vector.load %arg7[%c0_66, %c0_67] : memref<8x128xf32, #tpu.memory_space<vmem>>, vector<8x128xf32>
    tpu.vector_store %arg7[%c0_66, %c0_67], %175 {strides = array<i32>} : memref<8x128xf32, #tpu.memory_space<vmem>>, vector<8x128xf32>,
    return
  }
  func.func @transform_0(%arg0: i32) -> (i32, i32) {
    %c0_i32 = arith.constant 0 : i32
    %c0_i32_0 = arith.constant 0 : i32
    return %arg0, %c0_i32 : i32, i32
  }
  func.func @transform_1(%arg0: i32) -> (i32, i32) {
    %c0_i32 = arith.constant 0 : i32
    %c0_i32_0 = arith.constant 0 : i32
    %c0_i32_1 = arith.constant 0 : i32
    return %c0_i32, %c0_i32_0 : i32, i32
  }
  func.func @transform_2(%arg0: i32) -> (i32, i32) {
    %c0_i32 = arith.constant 0 : i32
    %c0_i32_0 = arith.constant 0 : i32
    %c0_i32_1 = arith.constant 0 : i32
    return %c0_i32, %c0_i32_0 : i32, i32
  }
  func.func @transform_3(%arg0: i32) -> (i32, i32, i32) {
    %c0_i32 = arith.constant 0 : i32
    %c0_i32_0 = arith.constant 0 : i32
    %c0_i32_1 = arith.constant 0 : i32
    %c0_i32_2 = arith.constant 0 : i32
    return %c0_i32, %c0_i32_0, %c0_i32_1 : i32, i32, i32
  }
  func.func @transform_4(%arg0: i32) -> (i32, i32) {
    %c0_i32 = arith.constant 0 : i32
    %c0_i32_0 = arith.constant 0 : i32
    %c0_i32_1 = arith.constant 0 : i32
    return %c0_i32, %c0_i32_0 : i32, i32
  }
  func.func @transform_5(%arg0: i32) -> (i32, i32) {
    %c0_i32 = arith.constant 0 : i32
    %c0_i32_0 = arith.constant 0 : i32
    %c0_i32_1 = arith.constant 0 : i32
    return %c0_i32, %c0_i32_0 : i32, i32
  }
  func.func @transform_6(%arg0: i32) -> (i32, i32) {
    %c0_i32 = arith.constant 0 : i32
    %c0_i32_0 = arith.constant 0 : i32
    return %arg0, %c0_i32 : i32, i32
  }
}

</mosaic_0001>

<bundles_post_ra>
// kernel: tpu_custom_call.1
= control target key start
LH: loop header
LB: loop body
LE: loop exit
PB: predicated region body
PF: predicated region fallthrough
CT: control target
= control target key end

     0   :  { %11 = vsyncpa [#allocation3], 0  ;;  %s1479_s0 = inlined_call_operand.hbm [shape: f32[8,16], index: 0, kind: input, shape index: {}]   ;;  %s1480_s1 = inlined_call_operand.hbm [shape: f32[16,128], index: 1, kind: input, shape index: {}]   ;;  %s1481_s2 = inlined_call_operand.hbm [shape: f32[128,1536], index: 2, kind: input, shape index: {}]   ;;  %s1482_s3 = inlined_call_operand.hbm [shape: f32[2,128,128], index: 3, kind: input, shape index: {}]   ;;  %s1483_s4 = inlined_call_operand.hbm [shape: f32[256,128], index: 4, kind: input, shape index: {}]   ;;  %s1484_s5 = inlined_call_operand.hbm [shape: f32[16,1024], index: 5, kind: input, shape index: {}]   ;;  %s1485_s6 = inlined_call_operand.hbm [shape: f32[8,128], index: 6, kind: output, shape index: {}]  }
   0x1   :  { %12 = vsyncpa [#allocation6], 0 }
   0x2   :  { %13 = vsyncpa [#allocation9], 0 }
   0x3   :  { %14 = vsyncpa [#allocation12], 0  ;;  %s31_s23 = sshll.u32 %s1480_s1, 4  ;;  %s32_s23 = int_to_ptr.hbm [resolvable:$true] %s31_s23 }
   0x4   :  { %15 = vsyncpa [#allocation4], 0  ;;  %s1307_s24 = smov [#allocation5]   ;;  %s57_s28 = sshll.u32 %s1482_s3, 4  ;;  %s58_s28 = int_to_ptr.hbm [resolvable:$true] %s57_s28 }
   0x5   :  { %s33_s25 = sshll.u32 %s1307_s24, 4  ;;  %s1308_s29 = smov 128   ;;  %s34_s25 = int_to_ptr.vmem [resolvable:$true] %s33_s25 }
   0x6   :  { %s1309_s30 = smov 8   ;;  %s1310_s7 = smov [#allocation8]  }
   0x7   :  { %39 = dma.hbm_to_vmem [thread:$0]  %s32_s23, 256, %s34_s25, [#allocation6], %s1308_s29, %s1308_s29, %s1309_s30  }
   0x8   :  { %s59_s8 = sshll.u32 %s1310_s7, 4  ;;  %s21_s10 = sshll.u32 %s1479_s0, 4  ;;  %s60_s8 = int_to_ptr.vmem [resolvable:$true] %s59_s8  ;;  %s22_s10 = int_to_ptr.hbm [resolvable:$true] %s21_s10 }
   0x9   :  { %65 = dma.hbm_to_vmem [thread:$0]  %s58_s28, 4096, %s60_s8, [#allocation9], %s1308_s29, %s1308_s29, %s1309_s30  }
   0xa   :  { %s44_s12 = sshll.u32 %s1481_s2, 4  ;;  %s1311_s13 = smov [#allocation2]   ;;  %s45_s12 = int_to_ptr.hbm [resolvable:$true] %s44_s12 }
   0xb   :  { %s23_s14 = sshll.u32 %s1311_s13, 4  ;;  %s1312_s15 = smov [#allocation7]   ;;  %s24_s14 = int_to_ptr.vmem [resolvable:$true] %s23_s14 }
   0xc   :  { %26 = dma.hbm_to_vmem [thread:$0]  %s22_s10, 128, %s24_s14, [#allocation3]  }
   0xd   :  { %s46_s16 = sshll.u32 %s1312_s15, 4  ;;  %s1313_s17 = smov 1536   ;;  %s47_s16 = int_to_ptr.vmem [resolvable:$true] %s46_s16 }
   0xe   :  { %s1314_s0 = smov 96   ;;  %s70_s20 = sshll.u32 %s1483_s4, 4  ;;  %s71_s20 = int_to_ptr.hbm [resolvable:$true] %s70_s20 }
   0xf   :  { %52 = dma.hbm_to_vmem [thread:$0]  %s45_s12, 24576, %s47_s16, [#allocation6], %s1313_s17, %s1313_s17, %s1314_s0  }
  0x10   :  { %s1315_s21 = smov [#allocation10]   ;;  %s83_s24 = sshll.u32 %s1484_s5, 4  ;;  %s84_s24 = int_to_ptr.hbm [resolvable:$true] %s83_s24 }
  0x11   :  { %s72_s22 = sshll.u32 %s1315_s21, 4  ;;  %s1316_s25 = smov [#allocation11]   ;;  %s73_s22 = int_to_ptr.vmem [resolvable:$true] %s72_s22 }
  0x12   :  { %78 = dma.hbm_to_vmem [thread:$0]  %s71_s20, 4096, %s73_s22, [#allocation9], %s1308_s29, %s1308_s29, %s1309_s30  }
  0x13   :  { %s85_s26 = sshll.u32 %s1316_s25, 4  ;;  %s1317_s27 = smov 1024   ;;  %s86_s26 = int_to_ptr.vmem [resolvable:$true] %s85_s26 }
  0x14   :  { %s1318_s28 = smov 64  }
  0x15   :  { %91 = dma.hbm_to_vmem [thread:$0]  %s84_s24, 2048, %s86_s26, [#allocation12], %s1317_s27, %s1317_s27, %s1318_s28  }
  0x16   :  { %1297 = dma.done.wait [#allocation3], 128  }
  0x17   :  { %1298 = vsyncadd [#allocation3], 4294967168 }
  0x18   :  { %1299 = dma.done.wait [#allocation6], 24832  }
  0x19   :  { %1300 = vsyncadd [#allocation6], 4294942464 }
  0x1a   :  { %1301 = dma.done.wait [#allocation9], 8192  }
  0x1b   :  { %1302 = vsyncadd [#allocation9], 4294959104 }
  0x1c   :  { %1303 = dma.done.wait [#allocation12], 2048  }
  0x1d   :  { %1304 = vsyncadd [#allocation12], 4294965248  ;;  %v118_v0 = vld [vmem:[#allocation5 + $0x8] sm:$0xff]  ;;  %v117_v1 = vld [vmem:[#allocation5] sm:$0xff]  ;;  %vm120_vm0 = vcmask 130048   ;;  %s1319_s4 = smov [#allocation13]  }
  0x1e   :  { %v116_v2 = vld [vmem:[#allocation2] sm:$0xff]  ;;  %138 = vmatpush.msra.mxu0 %v118_v0  ;;  %v285_v3 = vld [vmem:[#allocation7 + $0x5a0] sm:$0xff]  ;;  %v287_v5 = vld [vmem:[#allocation7 + $0x5b0] sm:$0xff]  ;;  %s1071_s5 = sshll.u32 %s1319_s4, 4  ;;  %s1073_s7 = sshll.u32 %s1485_s6, 4  ;;  %s1072_s5 = int_to_ptr.vmem [resolvable:$true] %s1071_s5  ;;  %s1074_s7 = int_to_ptr.hbm [resolvable:$true] %s1073_s7 }
  0x1f   :  { %v286_v4 = vld [vmem:[#allocation7 + $0x5a8] sm:$0xff]  ;;  %314 = vmatpush.msra.mxu1 %v285_v3  ;;  %v288_v6 = vld [vmem:[#allocation7 + $0x5b8] sm:$0xff]  ;;  %v277_v7 = vld [vmem:[#allocation7 + $0x540] sm:$0xff]  ;;  %354 = vmatpush.msra.mxu3 %v287_v5 }
  0x20   :  { %334 = vmatpush.msra.mxu2 %v286_v4  ;;  %v278_v8 = vld [vmem:[#allocation7 + $0x548] sm:$0xff]  ;;  %139 = vmatpush.msra.mxu0 %v117_v1  ;;  %v279_v9 = vld [vmem:[#allocation7 + $0x550] sm:$0xff]  ;;  %v269_v10 = vld [vmem:[#allocation7 + $0x4e0] sm:$0xff] }
  0x21   :  { %1086 = vmatmul.msk.f32.vlgmr.msra.gmra.mxu0 %vm120_vm0, %v116_v2  ;;  %315 = vmatpush.msra.mxu1 %v277_v7  ;;  %v280_v11 = vld [vmem:[#allocation7 + $0x558] sm:$0xff]  ;;  %v270_v12 = vld [vmem:[#allocation7 + $0x4e8] sm:$0xff]  ;;  %v271_v13 = vld [vmem:[#allocation7 + $0x4f0] sm:$0xff] }
  0x22   :  { %374 = vmatpush.msrb.mxu0 %v288_v6  ;;  %335 = vmatpush.msra.mxu2 %v278_v8  ;;  %v261_v14 = vld [vmem:[#allocation7 + $0x480] sm:$0xff]  ;;  %v272_v15 = vld [vmem:[#allocation7 + $0x4f8] sm:$0xff]  ;;  %v262_v16 = vld [vmem:[#allocation7 + $0x488] sm:$0xff] }
  0x23   :  { %355 = vmatpush.msra.mxu3 %v279_v9  ;;  %316 = vmatpush.msra.mxu1 %v269_v10  ;;  %v263_v17 = vld [vmem:[#allocation7 + $0x490] sm:$0xff]  ;;  %v253_v18 = vld [vmem:[#allocation7 + $0x420] sm:$0xff]  ;;  %v264_v19 = vld [vmem:[#allocation7 + $0x498] sm:$0xff] }
  0x24   :  { %375 = vmatpush.msrb.mxu0 %v280_v11  ;;  %336 = vmatpush.msra.mxu2 %v270_v12  ;;  %v254_v20 = vld [vmem:[#allocation7 + $0x428] sm:$0xff]  ;;  %v255_v21 = vld [vmem:[#allocation7 + $0x430] sm:$0xff]  ;;  %v1382_v22 = vld [vmem:[#allocation11 + $0x1] ss:$0 sm:$0xff] }
  0x25   :  { %356 = vmatpush.msra.mxu3 %v271_v13  ;;  %317 = vmatpush.msra.mxu1 %v261_v14  ;;  %v256_v23 = vld [vmem:[#allocation7 + $0x438] sm:$0xff]  ;;  %v245_v24 = vld [vmem:[#allocation7 + $0x3c0] sm:$0xff]  ;;  %v246_v25 = vld [vmem:[#allocation7 + $0x3c8] sm:$0xff]  ;;  %v477_v39 = vmul.f32 %v1382_v22, %v1382_v22 }
  0x26   :  { %376 = vmatpush.msrb.mxu0 %v272_v15  ;;  %337 = vmatpush.msra.mxu2 %v262_v16  ;;  %v247_v26 = vld [vmem:[#allocation7 + $0x3d0] sm:$0xff]  ;;  %v248_v27 = vld [vmem:[#allocation7 + $0x3d8] sm:$0xff]  ;;  %v237_v28 = vld [vmem:[#allocation7 + $0x360] sm:$0xff] }
  0x27   :  { %357 = vmatpush.msra.mxu3 %v263_v17  ;;  %318 = vmatpush.msra.mxu1 %v253_v18  ;;  %v238_v29 = vld [vmem:[#allocation7 + $0x368] sm:$0xff]  ;;  %v239_v30 = vld [vmem:[#allocation7 + $0x370] sm:$0xff]  ;;  %v240_v31 = vld [vmem:[#allocation7 + $0x378] sm:$0xff] }
  0x28   :  { %377 = vmatpush.msrb.mxu0 %v264_v19  ;;  %338 = vmatpush.msra.mxu2 %v254_v20  ;;  %v229_v32 = vld [vmem:[#allocation7 + $0x300] sm:$0xff]  ;;  %v230_v33 = vld [vmem:[#allocation7 + $0x308] sm:$0xff]  ;;  %v231_v34 = vld [vmem:[#allocation7 + $0x310] sm:$0xff] }
  0x29   :  { %358 = vmatpush.msra.mxu3 %v255_v21  ;;  %475 = vadd.xlane.f32.xlu0 %v1382_v22  ;;  %v232_v35 = vld [vmem:[#allocation7 + $0x318] sm:$0xff]  ;;  %v221_v36 = vld [vmem:[#allocation7 + $0x2a0] sm:$0xff]  ;;  %v222_v37 = vld [vmem:[#allocation7 + $0x2a8] sm:$0xff] }
  0x2a   :  { %378 = vmatpush.msrb.mxu0 %v256_v23  ;;  %319 = vmatpush.msra.mxu1 %v245_v24  ;;  %v223_v38 = vld [vmem:[#allocation7 + $0x2b0] sm:$0xff]  ;;  %v224_v40 = vld [vmem:[#allocation7 + $0x2b8] sm:$0xff]  ;;  %v213_v41 = vld [vmem:[#allocation7 + $0x240] sm:$0xff] }
  0x2b   :  { %339 = vmatpush.msra.mxu2 %v246_v25  ;;  %359 = vmatpush.msra.mxu3 %v247_v26  ;;  %v214_v42 = vld [vmem:[#allocation7 + $0x248] sm:$0xff]  ;;  %v215_v43 = vld [vmem:[#allocation7 + $0x250] sm:$0xff]  ;;  %v216_v44 = vld [vmem:[#allocation7 + $0x258] sm:$0xff] }
  0x2c   :  { %379 = vmatpush.msrb.mxu0 %v248_v27  ;;  %320 = vmatpush.msra.mxu1 %v237_v28  ;;  %v205_v45 = vld [vmem:[#allocation7 + $0x1e0] sm:$0xff]  ;;  %v206_v46 = vld [vmem:[#allocation7 + $0x1e8] sm:$0xff]  ;;  %v207_v47 = vld [vmem:[#allocation7 + $0x1f0] sm:$0xff] }
  0x2d   :  { %340 = vmatpush.msra.mxu2 %v238_v29  ;;  %360 = vmatpush.msra.mxu3 %v239_v30  ;;  %v208_v48 = vld [vmem:[#allocation7 + $0x1f8] sm:$0xff]  ;;  %v197_v49 = vld [vmem:[#allocation7 + $0x180] sm:$0xff]  ;;  %v198_v50 = vld [vmem:[#allocation7 + $0x188] sm:$0xff] }
  0x2e   :  { %380 = vmatpush.msrb.mxu0 %v240_v31  ;;  %321 = vmatpush.msra.mxu1 %v229_v32  ;;  %v199_v51 = vld [vmem:[#allocation7 + $0x190] sm:$0xff]  ;;  %v200_v52 = vld [vmem:[#allocation7 + $0x198] sm:$0xff]  ;;  %v189_v53 = vld [vmem:[#allocation7 + $0x120] sm:$0xff] }
  0x2f   :  { %341 = vmatpush.msra.mxu2 %v230_v33  ;;  %361 = vmatpush.msra.mxu3 %v231_v34  ;;  %v190_v54 = vld [vmem:[#allocation7 + $0x128] sm:$0xff]  ;;  %v191_v55 = vld [vmem:[#allocation7 + $0x130] sm:$0xff]  ;;  %v192_v56 = vld [vmem:[#allocation7 + $0x138] sm:$0xff] }
  0x30   :  { %381 = vmatpush.msrb.mxu0 %v232_v35  ;;  %322 = vmatpush.msra.mxu1 %v221_v36  ;;  %v181_v57 = vld [vmem:[#allocation7 + $0xc0] sm:$0xff]  ;;  %v182_v58 = vld [vmem:[#allocation7 + $0xc8] sm:$0xff]  ;;  %v183_v59 = vld [vmem:[#allocation7 + $0xd0] sm:$0xff] }
  0x31   :  { %342 = vmatpush.msra.mxu2 %v222_v37  ;;  %362 = vmatpush.msra.mxu3 %v223_v38  ;;  %v184_v60 = vld [vmem:[#allocation7 + $0xd8] sm:$0xff]  ;;  %v173_v61 = vld [vmem:[#allocation7 + $0x60] sm:$0xff]  ;;  %v174_v62 = vld [vmem:[#allocation7 + $0x68] sm:$0xff] }
  0x32   :  { %478 = vadd.xlane.f32.xlu0 %v477_v39  ;;  %382 = vmatpush.msrb.mxu0 %v224_v40  ;;  %v175_v63 = vld [vmem:[#allocation7 + $0x70] sm:$0xff]  ;;  %v176_v0 = vld [vmem:[#allocation7 + $0x78] sm:$0xff]  ;;  %v165_v1 = vld [vmem:[#allocation7] sm:$0xff] }
  0x33   :  { %323 = vmatpush.msra.mxu1 %v213_v41  ;;  %343 = vmatpush.msra.mxu2 %v214_v42  ;;  %v166_v2 = vld [vmem:[#allocation7 + $0x8] sm:$0xff]  ;;  %v167_v3 = vld [vmem:[#allocation7 + $0x10] sm:$0xff]  ;;  %v168_v4 = vld [vmem:[#allocation7 + $0x18] sm:$0xff] }
  0x34   :  { %363 = vmatpush.msra.mxu3 %v215_v43  ;;  %383 = vmatpush.msrb.mxu0 %v216_v44  ;;  %v289_v5 = vld [vmem:[#allocation7 + $0x5c0] sm:$0xff]  ;;  %v290_v6 = vld [vmem:[#allocation7 + $0x5c8] sm:$0xff]  ;;  %v291_v7 = vld [vmem:[#allocation7 + $0x5d0] sm:$0xff] }
  0x35   :  { %324 = vmatpush.msra.mxu1 %v205_v45  ;;  %344 = vmatpush.msra.mxu2 %v206_v46  ;;  %v292_v8 = vld [vmem:[#allocation7 + $0x5d8] sm:$0xff]  ;;  %v281_v9 = vld [vmem:[#allocation7 + $0x560] sm:$0xff]  ;;  %v282_v10 = vld [vmem:[#allocation7 + $0x568] sm:$0xff] }
  0x36   :  { %364 = vmatpush.msra.mxu3 %v207_v47  ;;  %384 = vmatpush.msrb.mxu0 %v208_v48  ;;  %v283_v11 = vld [vmem:[#allocation7 + $0x570] sm:$0xff]  ;;  %v284_v12 = vld [vmem:[#allocation7 + $0x578] sm:$0xff]  ;;  %v273_v13 = vld [vmem:[#allocation7 + $0x500] sm:$0xff] }
  0x37   :  { %325 = vmatpush.msra.mxu1 %v197_v49  ;;  %345 = vmatpush.msra.mxu2 %v198_v50  ;;  %v274_v14 = vld [vmem:[#allocation7 + $0x508] sm:$0xff]  ;;  %v275_v15 = vld [vmem:[#allocation7 + $0x510] sm:$0xff]  ;;  %v276_v16 = vld [vmem:[#allocation7 + $0x518] sm:$0xff] }
  0x38   :  { %365 = vmatpush.msra.mxu3 %v199_v51  ;;  %385 = vmatpush.msrb.mxu0 %v200_v52  ;;  %v265_v17 = vld [vmem:[#allocation7 + $0x4a0] sm:$0xff]  ;;  %v266_v18 = vld [vmem:[#allocation7 + $0x4a8] sm:$0xff]  ;;  %v267_v19 = vld [vmem:[#allocation7 + $0x4b0] sm:$0xff] }
  0x39   :  { %326 = vmatpush.msra.mxu1 %v189_v53  ;;  %346 = vmatpush.msra.mxu2 %v190_v54  ;;  %v268_v20 = vld [vmem:[#allocation7 + $0x4b8] sm:$0xff]  ;;  %v257_v21 = vld [vmem:[#allocation7 + $0x440] sm:$0xff]  ;;  %v258_v23 = vld [vmem:[#allocation7 + $0x448] sm:$0xff] }
  0x3a   :  { %366 = vmatpush.msra.mxu3 %v191_v55  ;;  %386 = vmatpush.msrb.mxu0 %v192_v56  ;;  %v259_v24 = vld [vmem:[#allocation7 + $0x450] sm:$0xff]  ;;  %v260_v25 = vld [vmem:[#allocation7 + $0x458] sm:$0xff]  ;;  %v249_v26 = vld [vmem:[#allocation7 + $0x3e0] sm:$0xff] }
  0x3b   :  { %327 = vmatpush.msra.mxu1 %v181_v57  ;;  %347 = vmatpush.msra.mxu2 %v182_v58  ;;  %v250_v27 = vld [vmem:[#allocation7 + $0x3e8] sm:$0xff]  ;;  %v251_v28 = vld [vmem:[#allocation7 + $0x3f0] sm:$0xff]  ;;  %v252_v29 = vld [vmem:[#allocation7 + $0x3f8] sm:$0xff] }
  0x3c   :  { %367 = vmatpush.msra.mxu3 %v183_v59  ;;  %387 = vmatpush.msrb.mxu0 %v184_v60  ;;  %v241_v30 = vld [vmem:[#allocation7 + $0x380] sm:$0xff]  ;;  %v242_v31 = vld [vmem:[#allocation7 + $0x388] sm:$0xff]  ;;  %v243_v32 = vld [vmem:[#allocation7 + $0x390] sm:$0xff] }
  0x3d   :  { %328 = vmatpush.msra.mxu1 %v173_v61  ;;  %348 = vmatpush.msra.mxu2 %v174_v62  ;;  %v244_v33 = vld [vmem:[#allocation7 + $0x398] sm:$0xff]  ;;  %v233_v34 = vld [vmem:[#allocation7 + $0x320] sm:$0xff]  ;;  %v234_v35 = vld [vmem:[#allocation7 + $0x328] sm:$0xff] }
  0x3e   :  { %368 = vmatpush.msra.mxu3 %v175_v63  ;;  %388 = vmatpush.msrb.mxu0 %v176_v0  ;;  %v235_v36 = vld [vmem:[#allocation7 + $0x330] sm:$0xff]  ;;  %v236_v37 = vld [vmem:[#allocation7 + $0x338] sm:$0xff]  ;;  %v225_v38 = vld [vmem:[#allocation7 + $0x2c0] sm:$0xff] }
  0x3f   :  { %329 = vmatpush.msra.mxu1 %v165_v1  ;;  %349 = vmatpush.msra.mxu2 %v166_v2  ;;  %v226_v39 = vld [vmem:[#allocation7 + $0x2c8] sm:$0xff]  ;;  %v227_v40 = vld [vmem:[#allocation7 + $0x2d0] sm:$0xff]  ;;  %v228_v41 = vld [vmem:[#allocation7 + $0x2d8] sm:$0xff] }
  0x40   :  { %369 = vmatpush.msra.mxu3 %v167_v3  ;;  %389 = vmatpush.msrb.mxu0 %v168_v4  ;;  %v217_v42 = vld [vmem:[#allocation7 + $0x260] sm:$0xff]  ;;  %v218_v43 = vld [vmem:[#allocation7 + $0x268] sm:$0xff]  ;;  %v219_v44 = vld [vmem:[#allocation7 + $0x270] sm:$0xff] }
  0x41   :  { %394 = vmatpush.msrb.mxu1 %v289_v5  ;;  %414 = vmatpush.msrb.mxu2 %v290_v6  ;;  %v220_v45 = vld [vmem:[#allocation7 + $0x278] sm:$0xff]  ;;  %v209_v46 = vld [vmem:[#allocation7 + $0x200] sm:$0xff]  ;;  %v210_v47 = vld [vmem:[#allocation7 + $0x208] sm:$0xff] }
  0x42   :  { %434 = vmatpush.msrb.mxu3 %v291_v7  ;;  %454 = vmatpush.msra.mxu0 %v292_v8  ;;  %v211_v48 = vld [vmem:[#allocation7 + $0x210] sm:$0xff]  ;;  %v119_v49 = vld [vmem:[#allocation11] ss:$0 sm:$0xff]  ;;  %v212_v50 = vld [vmem:[#allocation7 + $0x218] sm:$0xff] }
  0x43   :  { %395 = vmatpush.msrb.mxu1 %v281_v9  ;;  %415 = vmatpush.msrb.mxu2 %v282_v10  ;;  %v201_v51 = vld [vmem:[#allocation7 + $0x1a0] sm:$0xff]  ;;  %v202_v52 = vld [vmem:[#allocation7 + $0x1a8] sm:$0xff]  ;;  %v203_v53 = vld [vmem:[#allocation7 + $0x1b0] sm:$0xff] }
  0x44   :  { %435 = vmatpush.msrb.mxu3 %v283_v11  ;;  %455 = vmatpush.msra.mxu0 %v284_v12  ;;  %v204_v55 = vld [vmem:[#allocation7 + $0x1b8] sm:$0xff]  ;;  %v193_v57 = vld [vmem:[#allocation7 + $0x140] sm:$0xff]  ;;  %v194_v58 = vld [vmem:[#allocation7 + $0x148] sm:$0xff] }
  0x45   :  { %396 = vmatpush.msrb.mxu1 %v273_v13  ;;  %416 = vmatpush.msrb.mxu2 %v274_v14  ;;  %v195_v59 = vld [vmem:[#allocation7 + $0x150] sm:$0xff]  ;;  %v196_v61 = vld [vmem:[#allocation7 + $0x158] sm:$0xff]  ;;  %v185_v62 = vld [vmem:[#allocation7 + $0xe0] sm:$0xff] }
  0x46   :  { %436 = vmatpush.msrb.mxu3 %v275_v15  ;;  %456 = vmatpush.msra.mxu0 %v276_v16  ;;  %v186_v63 = vld [vmem:[#allocation7 + $0xe8] sm:$0xff]  ;;  %v187_v0 = vld [vmem:[#allocation7 + $0xf0] sm:$0xff]  ;;  %v188_v1 = vld [vmem:[#allocation7 + $0xf8] sm:$0xff] }
  0x47   :  { %397 = vmatpush.msrb.mxu1 %v265_v17  ;;  %417 = vmatpush.msrb.mxu2 %v266_v18  ;;  %v177_v2 = vld [vmem:[#allocation7 + $0x80] sm:$0xff]  ;;  %v178_v3 = vld [vmem:[#allocation7 + $0x88] sm:$0xff]  ;;  %v179_v4 = vld [vmem:[#allocation7 + $0x90] sm:$0xff] }
  0x48   :  { %437 = vmatpush.msrb.mxu3 %v267_v19  ;;  %457 = vmatpush.msra.mxu0 %v268_v20  ;;  %v180_v5 = vld [vmem:[#allocation7 + $0x98] sm:$0xff]  ;;  %v169_v6 = vld [vmem:[#allocation7 + $0x20] sm:$0xff]  ;;  %v170_v7 = vld [vmem:[#allocation7 + $0x28] sm:$0xff] }
  0x49   :  { %398 = vmatpush.msrb.mxu1 %v257_v21  ;;  %418 = vmatpush.msrb.mxu2 %v258_v23  ;;  %v171_v8 = vld [vmem:[#allocation7 + $0x30] sm:$0xff]  ;;  %v172_v9 = vld [vmem:[#allocation7 + $0x38] sm:$0xff] }
  0x4a   :  { %438 = vmatpush.msrb.mxu3 %v259_v24  ;;  %458 = vmatpush.msra.mxu0 %v260_v25  ;;  %v514_v24 = vld [vmem:[#allocation7 + $0x5e0] sm:$0xff] }
  0x4b   :  { %399 = vmatpush.msrb.mxu1 %v249_v26  ;;  %419 = vmatpush.msrb.mxu2 %v250_v27  ;;  %v513_v25 = vld [vmem:[#allocation7 + $0x580] sm:$0xff] }
  0x4c   :  { %439 = vmatpush.msrb.mxu3 %v251_v28  ;;  %459 = vmatpush.msra.mxu0 %v252_v29  ;;  %v512_v26 = vld [vmem:[#allocation7 + $0x520] sm:$0xff] }
  0x4d   :  { %400 = vmatpush.msrb.mxu1 %v241_v30  ;;  %420 = vmatpush.msrb.mxu2 %v242_v31  ;;  %v511_v27 = vld [vmem:[#allocation7 + $0x4c0] sm:$0xff] }
  0x4e   :  { %440 = vmatpush.msrb.mxu3 %v243_v32  ;;  %460 = vmatpush.msra.mxu0 %v244_v33  ;;  %v510_v28 = vld [vmem:[#allocation7 + $0x460] sm:$0xff] }
  0x4f   :  { %401 = vmatpush.msrb.mxu1 %v233_v34  ;;  %421 = vmatpush.msrb.mxu2 %v234_v35  ;;  %v509_v29 = vld [vmem:[#allocation7 + $0x400] sm:$0xff] }
  0x50   :  { %441 = vmatpush.msrb.mxu3 %v235_v36  ;;  %461 = vmatpush.msra.mxu0 %v236_v37  ;;  %v508_v30 = vld [vmem:[#allocation7 + $0x3a0] sm:$0xff] }
  0x51   :  { %402 = vmatpush.msrb.mxu1 %v225_v38  ;;  %422 = vmatpush.msrb.mxu2 %v226_v39  ;;  %v507_v31 = vld [vmem:[#allocation7 + $0x340] sm:$0xff] }
  0x52   :  { %442 = vmatpush.msrb.mxu3 %v227_v40  ;;  %462 = vmatpush.msra.mxu0 %v228_v41  ;;  %v506_v32 = vld [vmem:[#allocation7 + $0x2e0] sm:$0xff] }
  0x53   :  { %403 = vmatpush.msrb.mxu1 %v217_v42  ;;  %423 = vmatpush.msrb.mxu2 %v218_v43  ;;  %v505_v33 = vld [vmem:[#allocation7 + $0x280] sm:$0xff] }
  0x54   :  { %443 = vmatpush.msrb.mxu3 %v219_v44  ;;  %463 = vmatpush.msra.mxu0 %v220_v45  ;;  %v504_v40 = vld [vmem:[#allocation7 + $0x220] sm:$0xff] }
  0x55   :  { %404 = vmatpush.msrb.mxu1 %v209_v46  ;;  %424 = vmatpush.msrb.mxu2 %v210_v47  ;;  %v503_v42 = vld [vmem:[#allocation7 + $0x1c0] sm:$0xff] }
  0x56   :  { %444 = vmatpush.msrb.mxu3 %v211_v48  ;;  %464 = vmatpush.msra.mxu0 %v212_v50  ;;  %v502_v43 = vld [vmem:[#allocation7 + $0x160] sm:$0xff] }
  0x57   :  { %405 = vmatpush.msrb.mxu1 %v201_v51  ;;  %425 = vmatpush.msrb.mxu2 %v202_v52  ;;  %v501_v44 = vld [vmem:[#allocation7 + $0x100] sm:$0xff] }
  0x58   :  { %445 = vmatpush.msrb.mxu3 %v203_v53  ;;  %465 = vmatpush.msra.mxu0 %v204_v55  ;;  %v500_v45 = vld [vmem:[#allocation7 + $0xa0] sm:$0xff] }
  0x59   :  { %406 = vmatpush.msrb.mxu1 %v193_v57  ;;  %426 = vmatpush.msrb.mxu2 %v194_v58  ;;  %v499_v46 = vld [vmem:[#allocation7 + $0x40] sm:$0xff] }
  0x5a   :  { %446 = vmatpush.msrb.mxu3 %v195_v59  ;;  %466 = vmatpush.msra.mxu0 %v196_v61  ;;  %v294_v50 = vld [vmem:[#allocation11 + $0x2] ss:$8 sm:$0xf] }
  0x5b   :  { %407 = vmatpush.msrb.mxu1 %v185_v62  ;;  %427 = vmatpush.msrb.mxu2 %v186_v63  ;;  %v295_v52 = vld [vmem:[#allocation11 + $0x2] ss:$8 sm:$0xf0] }
  0x5c   :  { %447 = vmatpush.msrb.mxu3 %v187_v0  ;;  %467 = vmatpush.msra.mxu0 %v188_v1  ;;  %v1387_v53 = vor.u32 %v295_v52, %v294_v50 }
  0x5d   :  { %408 = vmatpush.msrb.mxu1 %v177_v2  ;;  %428 = vmatpush.msrb.mxu2 %v178_v3 }
  0x5e   :  { %448 = vmatpush.msrb.mxu3 %v179_v4  ;;  %468 = vmatpush.msra.mxu0 %v180_v5  ;;  %v298_v55 = vperm.slane %v1387_v53, 0  ;;  %v299_v62 = vperm.slane %v1387_v53, 1  ;;  %v595_v4 = vld [vmem:[#allocation8 + $0x78] sm:$0xff] }
  0x5f   :  { %409 = vmatpush.msrb.mxu1 %v169_v6  ;;  %429 = vmatpush.msrb.mxu2 %v170_v7  ;;  %v594_v6 = vld [vmem:[#allocation8 + $0x70] sm:$0xff]  ;;  %v593_v7 = vld [vmem:[#allocation8 + $0x68] sm:$0xff] }
  0x60   :  { %449 = vmatpush.msrb.mxu3 %v171_v8  ;;  %469 = vmatpush.msra.mxu0 %v172_v9  ;;  %v592_v8 = vld [vmem:[#allocation8 + $0x60] sm:$0xff] }
  0x61   :  { %v515_v9 = vld [vmem:[#allocation11 + $0x3] ss:$0 sm:$0xff] }
  0x9c   :  { %v476_v34 = vpop.xlane.xlu0 %475 }
  0x9d   :  { %v480_v35 = vmul.f32 0.03125, %v476_v34  ;;  %v582_v34 = vld [vmem:[#allocation8 + $0x10] sm:$0xff] }
  0x9e   :  { %v141_v54 = vpop.f32.mrf.mxu0 }
  0x9f   :  { %v142_v56 = vadd.f32 %v141_v54, %v119_v49  ;;  %v482_v37 = vmul.f32 %v480_v35, %v480_v35  ;;  %v484_v58 = vsub.f32 %v1382_v22, %v480_v35 }
  0xa1   :  { %v1087_v60 = vmul.f32 -1.442695, %v142_v56 }
  0xa3   :  { %1105 = vpow2.f32 %v1087_v60 }
  0xa5   :  { %v479_v36 = vpop.xlane.xlu0 %478 }
  0xa6   :  { %v481_v38 = vmul.f32 0.03125, %v479_v36  ;;  %v581_v36 = vld [vmem:[#allocation8 + $0x8] sm:$0xff] }
  0xa8   :  { %v483_v39 = vsub.f32 %v481_v38, %v482_v37  ;;  %v580_v38 = vld [vmem:[#allocation8] sm:$0xff] }
  0xa9   :  { %v1106_v10 = vpop.eup %1105 }
  0xaa   :  { %v147_v11 = vadd.f32 1.0, %v1106_v10  ;;  %v485_v41 = vadd.f32 1e-05, %v483_v39  ;;  %v591_v10 = vld [vmem:[#allocation8 + $0x58] sm:$0xff] }
  0xac   :  { %1107 = vrcp.f32 %v147_v11  ;;  %v159_v15 = vand.u32 2147483648, %v147_v11  ;;  %v157_v17 = vand.u32 2147483647, %v147_v11  ;;  %vm153_vm2 = vweird.f32 %v147_v11 }
  0xad   :  { %1109 = vrsqrt.f32 %v485_v41  ;;  %vm492_vm5 = vweird.f32 %v485_v41 }
  0xae   :  { %v160_v19 = vor.u32 1.1754944e-38, %v159_v15  ;;  %vm158_vm4 = vcmp.eq.f32.partialorder %v157_v17, 8.507059e+37  ;;  %v589_v15 = vld [vmem:[#allocation8 + $0x48] sm:$0xff]  ;;  %v588_v17 = vld [vmem:[#allocation8 + $0x40] sm:$0xff] }
  0xb2   :  { %v1108_v12 = vpop.eup %1107 }
  0xb3   :  { %v149_v13 = vmul.f32 %v1108_v12, %v147_v11  ;;  %vm154_vm1 = vweird.f32 %v1108_v12  ;;  %v1110_v47 = vpop.eup %1109 }
  0xb4   :  { %vm155_vm3 = vmor %vm153_vm2, %vm154_vm1  ;;  %v487_v48 = vmul.f32 %v1110_v47, %v485_v41  ;;  %vm493_vm6 = vweird.f32 %v1110_v47 }
  0xb5   :  { %v150_v14 = vsub.f32 1.0, %v149_v13  ;;  %vm494_vm7 = vmor %vm492_vm5, %vm493_vm6  ;;  %v590_v13 = vld [vmem:[#allocation8 + $0x50] sm:$0xff] }
  0xb6   :  { %v488_v49 = vmul.f32 %v1110_v47, %v487_v48 }
  0xb7   :  { %v151_v16 = vmul.f32 %v1108_v12, %v150_v14 }
  0xb8   :  { %v489_v51 = vmul.f32 0.5, %v488_v49 }
  0xb9   :  { %v152_v18 = vadd.f32 %v1108_v12, %v151_v16 }
  0xba   :  { %v490_v54 = vsub.f32 1.5, %v489_v51 }
  0xbb   :  { %v156_v20 = vsel %vm155_vm3, %v1108_v12, %v152_v18 }
  0xbc   :  { %v161_v21 = vsel %vm158_vm4, %v160_v19, %v156_v20  ;;  %v587_v19 = vld [vmem:[#allocation8 + $0x38] sm:$0xff] }
  0xbd   :  { %v163_v23 = vmul.f32 %v161_v21, %v142_v56  ;;  %v491_v56 = vmul.f32 %v1110_v47, %v490_v54 }
  0xbf   :  { %330 = vmatmul.f32.vlgmr.msra.gmra.mxu1 %v163_v23  ;;  %350 = vmatmul.f32.vlgmr.msra.gmra.mxu2 %v163_v23  ;;  %v495_v60 = vsel %vm494_vm7, %v1110_v47, %v491_v56 }
  0xc0   :  { %370 = vmatmul.f32.vlgmr.msra.gmra.mxu3 %v163_v23  ;;  %390 = vmatmul.f32.vlgmr.msrb.gmra.mxu0 %v163_v23  ;;  %v496_v63 = vmul.f32 %v495_v60, %v484_v58 }
  0xc1   :  { %516 = vmatpush.msra.mxu1 %v514_v24  ;;  %597 = vmatpush.msra.mxu2 %v595_v4  ;;  %v596_v4 = vld [vmem:[#allocation11 + $0x5] ss:$0 sm:$0xff] }
  0xc3   :  { %517 = vmatpush.msra.mxu1 %v513_v25  ;;  %598 = vmatpush.msra.mxu2 %v594_v6 }
  0xc5   :  { %518 = vmatpush.msra.mxu1 %v512_v26  ;;  %599 = vmatpush.msra.mxu2 %v593_v7  ;;  %v585_v26 = vld [vmem:[#allocation8 + $0x28] sm:$0xff] }
  0xc7   :  { %410 = vmatmul.f32.vlgmr.msrb.gmra.mxu1 %v163_v23  ;;  %430 = vmatmul.f32.vlgmr.msrb.gmra.mxu2 %v163_v23 }
  0xc8   :  { %450 = vmatmul.f32.vlgmr.msrb.gmra.mxu3 %v163_v23  ;;  %470 = vmatmul.f32.vlgmr.msra.gmra.mxu0 %v163_v23  ;;  %v586_v23 = vld [vmem:[#allocation8 + $0x30] sm:$0xff] }
  0xc9   :  { %519 = vmatpush.msra.mxu1 %v511_v27  ;;  %600 = vmatpush.msra.mxu2 %v592_v8 }
  0xcb   :  { %520 = vmatpush.msra.mxu1 %v510_v28  ;;  %601 = vmatpush.msra.mxu2 %v591_v10 }
  0xcd   :  { %521 = vmatpush.msra.mxu1 %v509_v29  ;;  %602 = vmatpush.msra.mxu2 %v590_v13  ;;  %v584_v29 = vld [vmem:[#allocation8 + $0x20] sm:$0xff]  ;;  %v658_v13 = vld [vmem:[#allocation7 + $0x588] sm:$0xff] }
  0xcf   :  { %522 = vmatpush.msra.mxu1 %v508_v30  ;;  %603 = vmatpush.msra.mxu2 %v589_v15  ;;  %v656_v15 = vld [vmem:[#allocation7 + $0x4c8] sm:$0xff] }
  0xd1   :  { %523 = vmatpush.msra.mxu1 %v507_v31  ;;  %604 = vmatpush.msra.mxu2 %v588_v17  ;;  %v583_v31 = vld [vmem:[#allocation8 + $0x18] sm:$0xff]  ;;  %v654_v17 = vld [vmem:[#allocation7 + $0x408] sm:$0xff] }
  0xd3   :  { %524 = vmatpush.msra.mxu1 %v506_v32  ;;  %605 = vmatpush.msra.mxu2 %v587_v19  ;;  %v651_v19 = vld [vmem:[#allocation7 + $0x2e8] sm:$0xff] }
  0xd5   :  { %525 = vmatpush.msra.mxu1 %v505_v33  ;;  %606 = vmatpush.msra.mxu2 %v586_v23  ;;  %v648_v23 = vld [vmem:[#allocation7 + $0x1c8] sm:$0xff] }
  0xd7   :  { %526 = vmatpush.msra.mxu1 %v504_v40  ;;  %607 = vmatpush.msra.mxu2 %v585_v26  ;;  %v646_v26 = vld [vmem:[#allocation7 + $0x108] sm:$0xff] }
  0xd9   :  { %527 = vmatpush.msra.mxu1 %v503_v42  ;;  %608 = vmatpush.msra.mxu2 %v584_v29 }
  0xdb   :  { %528 = vmatpush.msra.mxu1 %v502_v43  ;;  %609 = vmatpush.msra.mxu2 %v583_v31 }
  0xdd   :  { %529 = vmatpush.msra.mxu1 %v501_v44  ;;  %610 = vmatpush.msra.mxu2 %v582_v34 }
  0xdf   :  { %530 = vmatpush.msra.mxu1 %v500_v45  ;;  %611 = vmatpush.msra.mxu2 %v581_v36 }
  0xe1   :  { %531 = vmatpush.msra.mxu1 %v499_v46  ;;  %612 = vmatpush.msra.mxu2 %v580_v38  ;;  %v301_v38 = vperm.slane %v1387_v53, 3 }
 0x13c   :  { %v331_v57 = vpop.f32.mrf.mxu1 }
 0x13d   :  { %v332_v59 = vadd.f32 %v331_v57, %v298_v55 }
 0x13f   :  { %v474_v61 = vadd.f32 1.0, %v332_v59 }
 0x141   :  { %v497_v1 = vmul.f32 %v496_v63, %v474_v61 }
 0x142   :  { %v351_v0 = vpop.f32.mrf.mxu2 }
 0x143   :  { %v352_v2 = vadd.f32 %v351_v0, %v299_v62 }
 0x144   :  { %v1392_v5 = vpop.f32.mrf.mxu1 }
 0x145   :  { %v498_v3 = vadd.f32 %v497_v1, %v352_v2  ;;  %v300_v2 = vperm.slane %v1387_v53, 2 }
 0x147   :  { %532 = vmatmul.f32.vlgmr.msra.gmra.mxu1 %v498_v3  ;;  %v371_v3 = vpop.f32.mrf.mxu3 }
 0x148   :  { %v372_v7 = vadd.f32 %v371_v3, %v300_v2  ;;  %v734_v2 = vld [vmem:[#allocation8 + $0xc0] sm:$0xff] }
 0x14a   :  { %v1398_v1 = vpop.f32.mrf.mxu2 }
 0x1c4   :  { %v533_v11 = vpop.f32.mrf.mxu1 }
 0x1c5   :  { %v1394_v12 = vadd.f32 %v533_v11, %v515_v9 }
 0x1c7   :  { %v537_v14 = vmul.f32 0.70710677, %v1394_v12  ;;  %v536_v62 = vmul.f32 0.5, %v1394_v12  ;;  %v659_v12 = vld [vmem:[#allocation7 + $0x5e8] sm:$0xff] }
 0x1c8   :  { %661 = vmatpush.msra.mxu3 %v659_v12  ;;  %v731_v12 = vld [vmem:[#allocation8 + $0xa8] sm:$0xff] }
 0x1c9   :  { %v538_v16 = vmul.f32 %v537_v14, %v537_v14 }
 0x1ca   :  { %662 = vmatpush.msra.mxu3 %v658_v13 }
 0x1cb   :  { %v539_v18 = vmin.f32 %v538_v16, 16.0  ;;  %v655_v16 = vld [vmem:[#allocation7 + $0x468] sm:$0xff] }
 0x1cd   :  { %v540_v20 = vmul.f32 2.1237322e-06, %v539_v18  ;;  %v551_v21 = vmul.f32 3.8918573e-05, %v539_v18 }
 0x1cf   :  { %v541_v24 = vadd.f32 0.00028619796, %v540_v20  ;;  %v552_v25 = vadd.f32 0.001143296, %v551_v21  ;;  %v650_v20 = vld [vmem:[#allocation7 + $0x288] sm:$0xff] }
 0x1d0   :  { %v649_v21 = vld [vmem:[#allocation7 + $0x228] sm:$0xff] }
 0x1d1   :  { %v542_v27 = vmul.f32 %v541_v24, %v539_v18  ;;  %v553_v28 = vmul.f32 %v552_v25, %v539_v18  ;;  %v647_v25 = vld [vmem:[#allocation7 + $0x168] sm:$0xff] }
 0x1d3   :  { %v554_v30 = vadd.f32 0.014752088, %v553_v28  ;;  %v543_v32 = vadd.f32 0.0036580483, %v542_v27  ;;  %v645_v27 = vld [vmem:[#allocation7 + $0xa8] sm:$0xff] }
 0x1d4   :  { %v644_v28 = vld [vmem:[#allocation7 + $0x48] sm:$0xff] }
 0x1d5   :  { %v555_v33 = vmul.f32 %v554_v30, %v539_v18  ;;  %v544_v37 = vmul.f32 %v543_v32, %v539_v18 }
 0x1d7   :  { %v556_v35 = vadd.f32 0.112945676, %v555_v33  ;;  %v545_v41 = vadd.f32 0.05243302, %v544_v37 }
 0x1d9   :  { %v557_v39 = vmul.f32 %v556_v35, %v539_v18  ;;  %v546_v44 = vmul.f32 %v545_v41, %v539_v18 }
 0x1db   :  { %v558_v40 = vadd.f32 0.4994258, %v557_v39  ;;  %v547_v45 = vadd.f32 0.18741608, %v546_v44  ;;  %v391_v39 = vpop.f32.mrf.mxu0  ;;  %v302_v44 = vperm.slane %v1387_v53, 4 }
 0x1dd   :  { %v559_v42 = vmul.f32 %v558_v40, %v539_v18  ;;  %v548_v47 = vmul.f32 %v547_v45, %v539_v18  ;;  %v652_v18 = vld [vmem:[#allocation7 + $0x348] sm:$0xff] }
 0x1df   :  { %v560_v43 = vadd.f32 1.0, %v559_v42  ;;  %v549_v51 = vadd.f32 1.1283791, %v548_v47  ;;  %v392_v42 = vadd.f32 %v391_v39, %v301_v38 }
 0x1e1   :  { %1111 = vrcp.f32 %v560_v43  ;;  %v572_v50 = vand.u32 2147483648, %v560_v43  ;;  %v570_v54 = vand.u32 2147483647, %v560_v43  ;;  %vm566_vm9 = vweird.f32 %v560_v43 }
 0x1e2   :  { %v550_v57 = vmul.f32 %v549_v51, %v537_v14  ;;  %v657_v14 = vld [vmem:[#allocation7 + $0x528] sm:$0xff]  ;;  %v619_v47 = vadd.f32 1.0, %v392_v42 }
 0x1e3   :  { %v573_v56 = vor.u32 1.1754944e-38, %v572_v50  ;;  %vm571_vm11 = vcmp.eq.f32.partialorder %v570_v54, 8.507059e+37  ;;  %663 = vmatpush.msra.mxu3 %v657_v14  ;;  %v1411_v54 = vpop.f32.mrf.mxu3 }
 0x1e5   :  { %664 = vmatpush.msra.mxu3 %v656_v15  ;;  %v730_v15 = vld [vmem:[#allocation8 + $0xa0] sm:$0xff] }
 0x1e7   :  { %v1112_v46 = vpop.eup %1111  ;;  %665 = vmatpush.msra.mxu3 %v655_v16 }
 0x1e8   :  { %v562_v48 = vmul.f32 %v1112_v46, %v560_v43  ;;  %vm567_vm8 = vweird.f32 %v1112_v46 }
 0x1e9   :  { %vm568_vm10 = vmor %vm566_vm9, %vm567_vm8  ;;  %666 = vmatpush.msra.mxu3 %v654_v17  ;;  %v729_v17 = vld [vmem:[#allocation8 + $0x98] sm:$0xff] }
 0x1ea   :  { %v563_v49 = vsub.f32 1.0, %v562_v48 }
 0x1ec   :  { %v564_v52 = vmul.f32 %v1112_v46, %v563_v49  ;;  %v412_v49 = vadd.f32 %v1392_v5, %v302_v44  ;;  %v736_v5 = vld [vmem:[#allocation8 + $0xd0] sm:$0xff] }
 0x1ee   :  { %v565_v55 = vadd.f32 %v1112_v46, %v564_v52  ;;  %v741_v52 = vld [vmem:[#allocation8 + $0xf8] sm:$0xff] }
 0x1ef   :  { %743 = vmatpush.msrb.mxu0 %v741_v52  ;;  %v742_v52 = vld [vmem:[#allocation11 + $0x6] ss:$0 sm:$0xff] }
 0x1f0   :  { %v569_v58 = vsel %vm568_vm10, %v1112_v46, %v565_v55  ;;  %v740_v55 = vld [vmem:[#allocation8 + $0xf0] sm:$0xff] }
 0x1f1   :  { %v574_v59 = vsel %vm571_vm11, %v573_v56, %v569_v58  ;;  %744 = vmatpush.msrb.mxu0 %v740_v55  ;;  %v739_v56 = vld [vmem:[#allocation8 + $0xe8] sm:$0xff]  ;;  %v660_v58 = vld [vmem:[#allocation11 + $0x4] ss:$0 sm:$0xff] }
 0x1f2   :  { %v575_v60 = vmul.f32 %v574_v59, %v550_v57  ;;  %v738_v57 = vld [vmem:[#allocation8 + $0xe0] sm:$0xff]  ;;  %v737_v59 = vld [vmem:[#allocation8 + $0xd8] sm:$0xff] }
 0x1f3   :  { %745 = vmatpush.msrb.mxu0 %v739_v56 }
 0x1f4   :  { %v1088_v61 = vclamps-f32 %v575_v60, 1.0 }
 0x1f5   :  { %746 = vmatpush.msrb.mxu0 %v738_v57 }
 0x1f6   :  { %v578_v63 = vadd.f32 1.0, %v1088_v61 }
 0x1f7   :  { %747 = vmatpush.msrb.mxu0 %v737_v59 }
 0x1f8   :  { %v579_v0 = vmul.f32 %v578_v63, %v536_v62  ;;  %v735_v63 = vld [vmem:[#allocation8 + $0xc8] sm:$0xff] }
 0x1f9   :  { %748 = vmatpush.msrb.mxu0 %v736_v5  ;;  %v821_v5 = vld [vmem:[#allocation7 + $0x5f8] sm:$0xff] }
 0x1fa   :  { %613 = vmatmul.f32.vlgmr.msra.gmra.mxu2 %v579_v0 }
 0x1fb   :  { %749 = vmatpush.msrb.mxu0 %v735_v63  ;;  %849 = vmatpush.msrb.mxu2 %v821_v5  ;;  %v819_v63 = vld [vmem:[#allocation7 + $0x598] sm:$0xff]  ;;  %v987_v5 = vld [vmem:[#allocation10 + $0xf0] sm:$0xff] }
 0x1fd   :  { %750 = vmatpush.msrb.mxu0 %v734_v2  ;;  %850 = vmatpush.msrb.mxu2 %v819_v63  ;;  %v815_v2 = vld [vmem:[#allocation7 + $0x4d8] sm:$0xff]  ;;  %v986_v63 = vld [vmem:[#allocation10 + $0xe8] sm:$0xff] }
 0x27d   :  { %v614_v6 = vpop.f32.mrf.mxu2 }
 0x27e   :  { %v615_v8 = vadd.f32 %v614_v6, %v596_v4  ;;  %v733_v4 = vld [vmem:[#allocation8 + $0xb8] sm:$0xff] }
 0x27f   :  { %751 = vmatpush.msrb.mxu0 %v733_v4  ;;  %v813_v4 = vld [vmem:[#allocation7 + $0x478] sm:$0xff] }
 0x280   :  { %v617_v9 = vmul.f32 %v615_v8, %v372_v7  ;;  %v732_v8 = vld [vmem:[#allocation8 + $0xb0] sm:$0xff] }
 0x281   :  { %752 = vmatpush.msrb.mxu0 %v732_v8  ;;  %v808_v8 = vld [vmem:[#allocation7 + $0x3b0] sm:$0xff] }
 0x282   :  { %v1402_v10 = vadd.f32 %v617_v9, %v1382_v22  ;;  %v653_v22 = vld [vmem:[#allocation7 + $0x3a8] sm:$0xff] }
 0x283   :  { %667 = vmatpush.msra.mxu3 %v653_v22  ;;  %753 = vmatpush.msrb.mxu0 %v731_v12  ;;  %v807_v12 = vld [vmem:[#allocation7 + $0x358] sm:$0xff] }
 0x284   :  { %620 = vadd.xlane.f32.xlu1 %v1402_v10  ;;  %v622_v11 = vmul.f32 %v1402_v10, %v1402_v10 }
 0x285   :  { %668 = vmatpush.msra.mxu3 %v652_v18  ;;  %754 = vmatpush.msrb.mxu0 %v730_v15  ;;  %v802_v15 = vld [vmem:[#allocation7 + $0x290] sm:$0xff] }
 0x287   :  { %669 = vmatpush.msra.mxu3 %v651_v19  ;;  %755 = vmatpush.msrb.mxu0 %v729_v17  ;;  %v728_v19 = vld [vmem:[#allocation8 + $0x90] sm:$0xff] }
 0x288   :  { %v800_v17 = vld [vmem:[#allocation7 + $0x230] sm:$0xff] }
 0x289   :  { %670 = vmatpush.msra.mxu3 %v650_v20  ;;  %756 = vmatpush.msrb.mxu0 %v728_v19  ;;  %v799_v19 = vld [vmem:[#allocation7 + $0x1d8] sm:$0xff] }
 0x28b   :  { %671 = vmatpush.msra.mxu3 %v649_v21  ;;  %v727_v21 = vld [vmem:[#allocation8 + $0x88] sm:$0xff] }
 0x28c   :  { %623 = vadd.xlane.f32.xlu1 %v622_v11  ;;  %757 = vmatpush.msrb.mxu0 %v727_v21  ;;  %v796_v21 = vld [vmem:[#allocation7 + $0x170] sm:$0xff] }
 0x28d   :  { %672 = vmatpush.msra.mxu3 %v648_v23 }
 0x28f   :  { %673 = vmatpush.msra.mxu3 %v647_v25 }
 0x291   :  { %674 = vmatpush.msra.mxu3 %v646_v26 }
 0x293   :  { %675 = vmatpush.msra.mxu3 %v645_v27 }
 0x295   :  { %676 = vmatpush.msra.mxu3 %v644_v28 }
 0x2f7   :  { %v621_v24 = vpop.xlane.xlu1 %620 }
 0x2f8   :  { %v625_v29 = vmul.f32 0.03125, %v621_v24  ;;  %v726_v24 = vld [vmem:[#allocation8 + $0x80] sm:$0xff] }
 0x2f9   :  { %758 = vmatpush.msrb.mxu0 %v726_v24  ;;  %v794_v24 = vld [vmem:[#allocation7 + $0x110] sm:$0xff] }
 0x2fa   :  { %v627_v31 = vmul.f32 %v625_v29, %v625_v29  ;;  %v629_v45 = vsub.f32 %v1402_v10, %v625_v29 }
 0x2ff   :  { %v624_v30 = vpop.xlane.xlu1 %623 }
 0x300   :  { %v626_v32 = vmul.f32 0.03125, %v624_v30 }
 0x302   :  { %v628_v33 = vsub.f32 %v626_v32, %v627_v31 }
 0x304   :  { %v630_v34 = vadd.f32 1e-05, %v628_v33 }
 0x306   :  { %1113 = vrsqrt.f32 %v630_v34  ;;  %vm637_vm13 = vweird.f32 %v630_v34 }
 0x30c   :  { %v1114_v35 = vpop.eup %1113 }
 0x30d   :  { %v632_v36 = vmul.f32 %v1114_v35, %v630_v34  ;;  %vm638_vm12 = vweird.f32 %v1114_v35 }
 0x30e   :  { %vm639_vm14 = vmor %vm637_vm13, %vm638_vm12 }
 0x30f   :  { %v633_v37 = vmul.f32 %v1114_v35, %v632_v36 }
 0x311   :  { %v634_v40 = vmul.f32 0.5, %v633_v37 }
 0x313   :  { %v635_v41 = vsub.f32 1.5, %v634_v40 }
 0x315   :  { %v636_v43 = vmul.f32 %v1114_v35, %v635_v41 }
 0x317   :  { %v640_v46 = vsel %vm639_vm14, %v1114_v35, %v636_v43 }
 0x318   :  { %v641_v48 = vmul.f32 %v640_v46, %v629_v45 }
 0x31a   :  { %v642_v50 = vmul.f32 %v641_v48, %v619_v47 }
 0x31c   :  { %v643_v51 = vadd.f32 %v642_v50, %v412_v49  ;;  %v1417_v50 = vpop.f32.mrf.mxu0 }
 0x31e   :  { %677 = vmatmul.f32.vlgmr.msra.gmra.mxu3 %v643_v51  ;;  %v303_v51 = vperm.slane %v1387_v53, 5 }
 0x320   :  { %v432_v56 = vadd.f32 %v1398_v1, %v303_v51  ;;  %v816_v1 = vld [vmem:[#allocation7 + $0x530] sm:$0xff] }
 0x3a1   :  { %v678_v60 = vpop.f32.mrf.mxu3 }
 0x3a2   :  { %v1413_v61 = vadd.f32 %v678_v60, %v660_v58 }
 0x3a4   :  { %v682_v62 = vmul.f32 0.70710677, %v1413_v61  ;;  %v681_v47 = vmul.f32 0.5, %v1413_v61  ;;  %v820_v61 = vld [vmem:[#allocation7 + $0x5f0] sm:$0xff] }
 0x3a5   :  { %829 = vmatpush.msrb.mxu1 %v820_v61  ;;  %v968_v61 = vld [vmem:[#allocation10 + $0x58] sm:$0xff] }
 0x3a6   :  { %v683_v0 = vmul.f32 %v682_v62, %v682_v62 }
 0x3a8   :  { %v684_v3 = vmin.f32 %v683_v0, 16.0  ;;  %v817_v0 = vld [vmem:[#allocation7 + $0x538] sm:$0xff] }
 0x3a9   :  { %851 = vmatpush.msrb.mxu2 %v817_v0 }
 0x3aa   :  { %v685_v6 = vmul.f32 2.1237322e-06, %v684_v3  ;;  %v696_v7 = vmul.f32 3.8918573e-05, %v684_v3 }
 0x3ab   :  { %852 = vmatpush.msrb.mxu2 %v815_v2  ;;  %v985_v2 = vld [vmem:[#allocation10 + $0xe0] sm:$0xff] }
 0x3ac   :  { %v686_v9 = vadd.f32 0.00028619796, %v685_v6  ;;  %v697_v11 = vadd.f32 0.001143296, %v696_v7  ;;  %v810_v6 = vld [vmem:[#allocation7 + $0x410] sm:$0xff]  ;;  %v811_v7 = vld [vmem:[#allocation7 + $0x418] sm:$0xff] }
 0x3ad   :  { %853 = vmatpush.msrb.mxu2 %v813_v4 }
 0x3ae   :  { %v687_v13 = vmul.f32 %v686_v9, %v684_v3  ;;  %v698_v14 = vmul.f32 %v697_v11, %v684_v3  ;;  %v809_v9 = vld [vmem:[#allocation7 + $0x3b8] sm:$0xff]  ;;  %v806_v11 = vld [vmem:[#allocation7 + $0x350] sm:$0xff] }
 0x3af   :  { %854 = vmatpush.msrb.mxu2 %v811_v7  ;;  %v984_v7 = vld [vmem:[#allocation10 + $0xd8] sm:$0xff] }
 0x3b0   :  { %v699_v16 = vadd.f32 0.014752088, %v698_v14  ;;  %v688_v22 = vadd.f32 0.0036580483, %v687_v13  ;;  %v804_v13 = vld [vmem:[#allocation7 + $0x2f0] sm:$0xff]  ;;  %v805_v14 = vld [vmem:[#allocation7 + $0x2f8] sm:$0xff] }
 0x3b1   :  { %855 = vmatpush.msrb.mxu2 %v809_v9 }
 0x3b2   :  { %v700_v18 = vmul.f32 %v699_v16, %v684_v3  ;;  %v689_v23 = vmul.f32 %v688_v22, %v684_v3  ;;  %v803_v16 = vld [vmem:[#allocation7 + $0x298] sm:$0xff] }
 0x3b3   :  { %856 = vmatpush.msrb.mxu2 %v807_v12  ;;  %v801_v22 = vld [vmem:[#allocation7 + $0x238] sm:$0xff]  ;;  %v983_v12 = vld [vmem:[#allocation10 + $0xd0] sm:$0xff] }
 0x3b4   :  { %v701_v20 = vadd.f32 0.112945676, %v700_v18  ;;  %v690_v27 = vadd.f32 0.05243302, %v689_v23  ;;  %v798_v18 = vld [vmem:[#allocation7 + $0x1d0] sm:$0xff]  ;;  %v797_v23 = vld [vmem:[#allocation7 + $0x178] sm:$0xff] }
 0x3b5   :  { %857 = vmatpush.msrb.mxu2 %v805_v14 }
 0x3b6   :  { %v702_v25 = vmul.f32 %v701_v20, %v684_v3  ;;  %v691_v30 = vmul.f32 %v690_v27, %v684_v3  ;;  %v793_v27 = vld [vmem:[#allocation7 + $0xb8] sm:$0xff] }
 0x3b7   :  { %858 = vmatpush.msrb.mxu2 %v803_v16  ;;  %v963_v16 = vld [vmem:[#allocation10 + $0x30] sm:$0xff] }
 0x3b8   :  { %v703_v26 = vadd.f32 0.4994258, %v702_v25  ;;  %v692_v31 = vadd.f32 0.18741608, %v691_v30  ;;  %v795_v25 = vld [vmem:[#allocation7 + $0x118] sm:$0xff] }
 0x3b9   :  { %859 = vmatpush.msrb.mxu2 %v801_v22 }
 0x3ba   :  { %v704_v28 = vmul.f32 %v703_v26, %v684_v3  ;;  %v693_v33 = vmul.f32 %v692_v31, %v684_v3  ;;  %v812_v3 = vld [vmem:[#allocation7 + $0x470] sm:$0xff] }
 0x3bb   :  { %860 = vmatpush.msrb.mxu2 %v799_v19  ;;  %v792_v26 = vld [vmem:[#allocation7 + $0xb0] sm:$0xff] }
 0x3bc   :  { %v705_v29 = vadd.f32 1.0, %v704_v28  ;;  %v694_v37 = vadd.f32 1.1283791, %v693_v33  ;;  %v790_v28 = vld [vmem:[#allocation7 + $0x50] sm:$0xff] }
 0x3bd   :  { %861 = vmatpush.msrb.mxu2 %v797_v23 }
 0x3be   :  { %1115 = vrcp.f32 %v705_v29  ;;  %v717_v36 = vand.u32 2147483648, %v705_v29  ;;  %v715_v39 = vand.u32 2147483647, %v705_v29  ;;  %vm711_vm0 = vweird.f32 %v705_v29 }
 0x3bf   :  { %v695_v42 = vmul.f32 %v694_v37, %v682_v62  ;;  %v818_v62 = vld [vmem:[#allocation7 + $0x590] sm:$0xff]  ;;  %862 = vmatpush.msrb.mxu2 %v795_v25 }
 0x3c0   :  { %v718_v41 = vor.u32 1.1754944e-38, %v717_v36  ;;  %vm716_vm2 = vcmp.eq.f32.partialorder %v715_v39, 8.507059e+37  ;;  %830 = vmatpush.msrb.mxu1 %v818_v62  ;;  %v304_v39 = vperm.slane %v1387_v53, 6  ;;  %v967_v62 = vld [vmem:[#allocation10 + $0x50] sm:$0xff] }
 0x3c1   :  { %863 = vmatpush.msrb.mxu2 %v793_v27  ;;  %v980_v27 = vld [vmem:[#allocation10 + $0xb8] sm:$0xff] }
 0x3c2   :  { %831 = vmatpush.msrb.mxu1 %v816_v1 }
 0x3c4   :  { %v1116_v32 = vpop.eup %1115 }
 0x3c5   :  { %v707_v34 = vmul.f32 %v1116_v32, %v705_v29  ;;  %vm712_vm15 = vweird.f32 %v1116_v32  ;;  %v791_v29 = vld [vmem:[#allocation7 + $0x58] sm:$0xff] }
 0x3c6   :  { %vm713_vm1 = vmor %vm711_vm0, %vm712_vm15  ;;  %864 = vmatpush.msrb.mxu2 %v791_v29 }
 0x3c7   :  { %v708_v35 = vsub.f32 1.0, %v707_v34 }
 0x3c9   :  { %v709_v38 = vmul.f32 %v1116_v32, %v708_v35 }
 0x3cb   :  { %v710_v40 = vadd.f32 %v1116_v32, %v709_v38 }
 0x3cd   :  { %v714_v43 = vsel %vm713_vm1, %v1116_v32, %v710_v40 }
 0x3ce   :  { %v719_v44 = vsel %vm716_vm2, %v718_v41, %v714_v43 }
 0x3cf   :  { %v720_v45 = vmul.f32 %v719_v44, %v695_v42  ;;  %v452_v42 = vadd.f32 %v1411_v54, %v304_v39  ;;  %v305_v44 = vperm.slane %v1387_v53, 7  ;;  %v971_v54 = vld [vmem:[#allocation10 + $0x70] sm:$0xff]  ;;  %v969_v53 = vld [vmem:[#allocation10 + $0x60] sm:$0xff] }
 0x3d1   :  { %v1089_v46 = vclamps-f32 %v720_v45, 1.0 }
 0x3d3   :  { %v723_v48 = vadd.f32 1.0, %v1089_v46 }
 0x3d5   :  { %v724_v49 = vmul.f32 %v723_v48, %v681_v47  ;;  %v765_v47 = vadd.f32 1.0, %v452_v42 }
 0x3d7   :  { %759 = vmatmul.f32.vlgmr.msrb.gmra.mxu0 %v724_v49  ;;  %v472_v49 = vadd.f32 %v1417_v50, %v305_v44  ;;  %v977_v44 = vld [vmem:[#allocation10 + $0xa0] sm:$0xff] }
 0x454   :  { %v760_v55 = vpop.f32.mrf.mxu0 }
 0x455   :  { %v761_v57 = vadd.f32 %v760_v55, %v742_v52  ;;  %v972_v55 = vld [vmem:[#allocation10 + $0x78] sm:$0xff] }
 0x456   :  { %990 = vmatpush.msrb.mxu3 %v972_v55 }
 0x457   :  { %v763_v58 = vmul.f32 %v761_v57, %v432_v56  ;;  %v823_v56 = vld [vmem:[#allocation11 + $0x7] ss:$8 sm:$0x3] }
 0x458   :  { %991 = vmatpush.msrb.mxu3 %v971_v54  ;;  %v970_v57 = vld [vmem:[#allocation10 + $0x68] sm:$0xff]  ;;  %v826_v0 = vperm.slane %v823_v56, 1 }
 0x459   :  { %v1422_v59 = vadd.f32 %v763_v58, %v1402_v10  ;;  %v814_v10 = vld [vmem:[#allocation7 + $0x4d0] sm:$0xff]  ;;  %v825_v58 = vperm.slane %v823_v56, 0 }
 0x45a   :  { %832 = vmatpush.msrb.mxu1 %v814_v10  ;;  %992 = vmatpush.msrb.mxu3 %v970_v57  ;;  %v966_v10 = vld [vmem:[#allocation10 + $0x48] sm:$0xff]  ;;  %v975_v56 = vld [vmem:[#allocation10 + $0x90] sm:$0xff] }
 0x45b   :  { %766 = vadd.xlane.f32.xlu2 %v1422_v59  ;;  %v768_v60 = vmul.f32 %v1422_v59, %v1422_v59 }
 0x45c   :  { %833 = vmatpush.msrb.mxu1 %v812_v3  ;;  %993 = vmatpush.msrb.mxu3 %v969_v53 }
 0x45e   :  { %834 = vmatpush.msrb.mxu1 %v810_v6  ;;  %994 = vmatpush.msrb.mxu3 %v968_v61  ;;  %v965_v6 = vld [vmem:[#allocation10 + $0x40] sm:$0xff] }
 0x460   :  { %835 = vmatpush.msrb.mxu1 %v808_v8  ;;  %995 = vmatpush.msrb.mxu3 %v967_v62 }
 0x462   :  { %836 = vmatpush.msrb.mxu1 %v806_v11  ;;  %996 = vmatpush.msrb.mxu3 %v966_v10  ;;  %v964_v11 = vld [vmem:[#allocation10 + $0x38] sm:$0xff] }
 0x463   :  { %769 = vadd.xlane.f32.xlu2 %v768_v60 }
 0x464   :  { %837 = vmatpush.msrb.mxu1 %v804_v13  ;;  %997 = vmatpush.msrb.mxu3 %v965_v6 }
 0x466   :  { %838 = vmatpush.msrb.mxu1 %v802_v15  ;;  %998 = vmatpush.msrb.mxu3 %v964_v11 }
 0x468   :  { %839 = vmatpush.msrb.mxu1 %v800_v17  ;;  %v982_v17 = vld [vmem:[#allocation10 + $0xc8] sm:$0xff]  ;;  %999 = vmatpush.msrb.mxu3 %v963_v16 }
 0x46a   :  { %840 = vmatpush.msrb.mxu1 %v798_v18 }
 0x46c   :  { %841 = vmatpush.msrb.mxu1 %v796_v21  ;;  %v981_v21 = vld [vmem:[#allocation10 + $0xc0] sm:$0xff] }
 0x46e   :  { %842 = vmatpush.msrb.mxu1 %v794_v24 }
 0x470   :  { %843 = vmatpush.msrb.mxu1 %v792_v26  ;;  %v961_v26 = vld [vmem:[#allocation10 + $0x20] sm:$0xff] }
 0x472   :  { %844 = vmatpush.msrb.mxu1 %v790_v28 }
 0x4ce   :  { %v767_v20 = vpop.xlane.xlu2 %766 }
 0x4cf   :  { %v771_v30 = vmul.f32 0.03125, %v767_v20  ;;  %v962_v20 = vld [vmem:[#allocation10 + $0x28] sm:$0xff] }
 0x4d0   :  { %1000 = vmatpush.msrb.mxu3 %v962_v20 }
 0x4d1   :  { %v773_v32 = vmul.f32 %v771_v30, %v771_v30  ;;  %v775_v45 = vsub.f32 %v1422_v59, %v771_v30  ;;  %v988_v59 = vld [vmem:[#allocation10 + $0xf8] sm:$0xff] }
 0x4d2   :  { %1010 = vmatpush.msra.mxu0 %v988_v59  ;;  %1001 = vmatpush.msrb.mxu3 %v961_v26 }
 0x4d4   :  { %1011 = vmatpush.msra.mxu0 %v987_v5 }
 0x4d6   :  { %v770_v31 = vpop.xlane.xlu2 %769  ;;  %1012 = vmatpush.msra.mxu0 %v986_v63 }
 0x4d7   :  { %v772_v33 = vmul.f32 0.03125, %v770_v31 }
 0x4d8   :  { %1013 = vmatpush.msra.mxu0 %v985_v2 }
 0x4d9   :  { %v774_v34 = vsub.f32 %v772_v33, %v773_v32  ;;  %v960_v32 = vld [vmem:[#allocation10 + $0x18] sm:$0xff]  ;;  %v979_v33 = vld [vmem:[#allocation10 + $0xb0] sm:$0xff] }
 0x4da   :  { %1014 = vmatpush.msra.mxu0 %v984_v7  ;;  %1002 = vmatpush.msrb.mxu3 %v960_v32 }
 0x4db   :  { %v776_v35 = vadd.f32 1e-05, %v774_v34 }
 0x4dc   :  { %1015 = vmatpush.msra.mxu0 %v983_v12 }
 0x4dd   :  { %1117 = vrsqrt.f32 %v776_v35  ;;  %vm783_vm4 = vweird.f32 %v776_v35 }
 0x4de   :  { %1016 = vmatpush.msra.mxu0 %v982_v17 }
 0x4e0   :  { %1017 = vmatpush.msra.mxu0 %v981_v21 }
 0x4e2   :  { %1018 = vmatpush.msra.mxu0 %v980_v27 }
 0x4e3   :  { %v1118_v36 = vpop.eup %1117 }
 0x4e4   :  { %v778_v37 = vmul.f32 %v1118_v36, %v776_v35  ;;  %vm784_vm3 = vweird.f32 %v1118_v36  ;;  %1019 = vmatpush.msra.mxu0 %v979_v33 }
 0x4e5   :  { %vm785_vm5 = vmor %vm783_vm4, %vm784_vm3 }
 0x4e6   :  { %v779_v38 = vmul.f32 %v1118_v36, %v778_v37  ;;  %v959_v37 = vld [vmem:[#allocation10 + $0x10] sm:$0xff] }
 0x4e7   :  { %1003 = vmatpush.msrb.mxu3 %v959_v37 }
 0x4e8   :  { %v780_v40 = vmul.f32 0.5, %v779_v38  ;;  %v978_v38 = vld [vmem:[#allocation10 + $0xa8] sm:$0xff] }
 0x4e9   :  { %1020 = vmatpush.msra.mxu0 %v978_v38 }
 0x4ea   :  { %v781_v41 = vsub.f32 1.5, %v780_v40 }
 0x4eb   :  { %1021 = vmatpush.msra.mxu0 %v977_v44  ;;  %v1030_v44 = vlaneseq }
 0x4ec   :  { %v782_v43 = vmul.f32 %v1118_v36, %v781_v41 }
 0x4ee   :  { %v786_v46 = vsel %vm785_vm5, %v1118_v36, %v782_v43  ;;  %v958_v43 = vld [vmem:[#allocation10 + $0x8] sm:$0xff] }
 0x4ef   :  { %v787_v48 = vmul.f32 %v786_v46, %v775_v45  ;;  %1004 = vmatpush.msrb.mxu3 %v958_v43 }
 0x4f1   :  { %v788_v51 = vmul.f32 %v787_v48, %v765_v47  ;;  %v957_v47 = vld [vmem:[#allocation10] sm:$0xff]  ;;  %v976_v48 = vld [vmem:[#allocation10 + $0x98] sm:$0xff] }
 0x4f2   :  { %1005 = vmatpush.msrb.mxu3 %v957_v47  ;;  %1022 = vmatpush.msra.mxu0 %v976_v48 }
 0x4f3   :  { %v789_v52 = vadd.f32 %v788_v51, %v472_v49 }
 0x4f4   :  { %1023 = vmatpush.msra.mxu0 %v975_v56 }
 0x4f5   :  { %845 = vmatmul.f32.vlgmr.msrb.gmra.mxu1 %v789_v52  ;;  %865 = vmatmul.f32.vlgmr.msrb.gmra.mxu2 %v789_v52 }
 0x572   :  { %v846_v60 = vpop.f32.mrf.mxu1 }
 0x573   :  { %v1432_v50 = vadd.f32 %v846_v60, %v825_v58  ;;  %v974_v58 = vld [vmem:[#allocation10 + $0x88] sm:$0xff]  ;;  %v973_v60 = vld [vmem:[#allocation10 + $0x80] sm:$0xff] }
 0x574   :  { %1024 = vmatpush.msra.mxu0 %v974_v58 }
 0x575   :  { %v1435_v1 = vmul.f32 0.70710677, %v1432_v50 }
 0x576   :  { %1025 = vmatpush.msra.mxu0 %v973_v60 }
 0x577   :  { %v873_v3 = vmul.f32 %v1435_v1, %v1435_v1 }
 0x578   :  { %v866_v4 = vpop.f32.mrf.mxu2 }
 0x579   :  { %v1439_v8 = vmin.f32 %v873_v3, 16.0  ;;  %v1441_v9 = vadd.f32 %v866_v4, %v826_v0 }
 0x57b   :  { %v875_v13 = vmul.f32 2.1237322e-06, %v1439_v8  ;;  %v886_v14 = vmul.f32 3.8918573e-05, %v1439_v8  ;;  %v1446_v15 = vmul.f32 0.70710677, %v1441_v9 }
 0x57d   :  { %v876_v22 = vadd.f32 0.00028619796, %v875_v13  ;;  %v887_v18 = vadd.f32 0.001143296, %v886_v14  ;;  %v913_v19 = vmul.f32 %v1446_v15, %v1446_v15 }
 0x57f   :  { %v877_v23 = vmul.f32 %v876_v22, %v1439_v8  ;;  %v888_v24 = vmul.f32 %v887_v18, %v1439_v8  ;;  %v1452_v25 = vmin.f32 %v913_v19, 16.0 }
 0x581   :  { %v878_v28 = vadd.f32 0.0036580483, %v877_v23  ;;  %v889_v29 = vadd.f32 0.014752088, %v888_v24  ;;  %v915_v30 = vmul.f32 2.1237322e-06, %v1452_v25 }
 0x582   :  { %v926_v31 = vmul.f32 3.8918573e-05, %v1452_v25 }
 0x583   :  { %v890_v34 = vmul.f32 %v889_v29, %v1439_v8  ;;  %v916_v35 = vadd.f32 0.00028619796, %v915_v30  ;;  %v879_v40 = vmul.f32 %v878_v28, %v1439_v8 }
 0x584   :  { %v927_v36 = vadd.f32 0.001143296, %v926_v31 }
 0x585   :  { %v891_v39 = vadd.f32 0.112945676, %v890_v34  ;;  %v917_v41 = vmul.f32 %v916_v35, %v1452_v25  ;;  %v880_v52 = vadd.f32 0.05243302, %v879_v40  ;;  %v869_v34 = vmul.f32 0.5, %v1432_v50 }
 0x586   :  { %v928_v42 = vmul.f32 %v927_v36, %v1452_v25 }
 0x587   :  { %v892_v45 = vmul.f32 %v891_v39, %v1439_v8  ;;  %v918_v51 = vadd.f32 0.0036580483, %v917_v41  ;;  %v881_v61 = vmul.f32 %v880_v52, %v1439_v8  ;;  %v870_v41 = vmul.f32 0.5, %v1441_v9 }
 0x588   :  { %v929_v46 = vadd.f32 0.014752088, %v928_v42 }
 0x589   :  { %v893_v49 = vadd.f32 0.4994258, %v892_v45  ;;  %v919_v59 = vmul.f32 %v918_v51, %v1452_v25  ;;  %v882_v0 = vadd.f32 0.18741608, %v881_v61  ;;  %v989_v45 = vld [vmem:[#allocation11 + $0x40] ss:$0 sm:$0xff] }
 0x58a   :  { %v930_v55 = vmul.f32 %v929_v46, %v1452_v25  ;;  %v1031_v46 = vand.u32 127, %v1030_v44 }
 0x58b   :  { %v894_v54 = vmul.f32 %v893_v49, %v1439_v8  ;;  %v920_v63 = vadd.f32 0.05243302, %v919_v59  ;;  %v883_v6 = vmul.f32 %v882_v0, %v1439_v8 }
 0x58c   :  { %v931_v57 = vadd.f32 0.112945676, %v930_v55  ;;  %vm1032_vm14 = vcmp.lt.s32.totalorder %v1031_v46, 3 }
 0x58d   :  { %v895_v53 = vadd.f32 1.0, %v894_v54  ;;  %v921_v4 = vmul.f32 %v920_v63, %v1452_v25  ;;  %v884_v14 = vadd.f32 1.1283791, %v883_v6 }
 0x58e   :  { %v932_v5 = vmul.f32 %v931_v57, %v1452_v25 }
 0x58f   :  { %1119 = vrcp.f32 %v895_v53  ;;  %v907_v12 = vand.u32 2147483648, %v895_v53  ;;  %v922_v13 = vadd.f32 0.18741608, %v921_v4  ;;  %v905_v17 = vand.u32 2147483647, %v895_v53 }
 0x590   :  { %v933_v62 = vadd.f32 0.4994258, %v932_v5  ;;  %vm901_vm7 = vweird.f32 %v895_v53  ;;  %v885_v23 = vmul.f32 %v884_v14, %v1435_v1 }
 0x591   :  { %v908_v19 = vor.u32 1.1754944e-38, %v907_v12  ;;  %v923_v20 = vmul.f32 %v922_v13, %v1452_v25  ;;  %vm906_vm9 = vcmp.eq.f32.partialorder %v905_v17, 8.507059e+37 }
 0x592   :  { %v934_v10 = vmul.f32 %v933_v62, %v1452_v25 }
 0x593   :  { %v924_v29 = vadd.f32 1.1283791, %v923_v20 }
 0x594   :  { %v935_v2 = vadd.f32 1.0, %v934_v10 }
 0x595   :  { %v1120_v3 = vpop.eup %1119  ;;  %v925_v1 = vmul.f32 %v924_v29, %v1446_v15 }
 0x596   :  { %v897_v7 = vmul.f32 %v1120_v3, %v895_v53  ;;  %1121 = vrcp.f32 %v935_v2  ;;  %vm902_vm6 = vweird.f32 %v1120_v3  ;;  %v947_v28 = vand.u32 2147483648, %v935_v2 }
 0x597   :  { %vm903_vm8 = vmor %vm901_vm7, %vm902_vm6  ;;  %v945_v31 = vand.u32 2147483647, %v935_v2  ;;  %vm941_vm11 = vweird.f32 %v935_v2 }
 0x598   :  { %v898_v11 = vsub.f32 1.0, %v897_v7  ;;  %v948_v25 = vor.u32 1.1754944e-38, %v947_v28 }
 0x599   :  { %vm946_vm13 = vcmp.eq.f32.partialorder %v945_v31, 8.507059e+37 }
 0x59a   :  { %v899_v16 = vmul.f32 %v1120_v3, %v898_v11 }
 0x59c   :  { %v1122_v22 = vpop.eup %1121  ;;  %v900_v18 = vadd.f32 %v1120_v3, %v899_v16 }
 0x59d   :  { %v937_v21 = vmul.f32 %v1122_v22, %v935_v2  ;;  %vm942_vm10 = vweird.f32 %v1122_v22 }
 0x59e   :  { %v904_v8 = vsel %vm903_vm8, %v1120_v3, %v900_v18  ;;  %vm943_vm12 = vmor %vm941_vm11, %vm942_vm10 }
 0x59f   :  { %v909_v24 = vsel %vm906_vm9, %v908_v19, %v904_v8  ;;  %v938_v26 = vsub.f32 1.0, %v937_v21 }
 0x5a0   :  { %v910_v27 = vmul.f32 %v909_v24, %v885_v23 }
 0x5a1   :  { %v939_v30 = vmul.f32 %v1122_v22, %v938_v26 }
 0x5a2   :  { %v1090_v32 = vclamps-f32 %v910_v27, 1.0 }
 0x5a3   :  { %v940_v33 = vadd.f32 %v1122_v22, %v939_v30 }
 0x5a4   :  { %v953_v35 = vadd.f32 1.0, %v1090_v32 }
 0x5a5   :  { %v944_v36 = vsel %vm943_vm12, %v1122_v22, %v940_v33 }
 0x5a6   :  { %v955_v37 = vmul.f32 %v953_v35, %v869_v34  ;;  %v949_v38 = vsel %vm946_vm13, %v948_v25, %v944_v36 }
 0x5a7   :  { %v950_v39 = vmul.f32 %v949_v38, %v925_v1 }
 0x5a8   :  { %1006 = vmatmul.f32.vlgmr.msrb.gmra.mxu3 %v955_v37 }
 0x5a9   :  { %v1091_v40 = vclamps-f32 %v950_v39, 1.0 }
 0x5ab   :  { %v954_v42 = vadd.f32 1.0, %v1091_v40 }
 0x5ad   :  { %v956_v43 = vmul.f32 %v954_v42, %v870_v41 }
 0x5af   :  { %1026 = vmatmul.f32.vlgmr.msra.gmra.mxu0 %v956_v43 }
 0x62b   :  { %v1007_v50 = vpop.f32.mrf.mxu3 }
 0x62c   :  { %v1008_v47 = vadd.f32 %v1007_v50, %v989_v45  ;;  %v1027_v48 = vpop.f32.mrf.mxu0 }
 0x62e   :  { %v1028_v49 = vadd.f32 %v1027_v48, %v1008_v47 }
 0x630   :  { %v1033_v15 = vmul.f32 %v1028_v49, %v1028_v49  ;;  %v1050_v52 = vand.u32 2147483647, %v1028_v49  ;;  %v1049_v7 = vmax.f32 %v1028_v49, 0.0 }
 0x632   :  { %v1034_v51 = vsel %vm1032_vm14, %v1033_v15, 0.0  ;;  %v1051_v55 = vsub.f32 0.0, %v1050_v52 }
 0x633   :  { %1035 = vadd.xlane.f32.xlu0 %v1034_v51 }
 0x634   :  { %v1052_v56 = vmul.f32 1.442695, %v1051_v55 }
 0x636   :  { %1123 = vpow2.f32 %v1052_v56 }
 0x63c   :  { %v1124_v9 = vpop.eup %1123 }
 0x63d   :  { %v1054_v58 = vadd.f32 1.0, %v1124_v9  ;;  %v1057_v53 = vmul.f32 -0.5, %v1124_v9  ;;  %v1060_v63 = vand.u32 2147483647, %v1124_v9 }
 0x63f   :  { %v1058_v62 = vadd.f32 1.0, %v1057_v53  ;;  %vm1061_vm0 = vcmp.lt.f32.partialorder %v1060_v63, 0.0004427343 }
 0x641   :  { %v1059_v3 = vmul.f32 %v1124_v9, %v1058_v62 }
 0x6a6   :  { %v1036_v54 = vpop.xlane.xlu0 %1035 }
 0x6a7   :  { %v1037_v57 = vmax.f32 %v1036_v54, 1e-24 }
 0x6a9   :  { %1125 = vrsqrt.f32 %v1037_v57  ;;  %vm1044_vm1 = vweird.f32 %v1037_v57 }
 0x6aa   :  { %1127 = vlog2.f32 %v1054_v58 }
 0x6af   :  { %v1126_v59 = vpop.eup %1125 }
 0x6b0   :  { %v1039_v60 = vmul.f32 %v1126_v59, %v1037_v57  ;;  %v1128_v61 = vpop.eup %1127  ;;  %vm1045_vm15 = vweird.f32 %v1126_v59 }
 0x6b1   :  { %v1056_v10 = vmul.f32 0.6931472, %v1128_v61  ;;  %vm1046_vm2 = vmor %vm1044_vm1, %vm1045_vm15 }
 0x6b2   :  { %v1040_v5 = vmul.f32 %v1126_v59, %v1039_v60 }
 0x6b3   :  { %v1062_v6 = vsel %vm1061_vm0, %v1059_v3, %v1056_v10 }
 0x6b4   :  { %v1041_v0 = vmul.f32 0.5, %v1040_v5  ;;  %v1063_v13 = vadd.f32 %v1062_v6, %v1049_v7 }
 0x6b6   :  { %v1042_v2 = vsub.f32 1.5, %v1041_v0 }
 0x6b8   :  { %v1043_v4 = vmul.f32 %v1126_v59, %v1042_v2 }
 0x6ba   :  { %v1047_v11 = vsel %vm1046_vm2, %v1126_v59, %v1043_v4 }
 0x6bb   :  { %v1048_v12 = vmul.f32 %v1047_v11, %v1028_v49 }
 0x6bd   :  { %v1064_v14 = vsel %vm1032_vm14, %v1048_v12, %v1063_v13 }
 0x6be   :  { %1065 = vst [vmem:[#allocation13] sm:$0xff] %v1064_v14 }
 0x6bf   :  { %1076 = dma.vmem_to_hbm [thread:$0]  %s1072_s5, 128, %s1074_s7, [#allocation4]  }
 0x6c0   :  { %1305 = dma.done.wait [#allocation4], 128  }
 0x6c1   :  { %1306 = vsyncadd [#allocation4], 4294967168 }
 0x6c2   :  { %1081 = vsyncpa [#allocation3], 1 }
 0x6c3   :  { %1082 = vsyncpa [#allocation6], 1 }
 0x6c4   :  { %1083 = vsyncpa [#allocation9], 1 }
 0x6c5   :  { %1084 = vsyncpa [#allocation12], 1 }
 0x6c6   :  { %1085 = vsyncpa [#allocation4], 1 }

// kernel: tpu_custom_call.1
= control target key start
LH: loop header
LB: loop body
LE: loop exit
PB: predicated region body
PF: predicated region fallthrough
CT: control target
= control target key end

     0   :  { %11 = vsyncpa [#allocation3], 0  ;;  %s1479_s0 = inlined_call_operand.hbm [shape: f32[8,16], index: 0, kind: input, shape index: {}]   ;;  %s1480_s1 = inlined_call_operand.hbm [shape: f32[16,128], index: 1, kind: input, shape index: {}]   ;;  %s1481_s2 = inlined_call_operand.hbm [shape: f32[128,1536], index: 2, kind: input, shape index: {}]   ;;  %s1482_s3 = inlined_call_operand.hbm [shape: f32[2,128,128], index: 3, kind: input, shape index: {}]   ;;  %s1483_s4 = inlined_call_operand.hbm [shape: f32[256,128], index: 4, kind: input, shape index: {}]   ;;  %s1484_s5 = inlined_call_operand.hbm [shape: f32[16,1024], index: 5, kind: input, shape index: {}]   ;;  %s1485_s6 = inlined_call_operand.hbm [shape: f32[8,128], index: 6, kind: output, shape index: {}]  }
   0x1   :  { %12 = vsyncpa [#allocation6], 0 }
   0x2   :  { %13 = vsyncpa [#allocation9], 0 }
   0x3   :  { %14 = vsyncpa [#allocation12], 0  ;;  %s31_s23 = sshll.u32 %s1480_s1, 4  ;;  %s32_s23 = int_to_ptr.hbm [resolvable:$true] %s31_s23 }
   0x4   :  { %15 = vsyncpa [#allocation4], 0  ;;  %s1307_s24 = smov [#allocation5]   ;;  %s57_s28 = sshll.u32 %s1482_s3, 4  ;;  %s58_s28 = int_to_ptr.hbm [resolvable:$true] %s57_s28 }
   0x5   :  { %s33_s25 = sshll.u32 %s1307_s24, 4  ;;  %s1308_s29 = smov 128   ;;  %s34_s25 = int_to_ptr.vmem [resolvable:$true] %s33_s25 }
   0x6   :  { %s1309_s30 = smov 8   ;;  %s1310_s7 = smov [#allocation8]  }
   0x7   :  { %39 = dma.hbm_to_vmem [thread:$0]  %s32_s23, 256, %s34_s25, [#allocation6], %s1308_s29, %s1308_s29, %s1309_s30  }
   0x8   :  { %s59_s8 = sshll.u32 %s1310_s7, 4  ;;  %s21_s10 = sshll.u32 %s1479_s0, 4  ;;  %s60_s8 = int_to_ptr.vmem [resolvable:$true] %s59_s8  ;;  %s22_s10 = int_to_ptr.hbm [resolvable:$true] %s21_s10 }
   0x9   :  { %65 = dma.hbm_to_vmem [thread:$0]  %s58_s28, 4096, %s60_s8, [#allocation9], %s1308_s29, %s1308_s29, %s1309_s30  }
   0xa   :  { %s44_s12 = sshll.u32 %s1481_s2, 4  ;;  %s1311_s13 = smov [#allocation2]   ;;  %s45_s12 = int_to_ptr.hbm [resolvable:$true] %s44_s12 }
   0xb   :  { %s23_s14 = sshll.u32 %s1311_s13, 4  ;;  %s1312_s15 = smov [#allocation7]   ;;  %s24_s14 = int_to_ptr.vmem [resolvable:$true] %s23_s14 }
   0xc   :  { %26 = dma.hbm_to_vmem [thread:$0]  %s22_s10, 128, %s24_s14, [#allocation3]  }
   0xd   :  { %s46_s16 = sshll.u32 %s1312_s15, 4  ;;  %s1313_s17 = smov 1536   ;;  %s47_s16 = int_to_ptr.vmem [resolvable:$true] %s46_s16 }
   0xe   :  { %s1314_s0 = smov 96   ;;  %s70_s20 = sshll.u32 %s1483_s4, 4  ;;  %s71_s20 = int_to_ptr.hbm [resolvable:$true] %s70_s20 }
   0xf   :  { %52 = dma.hbm_to_vmem [thread:$0]  %s45_s12, 24576, %s47_s16, [#allocation6], %s1313_s17, %s1313_s17, %s1314_s0  }
  0x10   :  { %s1315_s21 = smov [#allocation10]   ;;  %s83_s24 = sshll.u32 %s1484_s5, 4  ;;  %s84_s24 = int_to_ptr.hbm [resolvable:$true] %s83_s24 }
  0x11   :  { %s72_s22 = sshll.u32 %s1315_s21, 4  ;;  %s1316_s25 = smov [#allocation11]   ;;  %s73_s22 = int_to_ptr.vmem [resolvable:$true] %s72_s22 }
  0x12   :  { %78 = dma.hbm_to_vmem [thread:$0]  %s71_s20, 4096, %s73_s22, [#allocation9], %s1308_s29, %s1308_s29, %s1309_s30  }
  0x13   :  { %s85_s26 = sshll.u32 %s1316_s25, 4  ;;  %s1317_s27 = smov 1024   ;;  %s86_s26 = int_to_ptr.vmem [resolvable:$true] %s85_s26 }
  0x14   :  { %s1318_s28 = smov 64  }
  0x15   :  { %91 = dma.hbm_to_vmem [thread:$0]  %s84_s24, 2048, %s86_s26, [#allocation12], %s1317_s27, %s1317_s27, %s1318_s28  }
  0x16   :  { %1297 = dma.done.wait [#allocation3], 128  }
  0x17   :  { %1298 = vsyncadd [#allocation3], 4294967168 }
  0x18   :  { %1299 = dma.done.wait [#allocation6], 24832  }
  0x19   :  { %1300 = vsyncadd [#allocation6], 4294942464 }
  0x1a   :  { %1301 = dma.done.wait [#allocation9], 8192  }
  0x1b   :  { %1302 = vsyncadd [#allocation9], 4294959104 }
  0x1c   :  { %1303 = dma.done.wait [#allocation12], 2048  }
  0x1d   :  { %1304 = vsyncadd [#allocation12], 4294965248  ;;  %v118_v0 = vld [vmem:[#allocation5 + $0x8] sm:$0xff]  ;;  %v117_v1 = vld [vmem:[#allocation5] sm:$0xff]  ;;  %vm120_vm0 = vcmask 130048   ;;  %s1319_s4 = smov [#allocation13]  }
  0x1e   :  { %v116_v2 = vld [vmem:[#allocation2] sm:$0xff]  ;;  %138 = vmatpush.msra.mxu0 %v118_v0  ;;  %v285_v3 = vld [vmem:[#allocation7 + $0x5a0] sm:$0xff]  ;;  %v287_v5 = vld [vmem:[#allocation7 + $0x5b0] sm:$0xff]  ;;  %s1071_s5 = sshll.u32 %s1319_s4, 4  ;;  %s1073_s7 = sshll.u32 %s1485_s6, 4  ;;  %s1072_s5 = int_to_ptr.vmem [resolvable:$true] %s1071_s5  ;;  %s1074_s7 = int_to_ptr.hbm [resolvable:$true] %s1073_s7 }
  0x1f   :  { %v286_v4 = vld [vmem:[#allocation7 + $0x5a8] sm:$0xff]  ;;  %314 = vmatpush.msra.mxu1 %v285_v3  ;;  %v288_v6 = vld [vmem:[#allocation7 + $0x5b8] sm:$0xff]  ;;  %v277_v7 = vld [vmem:[#allocation7 + $0x540] sm:$0xff]  ;;  %354 = vmatpush.msra.mxu3 %v287_v5 }
  0x20   :  { %334 = vmatpush.msra.mxu2 %v286_v4  ;;  %v278_v8 = vld [vmem:[#allocation7 + $0x548] sm:$0xff]  ;;  %139 = vmatpush.msra.mxu0 %v117_v1  ;;  %v279_v9 = vld [vmem:[#allocation7 + $0x550] sm:$0xff]  ;;  %v269_v10 = vld [vmem:[#allocation7 + $0x4e0] sm:$0xff] }
  0x21   :  { %1086 = vmatmul.msk.f32.vlgmr.msra.gmra.mxu0 %vm120_vm0, %v116_v2  ;;  %315 = vmatpush.msra.mxu1 %v277_v7  ;;  %v280_v11 = vld [vmem:[#allocation7 + $0x558] sm:$0xff]  ;;  %v270_v12 = vld [vmem:[#allocation7 + $0x4e8] sm:$0xff]  ;;  %v271_v13 = vld [vmem:[#allocation7 + $0x4f0] sm:$0xff] }
  0x22   :  { %374 = vmatpush.msrb.mxu0 %v288_v6  ;;  %335 = vmatpush.msra.mxu2 %v278_v8  ;;  %v261_v14 = vld [vmem:[#allocation7 + $0x480] sm:$0xff]  ;;  %v272_v15 = vld [vmem:[#allocation7 + $0x4f8] sm:$0xff]  ;;  %v262_v16 = vld [vmem:[#allocation7 + $0x488] sm:$0xff] }
  0x23   :  { %355 = vmatpush.msra.mxu3 %v279_v9  ;;  %316 = vmatpush.msra.mxu1 %v269_v10  ;;  %v263_v17 = vld [vmem:[#allocation7 + $0x490] sm:$0xff]  ;;  %v253_v18 = vld [vmem:[#allocation7 + $0x420] sm:$0xff]  ;;  %v264_v19 = vld [vmem:[#allocation7 + $0x498] sm:$0xff] }
  0x24   :  { %375 = vmatpush.msrb.mxu0 %v280_v11  ;;  %336 = vmatpush.msra.mxu2 %v270_v12  ;;  %v254_v20 = vld [vmem:[#allocation7 + $0x428] sm:$0xff]  ;;  %v255_v21 = vld [vmem:[#allocation7 + $0x430] sm:$0xff]  ;;  %v1382_v22 = vld [vmem:[#allocation11 + $0x1] ss:$0 sm:$0xff] }
  0x25   :  { %356 = vmatpush.msra.mxu3 %v271_v13  ;;  %317 = vmatpush.msra.mxu1 %v261_v14  ;;  %v256_v23 = vld [vmem:[#allocation7 + $0x438] sm:$0xff]  ;;  %v245_v24 = vld [vmem:[#allocation7 + $0x3c0] sm:$0xff]  ;;  %v246_v25 = vld [vmem:[#allocation7 + $0x3c8] sm:$0xff]  ;;  %v477_v39 = vmul.f32 %v1382_v22, %v1382_v22 }
  0x26   :  { %376 = vmatpush.msrb.mxu0 %v272_v15  ;;  %337 = vmatpush.msra.mxu2 %v262_v16  ;;  %v247_v26 = vld [vmem:[#allocation7 + $0x3d0] sm:$0xff]  ;;  %v248_v27 = vld [vmem:[#allocation7 + $0x3d8] sm:$0xff]  ;;  %v237_v28 = vld [vmem:[#allocation7 + $0x360] sm:$0xff] }
  0x27   :  { %357 = vmatpush.msra.mxu3 %v263_v17  ;;  %318 = vmatpush.msra.mxu1 %v253_v18  ;;  %v238_v29 = vld [vmem:[#allocation7 + $0x368] sm:$0xff]  ;;  %v239_v30 = vld [vmem:[#allocation7 + $0x370] sm:$0xff]  ;;  %v240_v31 = vld [vmem:[#allocation7 + $0x378] sm:$0xff] }
  0x28   :  { %377 = vmatpush.msrb.mxu0 %v264_v19  ;;  %338 = vmatpush.msra.mxu2 %v254_v20  ;;  %v229_v32 = vld [vmem:[#allocation7 + $0x300] sm:$0xff]  ;;  %v230_v33 = vld [vmem:[#allocation7 + $0x308] sm:$0xff]  ;;  %v231_v34 = vld [vmem:[#allocation7 + $0x310] sm:$0xff] }
  0x29   :  { %358 = vmatpush.msra.mxu3 %v255_v21  ;;  %475 = vadd.xlane.f32.xlu0 %v1382_v22  ;;  %v232_v35 = vld [vmem:[#allocation7 + $0x318] sm:$0xff]  ;;  %v221_v36 = vld [vmem:[#allocation7 + $0x2a0] sm:$0xff]  ;;  %v222_v37 = vld [vmem:[#allocation7 + $0x2a8] sm:$0xff] }
  0x2a   :  { %378 = vmatpush.msrb.mxu0 %v256_v23  ;;  %319 = vmatpush.msra.mxu1 %v245_v24  ;;  %v223_v38 = vld [vmem:[#allocation7 + $0x2b0] sm:$0xff]  ;;  %v224_v40 = vld [vmem:[#allocation7 + $0x2b8] sm:$0xff]  ;;  %v213_v41 = vld [vmem:[#allocation7 + $0x240] sm:$0xff] }
  0x2b   :  { %339 = vmatpush.msra.mxu2 %v246_v25  ;;  %359 = vmatpush.msra.mxu3 %v247_v26  ;;  %v214_v42 = vld [vmem:[#allocation7 + $0x248] sm:$0xff]  ;;  %v215_v43 = vld [vmem:[#allocation7 + $0x250] sm:$0xff]  ;;  %v216_v44 = vld [vmem:[#allocation7 + $0x258] sm:$0xff] }
  0x2c   :  { %379 = vmatpush.msrb.mxu0 %v248_v27  ;;  %320 = vmatpush.msra.mxu1 %v237_v28  ;;  %v205_v45 = vld [vmem:[#allocation7 + $0x1e0] sm:$0xff]  ;;  %v206_v46 = vld [vmem:[#allocation7 + $0x1e8] sm:$0xff]  ;;  %v207_v47 = vld [vmem:[#allocation7 + $0x1f0] sm:$0xff] }
  0x2d   :  { %340 = vmatpush.msra.mxu2 %v238_v29  ;;  %360 = vmatpush.msra.mxu3 %v239_v30  ;;  %v208_v48 = vld [vmem:[#allocation7 + $0x1f8] sm:$0xff]  ;;  %v197_v49 = vld [vmem:[#allocation7 + $0x180] sm:$0xff]  ;;  %v198_v50 = vld [vmem:[#allocation7 + $0x188] sm:$0xff] }
  0x2e   :  { %380 = vmatpush.msrb.mxu0 %v240_v31  ;;  %321 = vmatpush.msra.mxu1 %v229_v32  ;;  %v199_v51 = vld [vmem:[#allocation7 + $0x190] sm:$0xff]  ;;  %v200_v52 = vld [vmem:[#allocation7 + $0x198] sm:$0xff]  ;;  %v189_v53 = vld [vmem:[#allocation7 + $0x120] sm:$0xff] }
  0x2f   :  { %341 = vmatpush.msra.mxu2 %v230_v33  ;;  %361 = vmatpush.msra.mxu3 %v231_v34  ;;  %v190_v54 = vld [vmem:[#allocation7 + $0x128] sm:$0xff]  ;;  %v191_v55 = vld [vmem:[#allocation7 + $0x130] sm:$0xff]  ;;  %v192_v56 = vld [vmem:[#allocation7 + $0x138] sm:$0xff] }
  0x30   :  { %381 = vmatpush.msrb.mxu0 %v232_v35  ;;  %322 = vmatpush.msra.mxu1 %v221_v36  ;;  %v181_v57 = vld [vmem:[#allocation7 + $0xc0] sm:$0xff]  ;;  %v182_v58 = vld [vmem:[#allocation7 + $0xc8] sm:$0xff]  ;;  %v183_v59 = vld [vmem:[#allocation7 + $0xd0] sm:$0xff] }
  0x31   :  { %342 = vmatpush.msra.mxu2 %v222_v37  ;;  %362 = vmatpush.msra.mxu3 %v223_v38  ;;  %v184_v60 = vld [vmem:[#allocation7 + $0xd8] sm:$0xff]  ;;  %v173_v61 = vld [vmem:[#allocation7 + $0x60] sm:$0xff]  ;;  %v174_v62 = vld [vmem:[#allocation7 + $0x68] sm:$0xff] }
  0x32   :  { %478 = vadd.xlane.f32.xlu0 %v477_v39  ;;  %382 = vmatpush.msrb.mxu0 %v224_v40  ;;  %v175_v63 = vld [vmem:[#allocation7 + $0x70] sm:$0xff]  ;;  %v176_v0 = vld [vmem:[#allocation7 + $0x78] sm:$0xff]  ;;  %v165_v1 = vld [vmem:[#allocation7] sm:$0xff] }
  0x33   :  { %323 = vmatpush.msra.mxu1 %v213_v41  ;;  %343 = vmatpush.msra.mxu2 %v214_v42  ;;  %v166_v2 = vld [vmem:[#allocation7 + $0x8] sm:$0xff]  ;;  %v167_v3 = vld [vmem:[#allocation7 + $0x10] sm:$0xff]  ;;  %v168_v4 = vld [vmem:[#allocation7 + $0x18] sm:$0xff] }
  0x34   :  { %363 = vmatpush.msra.mxu3 %v215_v43  ;;  %383 = vmatpush.msrb.mxu0 %v216_v44  ;;  %v289_v5 = vld [vmem:[#allocation7 + $0x5c0] sm:$0xff]  ;;  %v290_v6 = vld [vmem:[#allocation7 + $0x5c8] sm:$0xff]  ;;  %v291_v7 = vld [vmem:[#allocation7 + $0x5d0] sm:$0xff] }
  0x35   :  { %324 = vmatpush.msra.mxu1 %v205_v45  ;;  %344 = vmatpush.msra.mxu2 %v206_v46  ;;  %v292_v8 = vld [vmem:[#allocation7 + $0x5d8] sm:$0xff]  ;;  %v281_v9 = vld [vmem:[#allocation7 + $0x560] sm:$0xff]  ;;  %v282_v10 = vld [vmem:[#allocation7 + $0x568] sm:$0xff] }
  0x36   :  { %364 = vmatpush.msra.mxu3 %v207_v47  ;;  %384 = vmatpush.msrb.mxu0 %v208_v48  ;;  %v283_v11 = vld [vmem:[#allocation7 + $0x570] sm:$0xff]  ;;  %v284_v12 = vld [vmem:[#allocation7 + $0x578] sm:$0xff]  ;;  %v273_v13 = vld [vmem:[#allocation7 + $0x500] sm:$0xff] }
  0x37   :  { %325 = vmatpush.msra.mxu1 %v197_v49  ;;  %345 = vmatpush.msra.mxu2 %v198_v50  ;;  %v274_v14 = vld [vmem:[#allocation7 + $0x508] sm:$0xff]  ;;  %v275_v15 = vld [vmem:[#allocation7 + $0x510] sm:$0xff]  ;;  %v276_v16 = vld [vmem:[#allocation7 + $0x518] sm:$0xff] }
  0x38   :  { %365 = vmatpush.msra.mxu3 %v199_v51  ;;  %385 = vmatpush.msrb.mxu0 %v200_v52  ;;  %v265_v17 = vld [vmem:[#allocation7 + $0x4a0] sm:$0xff]  ;;  %v266_v18 = vld [vmem:[#allocation7 + $0x4a8] sm:$0xff]  ;;  %v267_v19 = vld [vmem:[#allocation7 + $0x4b0] sm:$0xff] }
  0x39   :  { %326 = vmatpush.msra.mxu1 %v189_v53  ;;  %346 = vmatpush.msra.mxu2 %v190_v54  ;;  %v268_v20 = vld [vmem:[#allocation7 + $0x4b8] sm:$0xff]  ;;  %v257_v21 = vld [vmem:[#allocation7 + $0x440] sm:$0xff]  ;;  %v258_v23 = vld [vmem:[#allocation7 + $0x448] sm:$0xff] }
  0x3a   :  { %366 = vmatpush.msra.mxu3 %v191_v55  ;;  %386 = vmatpush.msrb.mxu0 %v192_v56  ;;  %v259_v24 = vld [vmem:[#allocation7 + $0x450] sm:$0xff]  ;;  %v260_v25 = vld [vmem:[#allocation7 + $0x458] sm:$0xff]  ;;  %v249_v26 = vld [vmem:[#allocation7 + $0x3e0] sm:$0xff] }
  0x3b   :  { %327 = vmatpush.msra.mxu1 %v181_v57  ;;  %347 = vmatpush.msra.mxu2 %v182_v58  ;;  %v250_v27 = vld [vmem:[#allocation7 + $0x3e8] sm:$0xff]  ;;  %v251_v28 = vld [vmem:[#allocation7 + $0x3f0] sm:$0xff]  ;;  %v252_v29 = vld [vmem:[#allocation7 + $0x3f8] sm:$0xff] }
  0x3c   :  { %367 = vmatpush.msra.mxu3 %v183_v59  ;;  %387 = vmatpush.msrb.mxu0 %v184_v60  ;;  %v241_v30 = vld [vmem:[#allocation7 + $0x380] sm:$0xff]  ;;  %v242_v31 = vld [vmem:[#allocation7 + $0x388] sm:$0xff]  ;;  %v243_v32 = vld [vmem:[#allocation7 + $0x390] sm:$0xff] }
  0x3d   :  { %328 = vmatpush.msra.mxu1 %v173_v61  ;;  %348 = vmatpush.msra.mxu2 %v174_v62  ;;  %v244_v33 = vld [vmem:[#allocation7 + $0x398] sm:$0xff]  ;;  %v233_v34 = vld [vmem:[#allocation7 + $0x320] sm:$0xff]  ;;  %v234_v35 = vld [vmem:[#allocation7 + $0x328] sm:$0xff] }
  0x3e   :  { %368 = vmatpush.msra.mxu3 %v175_v63  ;;  %388 = vmatpush.msrb.mxu0 %v176_v0  ;;  %v235_v36 = vld [vmem:[#allocation7 + $0x330] sm:$0xff]  ;;  %v236_v37 = vld [vmem:[#allocation7 + $0x338] sm:$0xff]  ;;  %v225_v38 = vld [vmem:[#allocation7 + $0x2c0] sm:$0xff] }
  0x3f   :  { %329 = vmatpush.msra.mxu1 %v165_v1  ;;  %349 = vmatpush.msra.mxu2 %v166_v2  ;;  %v226_v39 = vld [vmem:[#allocation7 + $0x2c8] sm:$0xff]  ;;  %v227_v40 = vld [vmem:[#allocation7 + $0x2d0] sm:$0xff]  ;;  %v228_v41 = vld [vmem:[#allocation7 + $0x2d8] sm:$0xff] }
  0x40   :  { %369 = vmatpush.msra.mxu3 %v167_v3  ;;  %389 = vmatpush.msrb.mxu0 %v168_v4  ;;  %v217_v42 = vld [vmem:[#allocation7 + $0x260] sm:$0xff]  ;;  %v218_v43 = vld [vmem:[#allocation7 + $0x268] sm:$0xff]  ;;  %v219_v44 = vld [vmem:[#allocation7 + $0x270] sm:$0xff] }
  0x41   :  { %394 = vmatpush.msrb.mxu1 %v289_v5  ;;  %414 = vmatpush.msrb.mxu2 %v290_v6  ;;  %v220_v45 = vld [vmem:[#allocation7 + $0x278] sm:$0xff]  ;;  %v209_v46 = vld [vmem:[#allocation7 + $0x200] sm:$0xff]  ;;  %v210_v47 = vld [vmem:[#allocation7 + $0x208] sm:$0xff] }
  0x42   :  { %434 = vmatpush.msrb.mxu3 %v291_v7  ;;  %454 = vmatpush.msra.mxu0 %v292_v8  ;;  %v211_v48 = vld [vmem:[#allocation7 + $0x210] sm:$0xff]  ;;  %v119_v49 = vld [vmem:[#allocation11] ss:$0 sm:$0xff]  ;;  %v212_v50 = vld [vmem:[#allocation7 + $0x218] sm:$0xff] }
  0x43   :  { %395 = vmatpush.msrb.mxu1 %v281_v9  ;;  %415 = vmatpush.msrb.mxu2 %v282_v10  ;;  %v201_v51 = vld [vmem:[#allocation7 + $0x1a0] sm:$0xff]  ;;  %v202_v52 = vld [vmem:[#allocation7 + $0x1a8] sm:$0xff]  ;;  %v203_v53 = vld [vmem:[#allocation7 + $0x1b0] sm:$0xff] }
  0x44   :  { %435 = vmatpush.msrb.mxu3 %v283_v11  ;;  %455 = vmatpush.msra.mxu0 %v284_v12  ;;  %v204_v55 = vld [vmem:[#allocation7 + $0x1b8] sm:$0xff]  ;;  %v193_v57 = vld [vmem:[#allocation7 + $0x140] sm:$0xff]  ;;  %v194_v58 = vld [vmem:[#allocation7 + $0x148] sm:$0xff] }
  0x45   :  { %396 = vmatpush.msrb.mxu1 %v273_v13  ;;  %416 = vmatpush.msrb.mxu2 %v274_v14  ;;  %v195_v59 = vld [vmem:[#allocation7 + $0x150] sm:$0xff]  ;;  %v196_v61 = vld [vmem:[#allocation7 + $0x158] sm:$0xff]  ;;  %v185_v62 = vld [vmem:[#allocation7 + $0xe0] sm:$0xff] }
  0x46   :  { %436 = vmatpush.msrb.mxu3 %v275_v15  ;;  %456 = vmatpush.msra.mxu0 %v276_v16  ;;  %v186_v63 = vld [vmem:[#allocation7 + $0xe8] sm:$0xff]  ;;  %v187_v0 = vld [vmem:[#allocation7 + $0xf0] sm:$0xff]  ;;  %v188_v1 = vld [vmem:[#allocation7 + $0xf8] sm:$0xff] }
  0x47   :  { %397 = vmatpush.msrb.mxu1 %v265_v17  ;;  %417 = vmatpush.msrb.mxu2 %v266_v18  ;;  %v177_v2 = vld [vmem:[#allocation7 + $0x80] sm:$0xff]  ;;  %v178_v3 = vld [vmem:[#allocation7 + $0x88] sm:$0xff]  ;;  %v179_v4 = vld [vmem:[#allocation7 + $0x90] sm:$0xff] }
  0x48   :  { %437 = vmatpush.msrb.mxu3 %v267_v19  ;;  %457 = vmatpush.msra.mxu0 %v268_v20  ;;  %v180_v5 = vld [vmem:[#allocation7 + $0x98] sm:$0xff]  ;;  %v169_v6 = vld [vmem:[#allocation7 + $0x20] sm:$0xff]  ;;  %v170_v7 = vld [vmem:[#allocation7 + $0x28] sm:$0xff] }
  0x49   :  { %398 = vmatpush.msrb.mxu1 %v257_v21  ;;  %418 = vmatpush.msrb.mxu2 %v258_v23  ;;  %v171_v8 = vld [vmem:[#allocation7 + $0x30] sm:$0xff]  ;;  %v172_v9 = vld [vmem:[#allocation7 + $0x38] sm:$0xff] }
  0x4a   :  { %438 = vmatpush.msrb.mxu3 %v259_v24  ;;  %458 = vmatpush.msra.mxu0 %v260_v25  ;;  %v514_v24 = vld [vmem:[#allocation7 + $0x5e0] sm:$0xff] }
  0x4b   :  { %399 = vmatpush.msrb.mxu1 %v249_v26  ;;  %419 = vmatpush.msrb.mxu2 %v250_v27  ;;  %v513_v25 = vld [vmem:[#allocation7 + $0x580] sm:$0xff] }
  0x4c   :  { %439 = vmatpush.msrb.mxu3 %v251_v28  ;;  %459 = vmatpush.msra.mxu0 %v252_v29  ;;  %v512_v26 = vld [vmem:[#allocation7 + $0x520] sm:$0xff] }
  0x4d   :  { %400 = vmatpush.msrb.mxu1 %v241_v30  ;;  %420 = vmatpush.msrb.mxu2 %v242_v31  ;;  %v511_v27 = vld [vmem:[#allocation7 + $0x4c0] sm:$0xff] }
  0x4e   :  { %440 = vmatpush.msrb.mxu3 %v243_v32  ;;  %460 = vmatpush.msra.mxu0 %v244_v33  ;;  %v510_v28 = vld [vmem:[#allocation7 + $0x460] sm:$0xff] }
  0x4f   :  { %401 = vmatpush.msrb.mxu1 %v233_v34  ;;  %421 = vmatpush.msrb.mxu2 %v234_v35  ;;  %v509_v29 = vld [vmem:[#allocation7 + $0x400] sm:$0xff] }
  0x50   :  { %441 = vmatpush.msrb.mxu3 %v235_v36  ;;  %461 = vmatpush.msra.mxu0 %v236_v37  ;;  %v508_v30 = vld [vmem:[#allocation7 + $0x3a0] sm:$0xff] }
  0x51   :  { %402 = vmatpush.msrb.mxu1 %v225_v38  ;;  %422 = vmatpush.msrb.mxu2 %v226_v39  ;;  %v507_v31 = vld [vmem:[#allocation7 + $0x340] sm:$0xff] }
  0x52   :  { %442 = vmatpush.msrb.mxu3 %v227_v40  ;;  %462 = vmatpush.msra.mxu0 %v228_v41  ;;  %v506_v32 = vld [vmem:[#allocation7 + $0x2e0] sm:$0xff] }
  0x53   :  { %403 = vmatpush.msrb.mxu1 %v217_v42  ;;  %423 = vmatpush.msrb.mxu2 %v218_v43  ;;  %v505_v33 = vld [vmem:[#allocation7 + $0x280] sm:$0xff] }
  0x54   :  { %443 = vmatpush.msrb.mxu3 %v219_v44  ;;  %463 = vmatpush.msra.mxu0 %v220_v45  ;;  %v504_v40 = vld [vmem:[#allocation7 + $0x220] sm:$0xff] }
  0x55   :  { %404 = vmatpush.msrb.mxu1 %v209_v46  ;;  %424 = vmatpush.msrb.mxu2 %v210_v47  ;;  %v503_v42 = vld [vmem:[#allocation7 + $0x1c0] sm:$0xff] }
  0x56   :  { %444 = vmatpush.msrb.mxu3 %v211_v48  ;;  %464 = vmatpush.msra.mxu0 %v212_v50  ;;  %v502_v43 = vld [vmem:[#allocation7 + $0x160] sm:$0xff] }
  0x57   :  { %405 = vmatpush.msrb.mxu1 %v201_v51  ;;  %425 = vmatpush.msrb.mxu2 %v202_v52  ;;  %v501_v44 = vld [vmem:[#allocation7 + $0x100] sm:$0xff] }
  0x58   :  { %445 = vmatpush.msrb.mxu3 %v203_v53  ;;  %465 = vmatpush.msra.mxu0 %v204_v55  ;;  %v500_v45 = vld [vmem:[#allocation7 + $0xa0] sm:$0xff] }
  0x59   :  { %406 = vmatpush.msrb.mxu1 %v193_v57  ;;  %426 = vmatpush.msrb.mxu2 %v194_v58  ;;  %v499_v46 = vld [vmem:[#allocation7 + $0x40] sm:$0xff] }
  0x5a   :  { %446 = vmatpush.msrb.mxu3 %v195_v59  ;;  %466 = vmatpush.msra.mxu0 %v196_v61  ;;  %v294_v50 = vld [vmem:[#allocation11 + $0x2] ss:$8 sm:$0xf] }
  0x5b   :  { %407 = vmatpush.msrb.mxu1 %v185_v62  ;;  %427 = vmatpush.msrb.mxu2 %v186_v63  ;;  %v295_v52 = vld [vmem:[#allocation11 + $0x2] ss:$8 sm:$0xf0] }
  0x5c   :  { %447 = vmatpush.msrb.mxu3 %v187_v0  ;;  %467 = vmatpush.msra.mxu0 %v188_v1  ;;  %v1387_v53 = vor.u32 %v295_v52, %v294_v50 }
  0x5d   :  { %408 = vmatpush.msrb.mxu1 %v177_v2  ;;  %428 = vmatpush.msrb.mxu2 %v178_v3 }
  0x5e   :  { %448 = vmatpush.msrb.mxu3 %v179_v4  ;;  %468 = vmatpush.msra.mxu0 %v180_v5  ;;  %v298_v55 = vperm.slane %v1387_v53, 0  ;;  %v299_v62 = vperm.slane %v1387_v53, 1  ;;  %v595_v4 = vld [vmem:[#allocation8 + $0x78] sm:$0xff] }
  0x5f   :  { %409 = vmatpush.msrb.mxu1 %v169_v6  ;;  %429 = vmatpush.msrb.mxu2 %v170_v7  ;;  %v594_v6 = vld [vmem:[#allocation8 + $0x70] sm:$0xff]  ;;  %v593_v7 = vld [vmem:[#allocation8 + $0x68] sm:$0xff] }
  0x60   :  { %449 = vmatpush.msrb.mxu3 %v171_v8  ;;  %469 = vmatpush.msra.mxu0 %v172_v9  ;;  %v592_v8 = vld [vmem:[#allocation8 + $0x60] sm:$0xff] }
  0x61   :  { %v515_v9 = vld [vmem:[#allocation11 + $0x3] ss:$0 sm:$0xff] }
  0x9c   :  { %v476_v34 = vpop.xlane.xlu0 %475 }
  0x9d   :  { %v480_v35 = vmul.f32 0.03125, %v476_v34  ;;  %v582_v34 = vld [vmem:[#allocation8 + $0x10] sm:$0xff] }
  0x9e   :  { %v141_v54 = vpop.f32.mrf.mxu0 }
  0x9f   :  { %v142_v56 = vadd.f32 %v141_v54, %v119_v49  ;;  %v482_v37 = vmul.f32 %v480_v35, %v480_v35  ;;  %v484_v58 = vsub.f32 %v1382_v22, %v480_v35 }
  0xa1   :  { %v1087_v60 = vmul.f32 -1.442695, %v142_v56 }
  0xa3   :  { %1105 = vpow2.f32 %v1087_v60 }
  0xa5   :  { %v479_v36 = vpop.xlane.xlu0 %478 }
  0xa6   :  { %v481_v38 = vmul.f32 0.03125, %v479_v36  ;;  %v581_v36 = vld [vmem:[#allocation8 + $0x8] sm:$0xff] }
  0xa8   :  { %v483_v39 = vsub.f32 %v481_v38, %v482_v37  ;;  %v580_v38 = vld [vmem:[#allocation8] sm:$0xff] }
  0xa9   :  { %v1106_v10 = vpop.eup %1105 }
  0xaa   :  { %v147_v11 = vadd.f32 1.0, %v1106_v10  ;;  %v485_v41 = vadd.f32 1e-05, %v483_v39  ;;  %v591_v10 = vld [vmem:[#allocation8 + $0x58] sm:$0xff] }
  0xac   :  { %1107 = vrcp.f32 %v147_v11  ;;  %v159_v15 = vand.u32 2147483648, %v147_v11  ;;  %v157_v17 = vand.u32 2147483647, %v147_v11  ;;  %vm153_vm2 = vweird.f32 %v147_v11 }
  0xad   :  { %1109 = vrsqrt.f32 %v485_v41  ;;  %vm492_vm5 = vweird.f32 %v485_v41 }
  0xae   :  { %v160_v19 = vor.u32 1.1754944e-38, %v159_v15  ;;  %vm158_vm4 = vcmp.eq.f32.partialorder %v157_v17, 8.507059e+37  ;;  %v589_v15 = vld [vmem:[#allocation8 + $0x48] sm:$0xff]  ;;  %v588_v17 = vld [vmem:[#allocation8 + $0x40] sm:$0xff] }
  0xb2   :  { %v1108_v12 = vpop.eup %1107 }
  0xb3   :  { %v149_v13 = vmul.f32 %v1108_v12, %v147_v11  ;;  %vm154_vm1 = vweird.f32 %v1108_v12  ;;  %v1110_v47 = vpop.eup %1109 }
  0xb4   :  { %vm155_vm3 = vmor %vm153_vm2, %vm154_vm1  ;;  %v487_v48 = vmul.f32 %v1110_v47, %v485_v41  ;;  %vm493_vm6 = vweird.f32 %v1110_v47 }
  0xb5   :  { %v150_v14 = vsub.f32 1.0, %v149_v13  ;;  %vm494_vm7 = vmor %vm492_vm5, %vm493_vm6  ;;  %v590_v13 = vld [vmem:[#allocation8 + $0x50] sm:$0xff] }
  0xb6   :  { %v488_v49 = vmul.f32 %v1110_v47, %v487_v48 }
  0xb7   :  { %v151_v16 = vmul.f32 %v1108_v12, %v150_v14 }
  0xb8   :  { %v489_v51 = vmul.f32 0.5, %v488_v49 }
  0xb9   :  { %v152_v18 = vadd.f32 %v1108_v12, %v151_v16 }
  0xba   :  { %v490_v54 = vsub.f32 1.5, %v489_v51 }
  0xbb   :  { %v156_v20 = vsel %vm155_vm3, %v1108_v12, %v152_v18 }
  0xbc   :  { %v161_v21 = vsel %vm158_vm4, %v160_v19, %v156_v20  ;;  %v587_v19 = vld [vmem:[#allocation8 + $0x38] sm:$0xff] }
  0xbd   :  { %v163_v23 = vmul.f32 %v161_v21, %v142_v56  ;;  %v491_v56 = vmul.f32 %v1110_v47, %v490_v54 }
  0xbf   :  { %330 = vmatmul.f32.vlgmr.msra.gmra.mxu1 %v163_v23  ;;  %350 = vmatmul.f32.vlgmr.msra.gmra.mxu2 %v163_v23  ;;  %v495_v60 = vsel %vm494_vm7, %v1110_v47, %v491_v56 }
  0xc0   :  { %370 = vmatmul.f32.vlgmr.msra.gmra.mxu3 %v163_v23  ;;  %390 = vmatmul.f32.vlgmr.msrb.gmra.mxu0 %v163_v23  ;;  %v496_v63 = vmul.f32 %v495_v60, %v484_v58 }
  0xc1   :  { %516 = vmatpush.msra.mxu1 %v514_v24  ;;  %597 = vmatpush.msra.mxu2 %v595_v4  ;;  %v596_v4 = vld [vmem:[#allocation11 + $0x5] ss:$0 sm:$0xff] }
  0xc3   :  { %517 = vmatpush.msra.mxu1 %v513_v25  ;;  %598 = vmatpush.msra.mxu2 %v594_v6 }
  0xc5   :  { %518 = vmatpush.msra.mxu1 %v512_v26  ;;  %599 = vmatpush.msra.mxu2 %v593_v7  ;;  %v585_v26 = vld [vmem:[#allocation8 + $0x28] sm:$0xff] }
  0xc7   :  { %410 = vmatmul.f32.vlgmr.msrb.gmra.mxu1 %v163_v23  ;;  %430 = vmatmul.f32.vlgmr.msrb.gmra.mxu2 %v163_v23 }
  0xc8   :  { %450 = vmatmul.f32.vlgmr.msrb.gmra.mxu3 %v163_v23  ;;  %470 = vmatmul.f32.vlgmr.msra.gmra.mxu0 %v163_v23  ;;  %v586_v23 = vld [vmem:[#allocation8 + $0x30] sm:$0xff] }
  0xc9   :  { %519 = vmatpush.msra.mxu1 %v511_v27  ;;  %600 = vmatpush.msra.mxu2 %v592_v8 }
  0xcb   :  { %520 = vmatpush.msra.mxu1 %v510_v28  ;;  %601 = vmatpush.msra.mxu2 %v591_v10 }
  0xcd   :  { %521 = vmatpush.msra.mxu1 %v509_v29  ;;  %602 = vmatpush.msra.mxu2 %v590_v13  ;;  %v584_v29 = vld [vmem:[#allocation8 + $0x20] sm:$0xff]  ;;  %v658_v13 = vld [vmem:[#allocation7 + $0x588] sm:$0xff] }
  0xcf   :  { %522 = vmatpush.msra.mxu1 %v508_v30  ;;  %603 = vmatpush.msra.mxu2 %v589_v15  ;;  %v656_v15 = vld [vmem:[#allocation7 + $0x4c8] sm:$0xff] }
  0xd1   :  { %523 = vmatpush.msra.mxu1 %v507_v31  ;;  %604 = vmatpush.msra.mxu2 %v588_v17  ;;  %v583_v31 = vld [vmem:[#allocation8 + $0x18] sm:$0xff]  ;;  %v654_v17 = vld [vmem:[#allocation7 + $0x408] sm:$0xff] }
  0xd3   :  { %524 = vmatpush.msra.mxu1 %v506_v32  ;;  %605 = vmatpush.msra.mxu2 %v587_v19  ;;  %v651_v19 = vld [vmem:[#allocation7 + $0x2e8] sm:$0xff] }
  0xd5   :  { %525 = vmatpush.msra.mxu1 %v505_v33  ;;  %606 = vmatpush.msra.mxu2 %v586_v23  ;;  %v648_v23 = vld [vmem:[#allocation7 + $0x1c8] sm:$0xff] }
  0xd7   :  { %526 = vmatpush.msra.mxu1 %v504_v40  ;;  %607 = vmatpush.msra.mxu2 %v585_v26  ;;  %v646_v26 = vld [vmem:[#allocation7 + $0x108] sm:$0xff] }
  0xd9   :  { %527 = vmatpush.msra.mxu1 %v503_v42  ;;  %608 = vmatpush.msra.mxu2 %v584_v29 }
  0xdb   :  { %528 = vmatpush.msra.mxu1 %v502_v43  ;;  %609 = vmatpush.msra.mxu2 %v583_v31 }
  0xdd   :  { %529 = vmatpush.msra.mxu1 %v501_v44  ;;  %610 = vmatpush.msra.mxu2 %v582_v34 }
  0xdf   :  { %530 = vmatpush.msra.mxu1 %v500_v45  ;;  %611 = vmatpush.msra.mxu2 %v581_v36 }
  0xe1   :  { %531 = vmatpush.msra.mxu1 %v499_v46  ;;  %612 = vmatpush.msra.mxu2 %v580_v38  ;;  %v301_v38 = vperm.slane %v1387_v53, 3 }
 0x13c   :  { %v331_v57 = vpop.f32.mrf.mxu1 }
 0x13d   :  { %v332_v59 = vadd.f32 %v331_v57, %v298_v55 }
 0x13f   :  { %v474_v61 = vadd.f32 1.0, %v332_v59 }
 0x141   :  { %v497_v1 = vmul.f32 %v496_v63, %v474_v61 }
 0x142   :  { %v351_v0 = vpop.f32.mrf.mxu2 }
 0x143   :  { %v352_v2 = vadd.f32 %v351_v0, %v299_v62 }
 0x144   :  { %v1392_v5 = vpop.f32.mrf.mxu1 }
 0x145   :  { %v498_v3 = vadd.f32 %v497_v1, %v352_v2  ;;  %v300_v2 = vperm.slane %v1387_v53, 2 }
 0x147   :  { %532 = vmatmul.f32.vlgmr.msra.gmra.mxu1 %v498_v3  ;;  %v371_v3 = vpop.f32.mrf.mxu3 }
 0x148   :  { %v372_v7 = vadd.f32 %v371_v3, %v300_v2  ;;  %v734_v2 = vld [vmem:[#allocation8 + $0xc0] sm:$0xff] }
 0x14a   :  { %v1398_v1 = vpop.f32.mrf.mxu2 }
 0x1c4   :  { %v533_v11 = vpop.f32.mrf.mxu1 }
 0x1c5   :  { %v1394_v12 = vadd.f32 %v533_v11, %v515_v9 }
 0x1c7   :  { %v537_v14 = vmul.f32 0.70710677, %v1394_v12  ;;  %v536_v62 = vmul.f32 0.5, %v1394_v12  ;;  %v659_v12 = vld [vmem:[#allocation7 + $0x5e8] sm:$0xff] }
 0x1c8   :  { %661 = vmatpush.msra.mxu3 %v659_v12  ;;  %v731_v12 = vld [vmem:[#allocation8 + $0xa8] sm:$0xff] }
 0x1c9   :  { %v538_v16 = vmul.f32 %v537_v14, %v537_v14 }
 0x1ca   :  { %662 = vmatpush.msra.mxu3 %v658_v13 }
 0x1cb   :  { %v539_v18 = vmin.f32 %v538_v16, 16.0  ;;  %v655_v16 = vld [vmem:[#allocation7 + $0x468] sm:$0xff] }
 0x1cd   :  { %v540_v20 = vmul.f32 2.1237322e-06, %v539_v18  ;;  %v551_v21 = vmul.f32 3.8918573e-05, %v539_v18 }
 0x1cf   :  { %v541_v24 = vadd.f32 0.00028619796, %v540_v20  ;;  %v552_v25 = vadd.f32 0.001143296, %v551_v21  ;;  %v650_v20 = vld [vmem:[#allocation7 + $0x288] sm:$0xff] }
 0x1d0   :  { %v649_v21 = vld [vmem:[#allocation7 + $0x228] sm:$0xff] }
 0x1d1   :  { %v542_v27 = vmul.f32 %v541_v24, %v539_v18  ;;  %v553_v28 = vmul.f32 %v552_v25, %v539_v18  ;;  %v647_v25 = vld [vmem:[#allocation7 + $0x168] sm:$0xff] }
 0x1d3   :  { %v554_v30 = vadd.f32 0.014752088, %v553_v28  ;;  %v543_v32 = vadd.f32 0.0036580483, %v542_v27  ;;  %v645_v27 = vld [vmem:[#allocation7 + $0xa8] sm:$0xff] }
 0x1d4   :  { %v644_v28 = vld [vmem:[#allocation7 + $0x48] sm:$0xff] }
 0x1d5   :  { %v555_v33 = vmul.f32 %v554_v30, %v539_v18  ;;  %v544_v37 = vmul.f32 %v543_v32, %v539_v18 }
 0x1d7   :  { %v556_v35 = vadd.f32 0.112945676, %v555_v33  ;;  %v545_v41 = vadd.f32 0.05243302, %v544_v37 }
 0x1d9   :  { %v557_v39 = vmul.f32 %v556_v35, %v539_v18  ;;  %v546_v44 = vmul.f32 %v545_v41, %v539_v18 }
 0x1db   :  { %v558_v40 = vadd.f32 0.4994258, %v557_v39  ;;  %v547_v45 = vadd.f32 0.18741608, %v546_v44  ;;  %v391_v39 = vpop.f32.mrf.mxu0  ;;  %v302_v44 = vperm.slane %v1387_v53, 4 }
 0x1dd   :  { %v559_v42 = vmul.f32 %v558_v40, %v539_v18  ;;  %v548_v47 = vmul.f32 %v547_v45, %v539_v18  ;;  %v652_v18 = vld [vmem:[#allocation7 + $0x348] sm:$0xff] }
 0x1df   :  { %v560_v43 = vadd.f32 1.0, %v559_v42  ;;  %v549_v51 = vadd.f32 1.1283791, %v548_v47  ;;  %v392_v42 = vadd.f32 %v391_v39, %v301_v38 }
 0x1e1   :  { %1111 = vrcp.f32 %v560_v43  ;;  %v572_v50 = vand.u32 2147483648, %v560_v43  ;;  %v570_v54 = vand.u32 2147483647, %v560_v43  ;;  %vm566_vm9 = vweird.f32 %v560_v43 }
 0x1e2   :  { %v550_v57 = vmul.f32 %v549_v51, %v537_v14  ;;  %v657_v14 = vld [vmem:[#allocation7 + $0x528] sm:$0xff]  ;;  %v619_v47 = vadd.f32 1.0, %v392_v42 }
 0x1e3   :  { %v573_v56 = vor.u32 1.1754944e-38, %v572_v50  ;;  %vm571_vm11 = vcmp.eq.f32.partialorder %v570_v54, 8.507059e+37  ;;  %663 = vmatpush.msra.mxu3 %v657_v14  ;;  %v1411_v54 = vpop.f32.mrf.mxu3 }
 0x1e5   :  { %664 = vmatpush.msra.mxu3 %v656_v15  ;;  %v730_v15 = vld [vmem:[#allocation8 + $0xa0] sm:$0xff] }
 0x1e7   :  { %v1112_v46 = vpop.eup %1111  ;;  %665 = vmatpush.msra.mxu3 %v655_v16 }
 0x1e8   :  { %v562_v48 = vmul.f32 %v1112_v46, %v560_v43  ;;  %vm567_vm8 = vweird.f32 %v1112_v46 }
 0x1e9   :  { %vm568_vm10 = vmor %vm566_vm9, %vm567_vm8  ;;  %666 = vmatpush.msra.mxu3 %v654_v17  ;;  %v729_v17 = vld [vmem:[#allocation8 + $0x98] sm:$0xff] }
 0x1ea   :  { %v563_v49 = vsub.f32 1.0, %v562_v48 }
 0x1ec   :  { %v564_v52 = vmul.f32 %v1112_v46, %v563_v49  ;;  %v412_v49 = vadd.f32 %v1392_v5, %v302_v44  ;;  %v736_v5 = vld [vmem:[#allocation8 + $0xd0] sm:$0xff] }
 0x1ee   :  { %v565_v55 = vadd.f32 %v1112_v46, %v564_v52  ;;  %v741_v52 = vld [vmem:[#allocation8 + $0xf8] sm:$0xff] }
 0x1ef   :  { %743 = vmatpush.msrb.mxu0 %v741_v52  ;;  %v742_v52 = vld [vmem:[#allocation11 + $0x6] ss:$0 sm:$0xff] }
 0x1f0   :  { %v569_v58 = vsel %vm568_vm10, %v1112_v46, %v565_v55  ;;  %v740_v55 = vld [vmem:[#allocation8 + $0xf0] sm:$0xff] }
 0x1f1   :  { %v574_v59 = vsel %vm571_vm11, %v573_v56, %v569_v58  ;;  %744 = vmatpush.msrb.mxu0 %v740_v55  ;;  %v739_v56 = vld [vmem:[#allocation8 + $0xe8] sm:$0xff]  ;;  %v660_v58 = vld [vmem:[#allocation11 + $0x4] ss:$0 sm:$0xff] }
 0x1f2   :  { %v575_v60 = vmul.f32 %v574_v59, %v550_v57  ;;  %v738_v57 = vld [vmem:[#allocation8 + $0xe0] sm:$0xff]  ;;  %v737_v59 = vld [vmem:[#allocation8 + $0xd8] sm:$0xff] }
 0x1f3   :  { %745 = vmatpush.msrb.mxu0 %v739_v56 }
 0x1f4   :  { %v1088_v61 = vclamps-f32 %v575_v60, 1.0 }
 0x1f5   :  { %746 = vmatpush.msrb.mxu0 %v738_v57 }
 0x1f6   :  { %v578_v63 = vadd.f32 1.0, %v1088_v61 }
 0x1f7   :  { %747 = vmatpush.msrb.mxu0 %v737_v59 }
 0x1f8   :  { %v579_v0 = vmul.f32 %v578_v63, %v536_v62  ;;  %v735_v63 = vld [vmem:[#allocation8 + $0xc8] sm:$0xff] }
 0x1f9   :  { %748 = vmatpush.msrb.mxu0 %v736_v5  ;;  %v821_v5 = vld [vmem:[#allocation7 + $0x5f8] sm:$0xff] }
 0x1fa   :  { %613 = vmatmul.f32.vlgmr.msra.gmra.mxu2 %v579_v0 }
 0x1fb   :  { %749 = vmatpush.msrb.mxu0 %v735_v63  ;;  %849 = vmatpush.msrb.mxu2 %v821_v5  ;;  %v819_v63 = vld [vmem:[#allocation7 + $0x598] sm:$0xff]  ;;  %v987_v5 = vld [vmem:[#allocation10 + $0xf0] sm:$0xff] }
 0x1fd   :  { %750 = vmatpush.msrb.mxu0 %v734_v2  ;;  %850 = vmatpush.msrb.mxu2 %v819_v63  ;;  %v815_v2 = vld [vmem:[#allocation7 + $0x4d8] sm:$0xff]  ;;  %v986_v63 = vld [vmem:[#allocation10 + $0xe8] sm:$0xff] }
 0x27d   :  { %v614_v6 = vpop.f32.mrf.mxu2 }
 0x27e   :  { %v615_v8 = vadd.f32 %v614_v6, %v596_v4  ;;  %v733_v4 = vld [vmem:[#allocation8 + $0xb8] sm:$0xff] }
 0x27f   :  { %751 = vmatpush.msrb.mxu0 %v733_v4  ;;  %v813_v4 = vld [vmem:[#allocation7 + $0x478] sm:$0xff] }
 0x280   :  { %v617_v9 = vmul.f32 %v615_v8, %v372_v7  ;;  %v732_v8 = vld [vmem:[#allocation8 + $0xb0] sm:$0xff] }
 0x281   :  { %752 = vmatpush.msrb.mxu0 %v732_v8  ;;  %v808_v8 = vld [vmem:[#allocation7 + $0x3b0] sm:$0xff] }
 0x282   :  { %v1402_v10 = vadd.f32 %v617_v9, %v1382_v22  ;;  %v653_v22 = vld [vmem:[#allocation7 + $0x3a8] sm:$0xff] }
 0x283   :  { %667 = vmatpush.msra.mxu3 %v653_v22  ;;  %753 = vmatpush.msrb.mxu0 %v731_v12  ;;  %v807_v12 = vld [vmem:[#allocation7 + $0x358] sm:$0xff] }
 0x284   :  { %620 = vadd.xlane.f32.xlu1 %v1402_v10  ;;  %v622_v11 = vmul.f32 %v1402_v10, %v1402_v10 }
 0x285   :  { %668 = vmatpush.msra.mxu3 %v652_v18  ;;  %754 = vmatpush.msrb.mxu0 %v730_v15  ;;  %v802_v15 = vld [vmem:[#allocation7 + $0x290] sm:$0xff] }
 0x287   :  { %669 = vmatpush.msra.mxu3 %v651_v19  ;;  %755 = vmatpush.msrb.mxu0 %v729_v17  ;;  %v728_v19 = vld [vmem:[#allocation8 + $0x90] sm:$0xff] }
 0x288   :  { %v800_v17 = vld [vmem:[#allocation7 + $0x230] sm:$0xff] }
 0x289   :  { %670 = vmatpush.msra.mxu3 %v650_v20  ;;  %756 = vmatpush.msrb.mxu0 %v728_v19  ;;  %v799_v19 = vld [vmem:[#allocation7 + $0x1d8] sm:$0xff] }
 0x28b   :  { %671 = vmatpush.msra.mxu3 %v649_v21  ;;  %v727_v21 = vld [vmem:[#allocation8 + $0x88] sm:$0xff] }
 0x28c   :  { %623 = vadd.xlane.f32.xlu1 %v622_v11  ;;  %757 = vmatpush.msrb.mxu0 %v727_v21  ;;  %v796_v21 = vld [vmem:[#allocation7 + $0x170] sm:$0xff] }
 0x28d   :  { %672 = vmatpush.msra.mxu3 %v648_v23 }
 0x28f   :  { %673 = vmatpush.msra.mxu3 %v647_v25 }
 0x291   :  { %674 = vmatpush.msra.mxu3 %v646_v26 }
 0x293   :  { %675 = vmatpush.msra.mxu3 %v645_v27 }
 0x295   :  { %676 = vmatpush.msra.mxu3 %v644_v28 }
 0x2f7   :  { %v621_v24 = vpop.xlane.xlu1 %620 }
 0x2f8   :  { %v625_v29 = vmul.f32 0.03125, %v621_v24  ;;  %v726_v24 = vld [vmem:[#allocation8 + $0x80] sm:$0xff] }
 0x2f9   :  { %758 = vmatpush.msrb.mxu0 %v726_v24  ;;  %v794_v24 = vld [vmem:[#allocation7 + $0x110] sm:$0xff] }
 0x2fa   :  { %v627_v31 = vmul.f32 %v625_v29, %v625_v29  ;;  %v629_v45 = vsub.f32 %v1402_v10, %v625_v29 }
 0x2ff   :  { %v624_v30 = vpop.xlane.xlu1 %623 }
 0x300   :  { %v626_v32 = vmul.f32 0.03125, %v624_v30 }
 0x302   :  { %v628_v33 = vsub.f32 %v626_v32, %v627_v31 }
 0x304   :  { %v630_v34 = vadd.f32 1e-05, %v628_v33 }
 0x306   :  { %1113 = vrsqrt.f32 %v630_v34  ;;  %vm637_vm13 = vweird.f32 %v630_v34 }
 0x30c   :  { %v1114_v35 = vpop.eup %1113 }
 0x30d   :  { %v632_v36 = vmul.f32 %v1114_v35, %v630_v34  ;;  %vm638_vm12 = vweird.f32 %v1114_v35 }
 0x30e   :  { %vm639_vm14 = vmor %vm637_vm13, %vm638_vm12 }
 0x30f   :  { %v633_v37 = vmul.f32 %v1114_v35, %v632_v36 }
 0x311   :  { %v634_v40 = vmul.f32 0.5, %v633_v37 }
 0x313   :  { %v635_v41 = vsub.f32 1.5, %v634_v40 }
 0x315   :  { %v636_v43 = vmul.f32 %v1114_v35, %v635_v41 }
 0x317   :  { %v640_v46 = vsel %vm639_vm14, %v1114_v35, %v636_v43 }
 0x318   :  { %v641_v48 = vmul.f32 %v640_v46, %v629_v45 }
 0x31a   :  { %v642_v50 = vmul.f32 %v641_v48, %v619_v47 }
 0x31c   :  { %v643_v51 = vadd.f32 %v642_v50, %v412_v49  ;;  %v1417_v50 = vpop.f32.mrf.mxu0 }
 0x31e   :  { %677 = vmatmul.f32.vlgmr.msra.gmra.mxu3 %v643_v51  ;;  %v303_v51 = vperm.slane %v1387_v53, 5 }
 0x320   :  { %v432_v56 = vadd.f32 %v1398_v1, %v303_v51  ;;  %v816_v1 = vld [vmem:[#allocation7 + $0x530] sm:$0xff] }
 0x3a1   :  { %v678_v60 = vpop.f32.mrf.mxu3 }
 0x3a2   :  { %v1413_v61 = vadd.f32 %v678_v60, %v660_v58 }
 0x3a4   :  { %v682_v62 = vmul.f32 0.70710677, %v1413_v61  ;;  %v681_v47 = vmul.f32 0.5, %v1413_v61  ;;  %v820_v61 = vld [vmem:[#allocation7 + $0x5f0] sm:$0xff] }
 0x3a5   :  { %829 = vmatpush.msrb.mxu1 %v820_v61  ;;  %v968_v61 = vld [vmem:[#allocation10 + $0x58] sm:$0xff] }
 0x3a6   :  { %v683_v0 = vmul.f32 %v682_v62, %v682_v62 }
 0x3a8   :  { %v684_v3 = vmin.f32 %v683_v0, 16.0  ;;  %v817_v0 = vld [vmem:[#allocation7 + $0x538] sm:$0xff] }
 0x3a9   :  { %851 = vmatpush.msrb.mxu2 %v817_v0 }
 0x3aa   :  { %v685_v6 = vmul.f32 2.1237322e-06, %v684_v3  ;;  %v696_v7 = vmul.f32 3.8918573e-05, %v684_v3 }
 0x3ab   :  { %852 = vmatpush.msrb.mxu2 %v815_v2  ;;  %v985_v2 = vld [vmem:[#allocation10 + $0xe0] sm:$0xff] }
 0x3ac   :  { %v686_v9 = vadd.f32 0.00028619796, %v685_v6  ;;  %v697_v11 = vadd.f32 0.001143296, %v696_v7  ;;  %v810_v6 = vld [vmem:[#allocation7 + $0x410] sm:$0xff]  ;;  %v811_v7 = vld [vmem:[#allocation7 + $0x418] sm:$0xff] }
 0x3ad   :  { %853 = vmatpush.msrb.mxu2 %v813_v4 }
 0x3ae   :  { %v687_v13 = vmul.f32 %v686_v9, %v684_v3  ;;  %v698_v14 = vmul.f32 %v697_v11, %v684_v3  ;;  %v809_v9 = vld [vmem:[#allocation7 + $0x3b8] sm:$0xff]  ;;  %v806_v11 = vld [vmem:[#allocation7 + $0x350] sm:$0xff] }
 0x3af   :  { %854 = vmatpush.msrb.mxu2 %v811_v7  ;;  %v984_v7 = vld [vmem:[#allocation10 + $0xd8] sm:$0xff] }
 0x3b0   :  { %v699_v16 = vadd.f32 0.014752088, %v698_v14  ;;  %v688_v22 = vadd.f32 0.0036580483, %v687_v13  ;;  %v804_v13 = vld [vmem:[#allocation7 + $0x2f0] sm:$0xff]  ;;  %v805_v14 = vld [vmem:[#allocation7 + $0x2f8] sm:$0xff] }
 0x3b1   :  { %855 = vmatpush.msrb.mxu2 %v809_v9 }
 0x3b2   :  { %v700_v18 = vmul.f32 %v699_v16, %v684_v3  ;;  %v689_v23 = vmul.f32 %v688_v22, %v684_v3  ;;  %v803_v16 = vld [vmem:[#allocation7 + $0x298] sm:$0xff] }
 0x3b3   :  { %856 = vmatpush.msrb.mxu2 %v807_v12  ;;  %v801_v22 = vld [vmem:[#allocation7 + $0x238] sm:$0xff]  ;;  %v983_v12 = vld [vmem:[#allocation10 + $0xd0] sm:$0xff] }
 0x3b4   :  { %v701_v20 = vadd.f32 0.112945676, %v700_v18  ;;  %v690_v27 = vadd.f32 0.05243302, %v689_v23  ;;  %v798_v18 = vld [vmem:[#allocation7 + $0x1d0] sm:$0xff]  ;;  %v797_v23 = vld [vmem:[#allocation7 + $0x178] sm:$0xff] }
 0x3b5   :  { %857 = vmatpush.msrb.mxu2 %v805_v14 }
 0x3b6   :  { %v702_v25 = vmul.f32 %v701_v20, %v684_v3  ;;  %v691_v30 = vmul.f32 %v690_v27, %v684_v3  ;;  %v793_v27 = vld [vmem:[#allocation7 + $0xb8] sm:$0xff] }
 0x3b7   :  { %858 = vmatpush.msrb.mxu2 %v803_v16  ;;  %v963_v16 = vld [vmem:[#allocation10 + $0x30] sm:$0xff] }
 0x3b8   :  { %v703_v26 = vadd.f32 0.4994258, %v702_v25  ;;  %v692_v31 = vadd.f32 0.18741608, %v691_v30  ;;  %v795_v25 = vld [vmem:[#allocation7 + $0x118] sm:$0xff] }
 0x3b9   :  { %859 = vmatpush.msrb.mxu2 %v801_v22 }
 0x3ba   :  { %v704_v28 = vmul.f32 %v703_v26, %v684_v3  ;;  %v693_v33 = vmul.f32 %v692_v31, %v684_v3  ;;  %v812_v3 = vld [vmem:[#allocation7 + $0x470] sm:$0xff] }
 0x3bb   :  { %860 = vmatpush.msrb.mxu2 %v799_v19  ;;  %v792_v26 = vld [vmem:[#allocation7 + $0xb0] sm:$0xff] }
 0x3bc   :  { %v705_v29 = vadd.f32 1.0, %v704_v28  ;;  %v694_v37 = vadd.f32 1.1283791, %v693_v33  ;;  %v790_v28 = vld [vmem:[#allocation7 + $0x50] sm:$0xff] }
 0x3bd   :  { %861 = vmatpush.msrb.mxu2 %v797_v23 }
 0x3be   :  { %1115 = vrcp.f32 %v705_v29  ;;  %v717_v36 = vand.u32 2147483648, %v705_v29  ;;  %v715_v39 = vand.u32 2147483647, %v705_v29  ;;  %vm711_vm0 = vweird.f32 %v705_v29 }
 0x3bf   :  { %v695_v42 = vmul.f32 %v694_v37, %v682_v62  ;;  %v818_v62 = vld [vmem:[#allocation7 + $0x590] sm:$0xff]  ;;  %862 = vmatpush.msrb.mxu2 %v795_v25 }
 0x3c0   :  { %v718_v41 = vor.u32 1.1754944e-38, %v717_v36  ;;  %vm716_vm2 = vcmp.eq.f32.partialorder %v715_v39, 8.507059e+37  ;;  %830 = vmatpush.msrb.mxu1 %v818_v62  ;;  %v304_v39 = vperm.slane %v1387_v53, 6  ;;  %v967_v62 = vld [vmem:[#allocation10 + $0x50] sm:$0xff] }
 0x3c1   :  { %863 = vmatpush.msrb.mxu2 %v793_v27  ;;  %v980_v27 = vld [vmem:[#allocation10 + $0xb8] sm:$0xff] }
 0x3c2   :  { %831 = vmatpush.msrb.mxu1 %v816_v1 }
 0x3c4   :  { %v1116_v32 = vpop.eup %1115 }
 0x3c5   :  { %v707_v34 = vmul.f32 %v1116_v32, %v705_v29  ;;  %vm712_vm15 = vweird.f32 %v1116_v32  ;;  %v791_v29 = vld [vmem:[#allocation7 + $0x58] sm:$0xff] }
 0x3c6   :  { %vm713_vm1 = vmor %vm711_vm0, %vm712_vm15  ;;  %864 = vmatpush.msrb.mxu2 %v791_v29 }
 0x3c7   :  { %v708_v35 = vsub.f32 1.0, %v707_v34 }
 0x3c9   :  { %v709_v38 = vmul.f32 %v1116_v32, %v708_v35 }
 0x3cb   :  { %v710_v40 = vadd.f32 %v1116_v32, %v709_v38 }
 0x3cd   :  { %v714_v43 = vsel %vm713_vm1, %v1116_v32, %v710_v40 }
 0x3ce   :  { %v719_v44 = vsel %vm716_vm2, %v718_v41, %v714_v43 }
 0x3cf   :  { %v720_v45 = vmul.f32 %v719_v44, %v695_v42  ;;  %v452_v42 = vadd.f32 %v1411_v54, %v304_v39  ;;  %v305_v44 = vperm.slane %v1387_v53, 7  ;;  %v971_v54 = vld [vmem:[#allocation10 + $0x70] sm:$0xff]  ;;  %v969_v53 = vld [vmem:[#allocation10 + $0x60] sm:$0xff] }
 0x3d1   :  { %v1089_v46 = vclamps-f32 %v720_v45, 1.0 }
 0x3d3   :  { %v723_v48 = vadd.f32 1.0, %v1089_v46 }
 0x3d5   :  { %v724_v49 = vmul.f32 %v723_v48, %v681_v47  ;;  %v765_v47 = vadd.f32 1.0, %v452_v42 }
 0x3d7   :  { %759 = vmatmul.f32.vlgmr.msrb.gmra.mxu0 %v724_v49  ;;  %v472_v49 = vadd.f32 %v1417_v50, %v305_v44  ;;  %v977_v44 = vld [vmem:[#allocation10 + $0xa0] sm:$0xff] }
 0x454   :  { %v760_v55 = vpop.f32.mrf.mxu0 }
 0x455   :  { %v761_v57 = vadd.f32 %v760_v55, %v742_v52  ;;  %v972_v55 = vld [vmem:[#allocation10 + $0x78] sm:$0xff] }
 0x456   :  { %990 = vmatpush.msrb.mxu3 %v972_v55 }
 0x457   :  { %v763_v58 = vmul.f32 %v761_v57, %v432_v56  ;;  %v823_v56 = vld [vmem:[#allocation11 + $0x7] ss:$8 sm:$0x3] }
 0x458   :  { %991 = vmatpush.msrb.mxu3 %v971_v54  ;;  %v970_v57 = vld [vmem:[#allocation10 + $0x68] sm:$0xff]  ;;  %v826_v0 = vperm.slane %v823_v56, 1 }
 0x459   :  { %v1422_v59 = vadd.f32 %v763_v58, %v1402_v10  ;;  %v814_v10 = vld [vmem:[#allocation7 + $0x4d0] sm:$0xff]  ;;  %v825_v58 = vperm.slane %v823_v56, 0 }
 0x45a   :  { %832 = vmatpush.msrb.mxu1 %v814_v10  ;;  %992 = vmatpush.msrb.mxu3 %v970_v57  ;;  %v966_v10 = vld [vmem:[#allocation10 + $0x48] sm:$0xff]  ;;  %v975_v56 = vld [vmem:[#allocation10 + $0x90] sm:$0xff] }
 0x45b   :  { %766 = vadd.xlane.f32.xlu2 %v1422_v59  ;;  %v768_v60 = vmul.f32 %v1422_v59, %v1422_v59 }
 0x45c   :  { %833 = vmatpush.msrb.mxu1 %v812_v3  ;;  %993 = vmatpush.msrb.mxu3 %v969_v53 }
 0x45e   :  { %834 = vmatpush.msrb.mxu1 %v810_v6  ;;  %994 = vmatpush.msrb.mxu3 %v968_v61  ;;  %v965_v6 = vld [vmem:[#allocation10 + $0x40] sm:$0xff] }
 0x460   :  { %835 = vmatpush.msrb.mxu1 %v808_v8  ;;  %995 = vmatpush.msrb.mxu3 %v967_v62 }
 0x462   :  { %836 = vmatpush.msrb.mxu1 %v806_v11  ;;  %996 = vmatpush.msrb.mxu3 %v966_v10  ;;  %v964_v11 = vld [vmem:[#allocation10 + $0x38] sm:$0xff] }
 0x463   :  { %769 = vadd.xlane.f32.xlu2 %v768_v60 }
 0x464   :  { %837 = vmatpush.msrb.mxu1 %v804_v13  ;;  %997 = vmatpush.msrb.mxu3 %v965_v6 }
 0x466   :  { %838 = vmatpush.msrb.mxu1 %v802_v15  ;;  %998 = vmatpush.msrb.mxu3 %v964_v11 }
 0x468   :  { %839 = vmatpush.msrb.mxu1 %v800_v17  ;;  %v982_v17 = vld [vmem:[#allocation10 + $0xc8] sm:$0xff]  ;;  %999 = vmatpush.msrb.mxu3 %v963_v16 }
 0x46a   :  { %840 = vmatpush.msrb.mxu1 %v798_v18 }
 0x46c   :  { %841 = vmatpush.msrb.mxu1 %v796_v21  ;;  %v981_v21 = vld [vmem:[#allocation10 + $0xc0] sm:$0xff] }
 0x46e   :  { %842 = vmatpush.msrb.mxu1 %v794_v24 }
 0x470   :  { %843 = vmatpush.msrb.mxu1 %v792_v26  ;;  %v961_v26 = vld [vmem:[#allocation10 + $0x20] sm:$0xff] }
 0x472   :  { %844 = vmatpush.msrb.mxu1 %v790_v28 }
 0x4ce   :  { %v767_v20 = vpop.xlane.xlu2 %766 }
 0x4cf   :  { %v771_v30 = vmul.f32 0.03125, %v767_v20  ;;  %v962_v20 = vld [vmem:[#allocation10 + $0x28] sm:$0xff] }
 0x4d0   :  { %1000 = vmatpush.msrb.mxu3 %v962_v20 }
 0x4d1   :  { %v773_v32 = vmul.f32 %v771_v30, %v771_v30  ;;  %v775_v45 = vsub.f32 %v1422_v59, %v771_v30  ;;  %v988_v59 = vld [vmem:[#allocation10 + $0xf8] sm:$0xff] }
 0x4d2   :  { %1010 = vmatpush.msra.mxu0 %v988_v59  ;;  %1001 = vmatpush.msrb.mxu3 %v961_v26 }
 0x4d4   :  { %1011 = vmatpush.msra.mxu0 %v987_v5 }
 0x4d6   :  { %v770_v31 = vpop.xlane.xlu2 %769  ;;  %1012 = vmatpush.msra.mxu0 %v986_v63 }
 0x4d7   :  { %v772_v33 = vmul.f32 0.03125, %v770_v31 }
 0x4d8   :  { %1013 = vmatpush.msra.mxu0 %v985_v2 }
 0x4d9   :  { %v774_v34 = vsub.f32 %v772_v33, %v773_v32  ;;  %v960_v32 = vld [vmem:[#allocation10 + $0x18] sm:$0xff]  ;;  %v979_v33 = vld [vmem:[#allocation10 + $0xb0] sm:$0xff] }
 0x4da   :  { %1014 = vmatpush.msra.mxu0 %v984_v7  ;;  %1002 = vmatpush.msrb.mxu3 %v960_v32 }
 0x4db   :  { %v776_v35 = vadd.f32 1e-05, %v774_v34 }
 0x4dc   :  { %1015 = vmatpush.msra.mxu0 %v983_v12 }
 0x4dd   :  { %1117 = vrsqrt.f32 %v776_v35  ;;  %vm783_vm4 = vweird.f32 %v776_v35 }
 0x4de   :  { %1016 = vmatpush.msra.mxu0 %v982_v17 }
 0x4e0   :  { %1017 = vmatpush.msra.mxu0 %v981_v21 }
 0x4e2   :  { %1018 = vmatpush.msra.mxu0 %v980_v27 }
 0x4e3   :  { %v1118_v36 = vpop.eup %1117 }
 0x4e4   :  { %v778_v37 = vmul.f32 %v1118_v36, %v776_v35  ;;  %vm784_vm3 = vweird.f32 %v1118_v36  ;;  %1019 = vmatpush.msra.mxu0 %v979_v33 }
 0x4e5   :  { %vm785_vm5 = vmor %vm783_vm4, %vm784_vm3 }
 0x4e6   :  { %v779_v38 = vmul.f32 %v1118_v36, %v778_v37  ;;  %v959_v37 = vld [vmem:[#allocation10 + $0x10] sm:$0xff] }
 0x4e7   :  { %1003 = vmatpush.msrb.mxu3 %v959_v37 }
 0x4e8   :  { %v780_v40 = vmul.f32 0.5, %v779_v38  ;;  %v978_v38 = vld [vmem:[#allocation10 + $0xa8] sm:$0xff] }
 0x4e9   :  { %1020 = vmatpush.msra.mxu0 %v978_v38 }
 0x4ea   :  { %v781_v41 = vsub.f32 1.5, %v780_v40 }
 0x4eb   :  { %1021 = vmatpush.msra.mxu0 %v977_v44  ;;  %v1030_v44 = vlaneseq }
 0x4ec   :  { %v782_v43 = vmul.f32 %v1118_v36, %v781_v41 }
 0x4ee   :  { %v786_v46 = vsel %vm785_vm5, %v1118_v36, %v782_v43  ;;  %v958_v43 = vld [vmem:[#allocation10 + $0x8] sm:$0xff] }
 0x4ef   :  { %v787_v48 = vmul.f32 %v786_v46, %v775_v45  ;;  %1004 = vmatpush.msrb.mxu3 %v958_v43 }
 0x4f1   :  { %v788_v51 = vmul.f32 %v787_v48, %v765_v47  ;;  %v957_v47 = vld [vmem:[#allocation10] sm:$0xff]  ;;  %v976_v48 = vld [vmem:[#allocation10 + $0x98] sm:$0xff] }
 0x4f2   :  { %1005 = vmatpush.msrb.mxu3 %v957_v47  ;;  %1022 = vmatpush.msra.mxu0 %v976_v48 }
 0x4f3   :  { %v789_v52 = vadd.f32 %v788_v51, %v472_v49 }
 0x4f4   :  { %1023 = vmatpush.msra.mxu0 %v975_v56 }
 0x4f5   :  { %845 = vmatmul.f32.vlgmr.msrb.gmra.mxu1 %v789_v52  ;;  %865 = vmatmul.f32.vlgmr.msrb.gmra.mxu2 %v789_v52 }
 0x572   :  { %v846_v60 = vpop.f32.mrf.mxu1 }
 0x573   :  { %v1432_v50 = vadd.f32 %v846_v60, %v825_v58  ;;  %v974_v58 = vld [vmem:[#allocation10 + $0x88] sm:$0xff]  ;;  %v973_v60 = vld [vmem:[#allocation10 + $0x80] sm:$0xff] }
 0x574   :  { %1024 = vmatpush.msra.mxu0 %v974_v58 }
 0x575   :  { %v1435_v1 = vmul.f32 0.70710677, %v1432_v50 }
 0x576   :  { %1025 = vmatpush.msra.mxu0 %v973_v60 }
 0x577   :  { %v873_v3 = vmul.f32 %v1435_v1, %v1435_v1 }
 0x578   :  { %v866_v4 = vpop.f32.mrf.mxu2 }
 0x579   :  { %v1439_v8 = vmin.f32 %v873_v3, 16.0  ;;  %v1441_v9 = vadd.f32 %v866_v4, %v826_v0 }
 0x57b   :  { %v875_v13 = vmul.f32 2.1237322e-06, %v1439_v8  ;;  %v886_v14 = vmul.f32 3.8918573e-05, %v1439_v8  ;;  %v1446_v15 = vmul.f32 0.70710677, %v1441_v9 }
 0x57d   :  { %v876_v22 = vadd.f32 0.00028619796, %v875_v13  ;;  %v887_v18 = vadd.f32 0.001143296, %v886_v14  ;;  %v913_v19 = vmul.f32 %v1446_v15, %v1446_v15 }
 0x57f   :  { %v877_v23 = vmul.f32 %v876_v22, %v1439_v8  ;;  %v888_v24 = vmul.f32 %v887_v18, %v1439_v8  ;;  %v1452_v25 = vmin.f32 %v913_v19, 16.0 }
 0x581   :  { %v878_v28 = vadd.f32 0.0036580483, %v877_v23  ;;  %v889_v29 = vadd.f32 0.014752088, %v888_v24  ;;  %v915_v30 = vmul.f32 2.1237322e-06, %v1452_v25 }
 0x582   :  { %v926_v31 = vmul.f32 3.8918573e-05, %v1452_v25 }
 0x583   :  { %v890_v34 = vmul.f32 %v889_v29, %v1439_v8  ;;  %v916_v35 = vadd.f32 0.00028619796, %v915_v30  ;;  %v879_v40 = vmul.f32 %v878_v28, %v1439_v8 }
 0x584   :  { %v927_v36 = vadd.f32 0.001143296, %v926_v31 }
 0x585   :  { %v891_v39 = vadd.f32 0.112945676, %v890_v34  ;;  %v917_v41 = vmul.f32 %v916_v35, %v1452_v25  ;;  %v880_v52 = vadd.f32 0.05243302, %v879_v40  ;;  %v869_v34 = vmul.f32 0.5, %v1432_v50 }
 0x586   :  { %v928_v42 = vmul.f32 %v927_v36, %v1452_v25 }
 0x587   :  { %v892_v45 = vmul.f32 %v891_v39, %v1439_v8  ;;  %v918_v51 = vadd.f32 0.0036580483, %v917_v41  ;;  %v881_v61 = vmul.f32 %v880_v52, %v1439_v8  ;;  %v870_v41 = vmul.f32 0.5, %v1441_v9 }
 0x588   :  { %v929_v46 = vadd.f32 0.014752088, %v928_v42 }
 0x589   :  { %v893_v49 = vadd.f32 0.4994258, %v892_v45  ;;  %v919_v59 = vmul.f32 %v918_v51, %v1452_v25  ;;  %v882_v0 = vadd.f32 0.18741608, %v881_v61  ;;  %v989_v45 = vld [vmem:[#allocation11 + $0x40] ss:$0 sm:$0xff] }
 0x58a   :  { %v930_v55 = vmul.f32 %v929_v46, %v1452_v25  ;;  %v1031_v46 = vand.u32 127, %v1030_v44 }
 0x58b   :  { %v894_v54 = vmul.f32 %v893_v49, %v1439_v8  ;;  %v920_v63 = vadd.f32 0.05243302, %v919_v59  ;;  %v883_v6 = vmul.f32 %v882_v0, %v1439_v8 }
 0x58c   :  { %v931_v57 = vadd.f32 0.112945676, %v930_v55  ;;  %vm1032_vm14 = vcmp.lt.s32.totalorder %v1031_v46, 3 }
 0x58d   :  { %v895_v53 = vadd.f32 1.0, %v894_v54  ;;  %v921_v4 = vmul.f32 %v920_v63, %v1452_v25  ;;  %v884_v14 = vadd.f32 1.1283791, %v883_v6 }
 0x58e   :  { %v932_v5 = vmul.f32 %v931_v57, %v1452_v25 }
 0x58f   :  { %1119 = vrcp.f32 %v895_v53  ;;  %v907_v12 = vand.u32 2147483648, %v895_v53  ;;  %v922_v13 = vadd.f32 0.18741608, %v921_v4  ;;  %v905_v17 = vand.u32 2147483647, %v895_v53 }
 0x590   :  { %v933_v62 = vadd.f32 0.4994258, %v932_v5  ;;  %vm901_vm7 = vweird.f32 %v895_v53  ;;  %v885_v23 = vmul.f32 %v884_v14, %v1435_v1 }
 0x591   :  { %v908_v19 = vor.u32 1.1754944e-38, %v907_v12  ;;  %v923_v20 = vmul.f32 %v922_v13, %v1452_v25  ;;  %vm906_vm9 = vcmp.eq.f32.partialorder %v905_v17, 8.507059e+37 }
 0x592   :  { %v934_v10 = vmul.f32 %v933_v62, %v1452_v25 }
 0x593   :  { %v924_v29 = vadd.f32 1.1283791, %v923_v20 }
 0x594   :  { %v935_v2 = vadd.f32 1.0, %v934_v10 }
 0x595   :  { %v1120_v3 = vpop.eup %1119  ;;  %v925_v1 = vmul.f32 %v924_v29, %v1446_v15 }
 0x596   :  { %v897_v7 = vmul.f32 %v1120_v3, %v895_v53  ;;  %1121 = vrcp.f32 %v935_v2  ;;  %vm902_vm6 = vweird.f32 %v1120_v3  ;;  %v947_v28 = vand.u32 2147483648, %v935_v2 }
 0x597   :  { %vm903_vm8 = vmor %vm901_vm7, %vm902_vm6  ;;  %v945_v31 = vand.u32 2147483647, %v935_v2  ;;  %vm941_vm11 = vweird.f32 %v935_v2 }
 0x598   :  { %v898_v11 = vsub.f32 1.0, %v897_v7  ;;  %v948_v25 = vor.u32 1.1754944e-38, %v947_v28 }
 0x599   :  { %vm946_vm13 = vcmp.eq.f32.partialorder %v945_v31, 8.507059e+37 }
 0x59a   :  { %v899_v16 = vmul.f32 %v1120_v3, %v898_v11 }
 0x59c   :  { %v1122_v22 = vpop.eup %1121  ;;  %v900_v18 = vadd.f32 %v1120_v3, %v899_v16 }
 0x59d   :  { %v937_v21 = vmul.f32 %v1122_v22, %v935_v2  ;;  %vm942_vm10 = vweird.f32 %v1122_v22 }
 0x59e   :  { %v904_v8 = vsel %vm903_vm8, %v1120_v3, %v900_v18  ;;  %vm943_vm12 = vmor %vm941_vm11, %vm942_vm10 }
 0x59f   :  { %v909_v24 = vsel %vm906_vm9, %v908_v19, %v904_v8  ;;  %v938_v26 = vsub.f32 1.0, %v937_v21 }
 0x5a0   :  { %v910_v27 = vmul.f32 %v909_v24, %v885_v23 }
 0x5a1   :  { %v939_v30 = vmul.f32 %v1122_v22, %v938_v26 }
 0x5a2   :  { %v1090_v32 = vclamps-f32 %v910_v27, 1.0 }
 0x5a3   :  { %v940_v33 = vadd.f32 %v1122_v22, %v939_v30 }
 0x5a4   :  { %v953_v35 = vadd.f32 1.0, %v1090_v32 }
 0x5a5   :  { %v944_v36 = vsel %vm943_vm12, %v1122_v22, %v940_v33 }
 0x5a6   :  { %v955_v37 = vmul.f32 %v953_v35, %v869_v34  ;;  %v949_v38 = vsel %vm946_vm13, %v948_v25, %v944_v36 }
 0x5a7   :  { %v950_v39 = vmul.f32 %v949_v38, %v925_v1 }
 0x5a8   :  { %1006 = vmatmul.f32.vlgmr.msrb.gmra.mxu3 %v955_v37 }
 0x5a9   :  { %v1091_v40 = vclamps-f32 %v950_v39, 1.0 }
 0x5ab   :  { %v954_v42 = vadd.f32 1.0, %v1091_v40 }
 0x5ad   :  { %v956_v43 = vmul.f32 %v954_v42, %v870_v41 }
 0x5af   :  { %1026 = vmatmul.f32.vlgmr.msra.gmra.mxu0 %v956_v43 }
 0x62b   :  { %v1007_v50 = vpop.f32.mrf.mxu3 }
 0x62c   :  { %v1008_v47 = vadd.f32 %v1007_v50, %v989_v45  ;;  %v1027_v48 = vpop.f32.mrf.mxu0 }
 0x62e   :  { %v1028_v49 = vadd.f32 %v1027_v48, %v1008_v47 }
 0x630   :  { %v1033_v15 = vmul.f32 %v1028_v49, %v1028_v49  ;;  %v1050_v52 = vand.u32 2147483647, %v1028_v49  ;;  %v1049_v7 = vmax.f32 %v1028_v49, 0.0 }
 0x632   :  { %v1034_v51 = vsel %vm1032_vm14, %v1033_v15, 0.0  ;;  %v1051_v55 = vsub.f32 0.0, %v1050_v52 }
 0x633   :  { %1035 = vadd.xlane.f32.xlu0 %v1034_v51 }
 0x634   :  { %v1052_v56 = vmul.f32 1.442695, %v1051_v55 }
 0x636   :  { %1123 = vpow2.f32 %v1052_v56 }
 0x63c   :  { %v1124_v9 = vpop.eup %1123 }
 0x63d   :  { %v1054_v58 = vadd.f32 1.0, %v1124_v9  ;;  %v1057_v53 = vmul.f32 -0.5, %v1124_v9  ;;  %v1060_v63 = vand.u32 2147483647, %v1124_v9 }
 0x63f   :  { %v1058_v62 = vadd.f32 1.0, %v1057_v53  ;;  %vm1061_vm0 = vcmp.lt.f32.partialorder %v1060_v63, 0.0004427343 }
 0x641   :  { %v1059_v3 = vmul.f32 %v1124_v9, %v1058_v62 }
 0x6a6   :  { %v1036_v54 = vpop.xlane.xlu0 %1035 }
 0x6a7   :  { %v1037_v57 = vmax.f32 %v1036_v54, 1e-24 }
 0x6a9   :  { %1125 = vrsqrt.f32 %v1037_v57  ;;  %vm1044_vm1 = vweird.f32 %v1037_v57 }
 0x6aa   :  { %1127 = vlog2.f32 %v1054_v58 }
 0x6af   :  { %v1126_v59 = vpop.eup %1125 }
 0x6b0   :  { %v1039_v60 = vmul.f32 %v1126_v59, %v1037_v57  ;;  %v1128_v61 = vpop.eup %1127  ;;  %vm1045_vm15 = vweird.f32 %v1126_v59 }
 0x6b1   :  { %v1056_v10 = vmul.f32 0.6931472, %v1128_v61  ;;  %vm1046_vm2 = vmor %vm1044_vm1, %vm1045_vm15 }
 0x6b2   :  { %v1040_v5 = vmul.f32 %v1126_v59, %v1039_v60 }
 0x6b3   :  { %v1062_v6 = vsel %vm1061_vm0, %v1059_v3, %v1056_v10 }
 0x6b4   :  { %v1041_v0 = vmul.f32 0.5, %v1040_v5  ;;  %v1063_v13 = vadd.f32 %v1062_v6, %v1049_v7 }
 0x6b6   :  { %v1042_v2 = vsub.f32 1.5, %v1041_v0 }
 0x6b8   :  { %v1043_v4 = vmul.f32 %v1126_v59, %v1042_v2 }
 0x6ba   :  { %v1047_v11 = vsel %vm1046_vm2, %v1126_v59, %v1043_v4 }
 0x6bb   :  { %v1048_v12 = vmul.f32 %v1047_v11, %v1028_v49 }
 0x6bd   :  { %v1064_v14 = vsel %vm1032_vm14, %v1048_v12, %v1063_v13 }
 0x6be   :  { %1065 = vst [vmem:[#allocation13] sm:$0xff] %v1064_v14 }
 0x6bf   :  { %1076 = dma.vmem_to_hbm [thread:$0]  %s1072_s5, 128, %s1074_s7, [#allocation4]  }
 0x6c0   :  { %1305 = dma.done.wait [#allocation4], 128  }
 0x6c1   :  { %1306 = vsyncadd [#allocation4], 4294967168 }
 0x6c2   :  { %1081 = vsyncpa [#allocation3], 1 }
 0x6c3   :  { %1082 = vsyncpa [#allocation6], 1 }
 0x6c4   :  { %1083 = vsyncpa [#allocation9], 1 }
 0x6c5   :  { %1084 = vsyncpa [#allocation12], 1 }
 0x6c6   :  { %1085 = vsyncpa [#allocation4], 1 }

</bundles_post_ra>
